<compile_context>
chip_gen: v5e
topology: v5e:2x2
jax: 0.10.0
libtpu: 0.0.40
codegen_flags: <defaults>
</compile_context>

<pallas_src>
import jax
import jax.numpy as jnp
from jax import lax
from jax.experimental import pallas as pl
from jax.experimental.pallas import tpu as pltpu


def _upconv_kernel(x_ref, w_ref, scale_ref, shift_ref, o_ref, acc_ref):
    """Fused sub-pixel 3x3-conv-on-2x-upsample + BN affine + ReLU.

    x_ref:     (1, H+2, W+2, Cin)   original-res input, zero-padded by 1 (NHWC)
    w_ref:     (4, 4, Cin, Cout)    folded weights [phase = py*2+px, tap = r*2+c]
    scale_ref: (1, Cout)            gamma / sqrt(var + eps)
    shift_ref: (1, Cout)            beta + (bias - mean) * scale
    o_ref:     (1, 4, TH, W, Cout)  phase-separated output row tile
    acc_ref:   (TH, W, Cout) f32    VMEM scratch accumulator
    """
    TH = o_ref.shape[2]
    W = o_ref.shape[3]
    i0 = pl.program_id(1) * TH          # first output row of this tile (orig res)

    scale = scale_ref[0]                # (Cout,) f32, loaded once
    shift = shift_ref[0]

    # Output pixel (2i+py, 2j+px) = sum over 2x2 taps (r, c) of
    #   x_pad[i + r + py, j + c + px, :] @ w_folded[py*2+px, r*2+c]
    for py in range(2):
        for px in range(2):
            phase = py * 2 + px
            acc_ref[...] = jnp.zeros_like(acc_ref)
            for r in range(2):
                for c in range(2):
                    row0 = i0 + r + py                       # dynamic (major dim)
                    col0 = c + px                            # static in {0,1,2}
                    patch = x_ref[0, pl.ds(row0, TH), col0:col0 + W, :]
                    acc_ref[...] += jnp.einsum(
                        "hwi,io->hwo", patch, w_ref[phase, r * 2 + c],
                        preferred_element_type=jnp.float32)
            y = acc_ref[...] * scale + shift                 # BN affine (+ bias), f32
            # NOTE: for narrow Cout (< 128) these stores are lane-masked; realistic
            # U-Net up_conv layers (Cout >= 128) are lane-dense here.
            o_ref[0, phase] = jnp.maximum(y, 0.0).astype(o_ref.dtype)


def _pick_tile_h(H, W, Cout):
    """Largest row tile (divisor of H) whose output block stays small, preferring
    >= 2 row tiles so the pipeline / megacore has work to overlap."""
    out_block_budget = 4 * 1024 * 1024                       # bytes, per out block
    divs = [d for d in range(1, H + 1) if H % d == 0]
    cands = [d for d in divs if d < H] or divs
    fit = [d for d in cands if 4 * d * W * Cout * 4 <= out_block_budget]
    return max(fit) if fit else min(cands)


def up_conv_forward(x_nchw, params, eps=1e-5, compute_dtype=jnp.bfloat16,
                    tile_h=None):
    """Forward pass of up_conv. x_nchw: (N, Cin, H, W) -> (N, Cout, 2H, 2W)."""
    w, b, gamma, beta, running_mean, running_var = (
        params["weight"], params["bias"], params["gamma"], params["beta"],
        params["running_mean"], params["running_var"])

    N, Cin, H, W = x_nchw.shape
    Cout = w.shape[0]

    # ---- layout glue: NCHW -> NHWC, pad original resolution by 1 (tiny) ----
    x = jnp.transpose(x_nchw, (0, 2, 3, 1))                  # (N, H, W, Cin)
    x_pad = jnp.pad(x, ((0, 0), (1, 1), (1, 1), (0, 0))).astype(compute_dtype)

    # ---- fold conv bias + BN (inference) into per-channel scale/shift ----
    scale = (gamma / jnp.sqrt(running_var + eps)).astype(jnp.float32)   # (Cout,)
    shift = (beta + (b - running_mean) * scale).astype(jnp.float32)     # (Cout,)
    scale2 = scale.reshape(1, Cout)
    shift2 = shift.reshape(1, Cout)

    # ---- sub-pixel weight folding: (Cout,Cin,3,3) -> (4 phases, 4 taps, Cin, Cout)
    # Phase p along one axis: p=0 uses input offsets {-1,0} with weights
    # {w0, w1+w2}; p=1 uses offsets {0,+1} with weights {w0+w1, w2}.
    w33 = jnp.transpose(w, (2, 3, 1, 0)).astype(jnp.float32)            # (3,3,Cin,Cout)
    F = jnp.array([[[1., 0., 0.], [0., 1., 1.]],
                   [[1., 1., 0.], [0., 0., 1.]]], jnp.float32)          # (phase, tap, k)
    w_eff = jnp.einsum("prk,qcl,klio->pqrcio", F, F, w33)               # (2,2,2,2,Cin,Cout)
    w_eff = w_eff.reshape(4, 4, Cin, Cout).astype(compute_dtype)

    # ---- tiling / VMEM sizing (v7x-safe, still large tiles for v5e/v6e) ----
    TH = tile_h if tile_h is not None else _pick_tile_h(H, W, Cout)
    assert H % TH == 0, (H, TH)
    nT = H // TH

    itemsize = jnp.dtype(compute_dtype).itemsize
    in_block = (H + 2) * (W + 2) * Cin * itemsize
    out_block = 4 * TH * W * Cout * 4
    est = 2 * in_block + 2 * out_block + 16 * Cin * Cout * itemsize \
        + TH * W * Cout * 4 + (1 << 20)
    vmem_limit = int(min(max(2 * est, 32 * 1024 * 1024), 64 * 1024 * 1024))

    phases = pl.pallas_call(
        _upconv_kernel,
        out_shape=jax.ShapeDtypeStruct((N, 4, H, W, Cout), jnp.float32),
        grid_spec=pltpu.PrefetchScalarGridSpec(
            num_scalar_prefetch=0,
            grid=(N, nT),
            in_specs=[
                # whole (small) padded image; block index constant along t -> no
                # re-fetch across row tiles, fetched once per batch element.
                pl.BlockSpec((1, H + 2, W + 2, Cin), lambda n, t: (n, 0, 0, 0)),
                pl.BlockSpec((4, 4, Cin, Cout), lambda n, t: (0, 0, 0, 0)),
                pl.BlockSpec((1, Cout), lambda n, t: (0, 0)),
                pl.BlockSpec((1, Cout), lambda n, t: (0, 0)),
            ],
            out_specs=pl.BlockSpec((1, 4, TH, W, Cout),
                                   lambda n, t: (n, 0, t, 0, 0)),
            scratch_shapes=[pltpu.VMEM((TH, W, Cout), jnp.float32)],
        ),
        compiler_params=pltpu.CompilerParams(
            dimension_semantics=("parallel", "parallel"),
            vmem_limit_bytes=vmem_limit),
    )(x_pad, w_eff, scale2, shift2)

    # ---- interleave phases + NHWC->NCHW in a single transpose (output glue) ----
    # out[n, o, 2i+py, 2j+px] = phases[n, py*2+px, i, j, o]
    y = phases.reshape(N, 2, 2, H, W, Cout)
    y = jnp.transpose(y, (0, 5, 3, 1, 4, 2)).reshape(N, Cout, 2 * H, 2 * W)
    # Dropout2d: identity in eval mode.
    return y


def _reference(x_nchw, params, eps=1e-5):
    """Pure-JAX reference (XLA conv on the materialized upsample) for checking."""
    w, b, gamma, beta, rm, rv = (
        params["weight"], params["bias"], params["gamma"], params["beta"],
        params["running_mean"], params["running_var"])
    x = jnp.transpose(x_nchw, (0, 2, 3, 1))
    x = jnp.repeat(jnp.repeat(x, 2, axis=1), 2, axis=2)
    w_hwio = jnp.transpose(w, (2, 3, 1, 0))                  # (3,3,Cin,Cout)
    y = lax.conv_general_dilated(
        x, w_hwio, window_strides=(1, 1), padding="SAME",
        dimension_numbers=("NHWC", "HWIO", "NHWC"))
    y = y + b
    y = (y - rm) / jnp.sqrt(rv + eps) * gamma + beta
    y = jnp.maximum(y, 0.0)
    return jnp.transpose(y, (0, 3, 1, 2))


def make_params(key, ch_in, ch_out):
    k1, k2, k3, k4, k5, k6 = jax.random.split(key, 6)
    fan_in = ch_in * 3 * 3
    return {
        "weight": jax.random.normal(k1, (ch_out, ch_in, 3, 3), jnp.float32)
                  / jnp.sqrt(fan_in),
        "bias": 0.1 * jax.random.normal(k2, (ch_out,), jnp.float32),
        "gamma": 1.0 + 0.1 * jax.random.normal(k3, (ch_out,), jnp.float32),
        "beta": 0.1 * jax.random.normal(k4, (ch_out,), jnp.float32),
        "running_mean": 0.1 * jax.random.normal(k5, (ch_out,), jnp.float32),
        "running_var": jnp.abs(jax.random.normal(k6, (ch_out,), jnp.float32)) + 0.5,
    }


if __name__ == "__main__":
    key = jax.random.PRNGKey(0)
    kx, kp = jax.random.split(key)

    N, CH_IN, CH_OUT, H, W = 2, 4, 8, 16, 16                 # output spatial: 32x32
    x = jax.random.normal(kx, (N, CH_IN, H, W), jnp.float32)
    params = make_params(kp, CH_IN, CH_OUT)

    ref = jax.block_until_ready(_reference(x, params))

    # f32 MXU path: tight tolerance vs. the XLA-conv reference.
    out_f32 = jax.block_until_ready(
        up_conv_forward(x, params, compute_dtype=jnp.float32))
    assert out_f32.shape == (N, CH_OUT, 2 * H, 2 * W), out_f32.shape
    assert jnp.allclose(out_f32, ref, atol=1e-4, rtol=1e-4), \
        float(jnp.max(jnp.abs(out_f32 - ref)))

    # bf16 MXU path (default, per perf review): looser tolerance.
    out_bf16 = jax.block_until_ready(up_conv_forward(x, params))
    assert out_bf16.shape == (N, CH_OUT, 2 * H, 2 * W), out_bf16.shape
    assert jnp.allclose(out_bf16, ref, atol=5e-2, rtol=5e-2), \
        float(jnp.max(jnp.abs(out_bf16 - ref)))

    print("KERNEL_OK")
</pallas_src>

<mosaic_0001>
module attributes {stable_mosaic.version = 11 : i64} {
  func.func @_upconv_kernel(%arg0: i32, %arg1: i32, %arg2: memref<1x18x18x4xf32, #tpu.memory_space<vmem>>, %arg3: memref<4x4x4x8xf32, #tpu.memory_space<vmem>>, %arg4: memref<1x8xf32, #tpu.memory_space<vmem>>, %arg5: memref<1x8xf32, #tpu.memory_space<vmem>>, %arg6: memref<1x4x8x16x8xf32, #tpu.memory_space<vmem>>, %arg7: memref<8x16x8xf32, #tpu.memory_space<vmem>>) attributes {dimension_semantics = [#tpu.dimension_semantics<parallel>, #tpu.dimension_semantics<parallel>], iteration_bounds = array<i64: 2, 2>, scalar_prefetch = 0 : i64, scratch_operands = 1 : i64, tpu.core_type = #tpu.core_type<tc>, window_params = [{transform_indices = @transform_0, window_bounds = array<i64: 1, 18, 18, 4>}, {pipeline_mode = #tpu.pipeline_mode<synchronous>, transform_indices = @transform_1, window_bounds = array<i64: 4, 4, 4, 8>}, {pipeline_mode = #tpu.pipeline_mode<synchronous>, transform_indices = @transform_2, window_bounds = array<i64: 1, 8>}, {pipeline_mode = #tpu.pipeline_mode<synchronous>, transform_indices = @transform_3, window_bounds = array<i64: 1, 8>}, {transform_indices = @transform_4, window_bounds = array<i64: 1, 4, 8, 16, 8>}]} {
    %c8_i32 = arith.constant 8 : i32
    %0 = arith.muli %arg1, %c8_i32 : i32
    %c0 = arith.constant 0 : index
    %c0_0 = arith.constant 0 : index
    %1 = vector.load %arg4[%c0, %c0_0] : memref<1x8xf32, #tpu.memory_space<vmem>>, vector<1x8xf32>
    %2 = vector.shape_cast %1 : vector<1x8xf32> to vector<8xf32>
    %c0_1 = arith.constant 0 : index
    %c0_2 = arith.constant 0 : index
    %3 = vector.load %arg5[%c0_1, %c0_2] : memref<1x8xf32, #tpu.memory_space<vmem>>, vector<1x8xf32>
    %4 = vector.shape_cast %3 : vector<1x8xf32> to vector<8xf32>
    %cst = arith.constant 0.000000e+00 : f32
    %5 = vector.broadcast %cst : f32 to vector<8x16x8xf32>
    %c0_3 = arith.constant 0 : index
    %c0_4 = arith.constant 0 : index
    %c0_5 = arith.constant 0 : index
    %6 = vector.load %arg7[%c0_3, %c0_4, %c0_5] : memref<8x16x8xf32, #tpu.memory_space<vmem>>, vector<8x16x8xf32>
    tpu.vector_store %arg7[%c0_3, %c0_4, %c0_5], %5 {strides = array<i32>} : memref<8x16x8xf32, #tpu.memory_space<vmem>>, vector<8x16x8xf32>,
    %c0_i32 = arith.constant 0 : i32
    %7 = arith.addi %0, %c0_i32 : i32
    %c0_i32_6 = arith.constant 0 : i32
    %8 = arith.addi %7, %c0_i32_6 : i32
    %c0_7 = arith.constant 0 : index
    %9 = arith.index_cast %8 : i32 to index
    %c0_8 = arith.constant 0 : index
    %c0_9 = arith.constant 0 : index
    %10 = vector.load %arg2[%c0_7, %9, %c0_8, %c0_9] : memref<1x18x18x4xf32, #tpu.memory_space<vmem>>, vector<1x8x16x4xf32>
    %11 = vector.shape_cast %10 : vector<1x8x16x4xf32> to vector<8x16x4xf32>
    %c0_10 = arith.constant 0 : index
    %c0_11 = arith.constant 0 : index
    %c0_12 = arith.constant 0 : index
    %12 = vector.load %arg7[%c0_10, %c0_11, %c0_12] : memref<8x16x8xf32, #tpu.memory_space<vmem>>, vector<8x16x8xf32>
    %c0_13 = arith.constant 0 : index
    %c0_14 = arith.constant 0 : index
    %c0_15 = arith.constant 0 : index
    %c0_16 = arith.constant 0 : index
    %13 = vector.load %arg3[%c0_13, %c0_14, %c0_15, %c0_16] : memref<4x4x4x8xf32, #tpu.memory_space<vmem>>, vector<1x1x4x8xf32>
    %14 = vector.shape_cast %13 : vector<1x1x4x8xf32> to vector<4x8xf32>
    "tpu.trace_start"() <{level = 10 : i32, message = "hwi,io->hwo"}> : () -> ()
    %cst_17 = arith.constant dense<0.000000e+00> : vector<8x16x8xf32>
    %15 = tpu.matmul %11, %14, %cst_17 {dimension_numbers = #tpu.dot_dimension_numbers<[2], [0], [0, 1], [1], [0, 0, 0, 1, 1, 1], [], []>} : vector<8x16x4xf32>, vector<4x8xf32>, vector<8x16x8xf32> -> vector<8x16x8xf32>
    "tpu.trace_stop"() : () -> ()
    %16 = arith.addf %12, %15 : vector<8x16x8xf32>
    %c0_18 = arith.constant 0 : index
    %c0_19 = arith.constant 0 : index
    %c0_20 = arith.constant 0 : index
    %17 = vector.load %arg7[%c0_18, %c0_19, %c0_20] : memref<8x16x8xf32, #tpu.memory_space<vmem>>, vector<8x16x8xf32>
    tpu.vector_store %arg7[%c0_18, %c0_19, %c0_20], %16 {strides = array<i32>} : memref<8x16x8xf32, #tpu.memory_space<vmem>>, vector<8x16x8xf32>,
    %c0_i32_21 = arith.constant 0 : i32
    %18 = arith.addi %0, %c0_i32_21 : i32
    %c0_i32_22 = arith.constant 0 : i32
    %19 = arith.addi %18, %c0_i32_22 : i32
    %c0_23 = arith.constant 0 : index
    %20 = arith.index_cast %19 : i32 to index
    %c1 = arith.constant 1 : index
    %c0_24 = arith.constant 0 : index
    %21 = vector.load %arg2[%c0_23, %20, %c1, %c0_24] : memref<1x18x18x4xf32, #tpu.memory_space<vmem>>, vector<1x8x16x4xf32>
    %22 = vector.shape_cast %21 : vector<1x8x16x4xf32> to vector<8x16x4xf32>
    %c0_25 = arith.constant 0 : index
    %c0_26 = arith.constant 0 : index
    %c0_27 = arith.constant 0 : index
    %23 = vector.load %arg7[%c0_25, %c0_26, %c0_27] : memref<8x16x8xf32, #tpu.memory_space<vmem>>, vector<8x16x8xf32>
    %c0_28 = arith.constant 0 : index
    %c1_29 = arith.constant 1 : index
    %c0_30 = arith.constant 0 : index
    %c0_31 = arith.constant 0 : index
    %24 = vector.load %arg3[%c0_28, %c1_29, %c0_30, %c0_31] : memref<4x4x4x8xf32, #tpu.memory_space<vmem>>, vector<1x1x4x8xf32>
    %25 = vector.shape_cast %24 : vector<1x1x4x8xf32> to vector<4x8xf32>
    "tpu.trace_start"() <{level = 10 : i32, message = "hwi,io->hwo"}> : () -> ()
    %cst_32 = arith.constant dense<0.000000e+00> : vector<8x16x8xf32>
    %26 = tpu.matmul %22, %25, %cst_32 {dimension_numbers = #tpu.dot_dimension_numbers<[2], [0], [0, 1], [1], [0, 0, 0, 1, 1, 1], [], []>} : vector<8x16x4xf32>, vector<4x8xf32>, vector<8x16x8xf32> -> vector<8x16x8xf32>
    "tpu.trace_stop"() : () -> ()
    %27 = arith.addf %23, %26 : vector<8x16x8xf32>
    %c0_33 = arith.constant 0 : index
    %c0_34 = arith.constant 0 : index
    %c0_35 = arith.constant 0 : index
    %28 = vector.load %arg7[%c0_33, %c0_34, %c0_35] : memref<8x16x8xf32, #tpu.memory_space<vmem>>, vector<8x16x8xf32>
    tpu.vector_store %arg7[%c0_33, %c0_34, %c0_35], %27 {strides = array<i32>} : memref<8x16x8xf32, #tpu.memory_space<vmem>>, vector<8x16x8xf32>,
    %c1_i32 = arith.constant 1 : i32
    %29 = arith.addi %0, %c1_i32 : i32
    %c0_i32_36 = arith.constant 0 : i32
    %30 = arith.addi %29, %c0_i32_36 : i32
    %c0_37 = arith.constant 0 : index
    %31 = arith.index_cast %30 : i32 to index
    %c0_38 = arith.constant 0 : index
    %c0_39 = arith.constant 0 : index
    %32 = vector.load %arg2[%c0_37, %31, %c0_38, %c0_39] : memref<1x18x18x4xf32, #tpu.memory_space<vmem>>, vector<1x8x16x4xf32>
    %33 = vector.shape_cast %32 : vector<1x8x16x4xf32> to vector<8x16x4xf32>
    %c0_40 = arith.constant 0 : index
    %c0_41 = arith.constant 0 : index
    %c0_42 = arith.constant 0 : index
    %34 = vector.load %arg7[%c0_40, %c0_41, %c0_42] : memref<8x16x8xf32, #tpu.memory_space<vmem>>, vector<8x16x8xf32>
    %c0_43 = arith.constant 0 : index
    %c2 = arith.constant 2 : index
    %c0_44 = arith.constant 0 : index
    %c0_45 = arith.constant 0 : index
    %35 = vector.load %arg3[%c0_43, %c2, %c0_44, %c0_45] : memref<4x4x4x8xf32, #tpu.memory_space<vmem>>, vector<1x1x4x8xf32>
    %36 = vector.shape_cast %35 : vector<1x1x4x8xf32> to vector<4x8xf32>
    "tpu.trace_start"() <{level = 10 : i32, message = "hwi,io->hwo"}> : () -> ()
    %cst_46 = arith.constant dense<0.000000e+00> : vector<8x16x8xf32>
    %37 = tpu.matmul %33, %36, %cst_46 {dimension_numbers = #tpu.dot_dimension_numbers<[2], [0], [0, 1], [1], [0, 0, 0, 1, 1, 1], [], []>} : vector<8x16x4xf32>, vector<4x8xf32>, vector<8x16x8xf32> -> vector<8x16x8xf32>
    "tpu.trace_stop"() : () -> ()
    %38 = arith.addf %34, %37 : vector<8x16x8xf32>
    %c0_47 = arith.constant 0 : index
    %c0_48 = arith.constant 0 : index
    %c0_49 = arith.constant 0 : index
    %39 = vector.load %arg7[%c0_47, %c0_48, %c0_49] : memref<8x16x8xf32, #tpu.memory_space<vmem>>, vector<8x16x8xf32>
    tpu.vector_store %arg7[%c0_47, %c0_48, %c0_49], %38 {strides = array<i32>} : memref<8x16x8xf32, #tpu.memory_space<vmem>>, vector<8x16x8xf32>,
    %c1_i32_50 = arith.constant 1 : i32
    %40 = arith.addi %0, %c1_i32_50 : i32
    %c0_i32_51 = arith.constant 0 : i32
    %41 = arith.addi %40, %c0_i32_51 : i32
    %c0_52 = arith.constant 0 : index
    %42 = arith.index_cast %41 : i32 to index
    %c1_53 = arith.constant 1 : index
    %c0_54 = arith.constant 0 : index
    %43 = vector.load %arg2[%c0_52, %42, %c1_53, %c0_54] : memref<1x18x18x4xf32, #tpu.memory_space<vmem>>, vector<1x8x16x4xf32>
    %44 = vector.shape_cast %43 : vector<1x8x16x4xf32> to vector<8x16x4xf32>
    %c0_55 = arith.constant 0 : index
    %c0_56 = arith.constant 0 : index
    %c0_57 = arith.constant 0 : index
    %45 = vector.load %arg7[%c0_55, %c0_56, %c0_57] : memref<8x16x8xf32, #tpu.memory_space<vmem>>, vector<8x16x8xf32>
    %c0_58 = arith.constant 0 : index
    %c3 = arith.constant 3 : index
    %c0_59 = arith.constant 0 : index
    %c0_60 = arith.constant 0 : index
    %46 = vector.load %arg3[%c0_58, %c3, %c0_59, %c0_60] : memref<4x4x4x8xf32, #tpu.memory_space<vmem>>, vector<1x1x4x8xf32>
    %47 = vector.shape_cast %46 : vector<1x1x4x8xf32> to vector<4x8xf32>
    "tpu.trace_start"() <{level = 10 : i32, message = "hwi,io->hwo"}> : () -> ()
    %cst_61 = arith.constant dense<0.000000e+00> : vector<8x16x8xf32>
    %48 = tpu.matmul %44, %47, %cst_61 {dimension_numbers = #tpu.dot_dimension_numbers<[2], [0], [0, 1], [1], [0, 0, 0, 1, 1, 1], [], []>} : vector<8x16x4xf32>, vector<4x8xf32>, vector<8x16x8xf32> -> vector<8x16x8xf32>
    "tpu.trace_stop"() : () -> ()
    %49 = arith.addf %45, %48 : vector<8x16x8xf32>
    %c0_62 = arith.constant 0 : index
    %c0_63 = arith.constant 0 : index
    %c0_64 = arith.constant 0 : index
    %50 = vector.load %arg7[%c0_62, %c0_63, %c0_64] : memref<8x16x8xf32, #tpu.memory_space<vmem>>, vector<8x16x8xf32>
    tpu.vector_store %arg7[%c0_62, %c0_63, %c0_64], %49 {strides = array<i32>} : memref<8x16x8xf32, #tpu.memory_space<vmem>>, vector<8x16x8xf32>,
    %c0_65 = arith.constant 0 : index
    %c0_66 = arith.constant 0 : index
    %c0_67 = arith.constant 0 : index
    %51 = vector.load %arg7[%c0_65, %c0_66, %c0_67] : memref<8x16x8xf32, #tpu.memory_space<vmem>>, vector<8x16x8xf32>
    %52 = vector.shape_cast %2 : vector<8xf32> to vector<1x1x8xf32>
    %53 = vector.broadcast %52 : vector<1x1x8xf32> to vector<8x16x8xf32>
    %54 = arith.mulf %51, %53 : vector<8x16x8xf32>
    %55 = vector.shape_cast %4 : vector<8xf32> to vector<1x1x8xf32>
    %56 = vector.broadcast %55 : vector<1x1x8xf32> to vector<8x16x8xf32>
    %57 = arith.addf %54, %56 : vector<8x16x8xf32>
    %cst_68 = arith.constant 0.000000e+00 : f32
    %58 = vector.broadcast %cst_68 : f32 to vector<8x16x8xf32>
    %59 = arith.maximumf %57, %58 : vector<8x16x8xf32>
    %c0_69 = arith.constant 0 : index
    %c0_70 = arith.constant 0 : index
    %c0_71 = arith.constant 0 : index
    %c0_72 = arith.constant 0 : index
    %c0_73 = arith.constant 0 : index
    %60 = vector.load %arg6[%c0_69, %c0_70, %c0_71, %c0_72, %c0_73] : memref<1x4x8x16x8xf32, #tpu.memory_space<vmem>>, vector<1x1x8x16x8xf32>
    %61 = vector.shape_cast %60 : vector<1x1x8x16x8xf32> to vector<8x16x8xf32>
    %62 = vector.shape_cast %59 : vector<8x16x8xf32> to vector<1x1x8x16x8xf32>
    tpu.vector_store %arg6[%c0_69, %c0_70, %c0_71, %c0_72, %c0_73], %62 {strides = array<i32>} : memref<1x4x8x16x8xf32, #tpu.memory_space<vmem>>, vector<1x1x8x16x8xf32>,
    %cst_74 = arith.constant 0.000000e+00 : f32
    %63 = vector.broadcast %cst_74 : f32 to vector<8x16x8xf32>
    %c0_75 = arith.constant 0 : index
    %c0_76 = arith.constant 0 : index
    %c0_77 = arith.constant 0 : index
    %64 = vector.load %arg7[%c0_75, %c0_76, %c0_77] : memref<8x16x8xf32, #tpu.memory_space<vmem>>, vector<8x16x8xf32>
    tpu.vector_store %arg7[%c0_75, %c0_76, %c0_77], %63 {strides = array<i32>} : memref<8x16x8xf32, #tpu.memory_space<vmem>>, vector<8x16x8xf32>,
    %c0_i32_78 = arith.constant 0 : i32
    %65 = arith.addi %0, %c0_i32_78 : i32
    %c0_i32_79 = arith.constant 0 : i32
    %66 = arith.addi %65, %c0_i32_79 : i32
    %c0_80 = arith.constant 0 : index
    %67 = arith.index_cast %66 : i32 to index
    %c1_81 = arith.constant 1 : index
    %c0_82 = arith.constant 0 : index
    %68 = vector.load %arg2[%c0_80, %67, %c1_81, %c0_82] : memref<1x18x18x4xf32, #tpu.memory_space<vmem>>, vector<1x8x16x4xf32>
    %69 = vector.shape_cast %68 : vector<1x8x16x4xf32> to vector<8x16x4xf32>
    %c0_83 = arith.constant 0 : index
    %c0_84 = arith.constant 0 : index
    %c0_85 = arith.constant 0 : index
    %70 = vector.load %arg7[%c0_83, %c0_84, %c0_85] : memref<8x16x8xf32, #tpu.memory_space<vmem>>, vector<8x16x8xf32>
    %c1_86 = arith.constant 1 : index
    %c0_87 = arith.constant 0 : index
    %c0_88 = arith.constant 0 : index
    %c0_89 = arith.constant 0 : index
    %71 = vector.load %arg3[%c1_86, %c0_87, %c0_88, %c0_89] : memref<4x4x4x8xf32, #tpu.memory_space<vmem>>, vector<1x1x4x8xf32>
    %72 = vector.shape_cast %71 : vector<1x1x4x8xf32> to vector<4x8xf32>
    "tpu.trace_start"() <{level = 10 : i32, message = "hwi,io->hwo"}> : () -> ()
    %cst_90 = arith.constant dense<0.000000e+00> : vector<8x16x8xf32>
    %73 = tpu.matmul %69, %72, %cst_90 {dimension_numbers = #tpu.dot_dimension_numbers<[2], [0], [0, 1], [1], [0, 0, 0, 1, 1, 1], [], []>} : vector<8x16x4xf32>, vector<4x8xf32>, vector<8x16x8xf32> -> vector<8x16x8xf32>
    "tpu.trace_stop"() : () -> ()
    %74 = arith.addf %70, %73 : vector<8x16x8xf32>
    %c0_91 = arith.constant 0 : index
    %c0_92 = arith.constant 0 : index
    %c0_93 = arith.constant 0 : index
    %75 = vector.load %arg7[%c0_91, %c0_92, %c0_93] : memref<8x16x8xf32, #tpu.memory_space<vmem>>, vector<8x16x8xf32>
    tpu.vector_store %arg7[%c0_91, %c0_92, %c0_93], %74 {strides = array<i32>} : memref<8x16x8xf32, #tpu.memory_space<vmem>>, vector<8x16x8xf32>,
    %c0_i32_94 = arith.constant 0 : i32
    %76 = arith.addi %0, %c0_i32_94 : i32
    %c0_i32_95 = arith.constant 0 : i32
    %77 = arith.addi %76, %c0_i32_95 : i32
    %c0_96 = arith.constant 0 : index
    %78 = arith.index_cast %77 : i32 to index
    %c2_97 = arith.constant 2 : index
    %c0_98 = arith.constant 0 : index
    %79 = vector.load %arg2[%c0_96, %78, %c2_97, %c0_98] : memref<1x18x18x4xf32, #tpu.memory_space<vmem>>, vector<1x8x16x4xf32>
    %80 = vector.shape_cast %79 : vector<1x8x16x4xf32> to vector<8x16x4xf32>
    %c0_99 = arith.constant 0 : index
    %c0_100 = arith.constant 0 : index
    %c0_101 = arith.constant 0 : index
    %81 = vector.load %arg7[%c0_99, %c0_100, %c0_101] : memref<8x16x8xf32, #tpu.memory_space<vmem>>, vector<8x16x8xf32>
    %c1_102 = arith.constant 1 : index
    %c1_103 = arith.constant 1 : index
    %c0_104 = arith.constant 0 : index
    %c0_105 = arith.constant 0 : index
    %82 = vector.load %arg3[%c1_102, %c1_103, %c0_104, %c0_105] : memref<4x4x4x8xf32, #tpu.memory_space<vmem>>, vector<1x1x4x8xf32>
    %83 = vector.shape_cast %82 : vector<1x1x4x8xf32> to vector<4x8xf32>
    "tpu.trace_start"() <{level = 10 : i32, message = "hwi,io->hwo"}> : () -> ()
    %cst_106 = arith.constant dense<0.000000e+00> : vector<8x16x8xf32>
    %84 = tpu.matmul %80, %83, %cst_106 {dimension_numbers = #tpu.dot_dimension_numbers<[2], [0], [0, 1], [1], [0, 0, 0, 1, 1, 1], [], []>} : vector<8x16x4xf32>, vector<4x8xf32>, vector<8x16x8xf32> -> vector<8x16x8xf32>
    "tpu.trace_stop"() : () -> ()
    %85 = arith.addf %81, %84 : vector<8x16x8xf32>
    %c0_107 = arith.constant 0 : index
    %c0_108 = arith.constant 0 : index
    %c0_109 = arith.constant 0 : index
    %86 = vector.load %arg7[%c0_107, %c0_108, %c0_109] : memref<8x16x8xf32, #tpu.memory_space<vmem>>, vector<8x16x8xf32>
    tpu.vector_store %arg7[%c0_107, %c0_108, %c0_109], %85 {strides = array<i32>} : memref<8x16x8xf32, #tpu.memory_space<vmem>>, vector<8x16x8xf32>,
    %c1_i32_110 = arith.constant 1 : i32
    %87 = arith.addi %0, %c1_i32_110 : i32
    %c0_i32_111 = arith.constant 0 : i32
    %88 = arith.addi %87, %c0_i32_111 : i32
    %c0_112 = arith.constant 0 : index
    %89 = arith.index_cast %88 : i32 to index
    %c1_113 = arith.constant 1 : index
    %c0_114 = arith.constant 0 : index
    %90 = vector.load %arg2[%c0_112, %89, %c1_113, %c0_114] : memref<1x18x18x4xf32, #tpu.memory_space<vmem>>, vector<1x8x16x4xf32>
    %91 = vector.shape_cast %90 : vector<1x8x16x4xf32> to vector<8x16x4xf32>
    %c0_115 = arith.constant 0 : index
    %c0_116 = arith.constant 0 : index
    %c0_117 = arith.constant 0 : index
    %92 = vector.load %arg7[%c0_115, %c0_116, %c0_117] : memref<8x16x8xf32, #tpu.memory_space<vmem>>, vector<8x16x8xf32>
    %c1_118 = arith.constant 1 : index
    %c2_119 = arith.constant 2 : index
    %c0_120 = arith.constant 0 : index
    %c0_121 = arith.constant 0 : index
    %93 = vector.load %arg3[%c1_118, %c2_119, %c0_120, %c0_121] : memref<4x4x4x8xf32, #tpu.memory_space<vmem>>, vector<1x1x4x8xf32>
    %94 = vector.shape_cast %93 : vector<1x1x4x8xf32> to vector<4x8xf32>
    "tpu.trace_start"() <{level = 10 : i32, message = "hwi,io->hwo"}> : () -> ()
    %cst_122 = arith.constant dense<0.000000e+00> : vector<8x16x8xf32>
    %95 = tpu.matmul %91, %94, %cst_122 {dimension_numbers = #tpu.dot_dimension_numbers<[2], [0], [0, 1], [1], [0, 0, 0, 1, 1, 1], [], []>} : vector<8x16x4xf32>, vector<4x8xf32>, vector<8x16x8xf32> -> vector<8x16x8xf32>
    "tpu.trace_stop"() : () -> ()
    %96 = arith.addf %92, %95 : vector<8x16x8xf32>
    %c0_123 = arith.constant 0 : index
    %c0_124 = arith.constant 0 : index
    %c0_125 = arith.constant 0 : index
    %97 = vector.load %arg7[%c0_123, %c0_124, %c0_125] : memref<8x16x8xf32, #tpu.memory_space<vmem>>, vector<8x16x8xf32>
    tpu.vector_store %arg7[%c0_123, %c0_124, %c0_125], %96 {strides = array<i32>} : memref<8x16x8xf32, #tpu.memory_space<vmem>>, vector<8x16x8xf32>,
    %c1_i32_126 = arith.constant 1 : i32
    %98 = arith.addi %0, %c1_i32_126 : i32
    %c0_i32_127 = arith.constant 0 : i32
    %99 = arith.addi %98, %c0_i32_127 : i32
    %c0_128 = arith.constant 0 : index
    %100 = arith.index_cast %99 : i32 to index
    %c2_129 = arith.constant 2 : index
    %c0_130 = arith.constant 0 : index
    %101 = vector.load %arg2[%c0_128, %100, %c2_129, %c0_130] : memref<1x18x18x4xf32, #tpu.memory_space<vmem>>, vector<1x8x16x4xf32>
    %102 = vector.shape_cast %101 : vector<1x8x16x4xf32> to vector<8x16x4xf32>
    %c0_131 = arith.constant 0 : index
    %c0_132 = arith.constant 0 : index
    %c0_133 = arith.constant 0 : index
    %103 = vector.load %arg7[%c0_131, %c0_132, %c0_133] : memref<8x16x8xf32, #tpu.memory_space<vmem>>, vector<8x16x8xf32>
    %c1_134 = arith.constant 1 : index
    %c3_135 = arith.constant 3 : index
    %c0_136 = arith.constant 0 : index
    %c0_137 = arith.constant 0 : index
    %104 = vector.load %arg3[%c1_134, %c3_135, %c0_136, %c0_137] : memref<4x4x4x8xf32, #tpu.memory_space<vmem>>, vector<1x1x4x8xf32>
    %105 = vector.shape_cast %104 : vector<1x1x4x8xf32> to vector<4x8xf32>
    "tpu.trace_start"() <{level = 10 : i32, message = "hwi,io->hwo"}> : () -> ()
    %cst_138 = arith.constant dense<0.000000e+00> : vector<8x16x8xf32>
    %106 = tpu.matmul %102, %105, %cst_138 {dimension_numbers = #tpu.dot_dimension_numbers<[2], [0], [0, 1], [1], [0, 0, 0, 1, 1, 1], [], []>} : vector<8x16x4xf32>, vector<4x8xf32>, vector<8x16x8xf32> -> vector<8x16x8xf32>
    "tpu.trace_stop"() : () -> ()
    %107 = arith.addf %103, %106 : vector<8x16x8xf32>
    %c0_139 = arith.constant 0 : index
    %c0_140 = arith.constant 0 : index
    %c0_141 = arith.constant 0 : index
    %108 = vector.load %arg7[%c0_139, %c0_140, %c0_141] : memref<8x16x8xf32, #tpu.memory_space<vmem>>, vector<8x16x8xf32>
    tpu.vector_store %arg7[%c0_139, %c0_140, %c0_141], %107 {strides = array<i32>} : memref<8x16x8xf32, #tpu.memory_space<vmem>>, vector<8x16x8xf32>,
    %c0_142 = arith.constant 0 : index
    %c0_143 = arith.constant 0 : index
    %c0_144 = arith.constant 0 : index
    %109 = vector.load %arg7[%c0_142, %c0_143, %c0_144] : memref<8x16x8xf32, #tpu.memory_space<vmem>>, vector<8x16x8xf32>
    %110 = vector.shape_cast %2 : vector<8xf32> to vector<1x1x8xf32>
    %111 = vector.broadcast %110 : vector<1x1x8xf32> to vector<8x16x8xf32>
    %112 = arith.mulf %109, %111 : vector<8x16x8xf32>
    %113 = vector.shape_cast %4 : vector<8xf32> to vector<1x1x8xf32>
    %114 = vector.broadcast %113 : vector<1x1x8xf32> to vector<8x16x8xf32>
    %115 = arith.addf %112, %114 : vector<8x16x8xf32>
    %cst_145 = arith.constant 0.000000e+00 : f32
    %116 = vector.broadcast %cst_145 : f32 to vector<8x16x8xf32>
    %117 = arith.maximumf %115, %116 : vector<8x16x8xf32>
    %c0_146 = arith.constant 0 : index
    %c1_147 = arith.constant 1 : index
    %c0_148 = arith.constant 0 : index
    %c0_149 = arith.constant 0 : index
    %c0_150 = arith.constant 0 : index
    %118 = vector.load %arg6[%c0_146, %c1_147, %c0_148, %c0_149, %c0_150] : memref<1x4x8x16x8xf32, #tpu.memory_space<vmem>>, vector<1x1x8x16x8xf32>
    %119 = vector.shape_cast %118 : vector<1x1x8x16x8xf32> to vector<8x16x8xf32>
    %120 = vector.shape_cast %117 : vector<8x16x8xf32> to vector<1x1x8x16x8xf32>
    tpu.vector_store %arg6[%c0_146, %c1_147, %c0_148, %c0_149, %c0_150], %120 {strides = array<i32>} : memref<1x4x8x16x8xf32, #tpu.memory_space<vmem>>, vector<1x1x8x16x8xf32>,
    %cst_151 = arith.constant 0.000000e+00 : f32
    %121 = vector.broadcast %cst_151 : f32 to vector<8x16x8xf32>
    %c0_152 = arith.constant 0 : index
    %c0_153 = arith.constant 0 : index
    %c0_154 = arith.constant 0 : index
    %122 = vector.load %arg7[%c0_152, %c0_153, %c0_154] : memref<8x16x8xf32, #tpu.memory_space<vmem>>, vector<8x16x8xf32>
    tpu.vector_store %arg7[%c0_152, %c0_153, %c0_154], %121 {strides = array<i32>} : memref<8x16x8xf32, #tpu.memory_space<vmem>>, vector<8x16x8xf32>,
    %c0_i32_155 = arith.constant 0 : i32
    %123 = arith.addi %0, %c0_i32_155 : i32
    %c1_i32_156 = arith.constant 1 : i32
    %124 = arith.addi %123, %c1_i32_156 : i32
    %c0_157 = arith.constant 0 : index
    %125 = arith.index_cast %124 : i32 to index
    %c0_158 = arith.constant 0 : index
    %c0_159 = arith.constant 0 : index
    %126 = vector.load %arg2[%c0_157, %125, %c0_158, %c0_159] : memref<1x18x18x4xf32, #tpu.memory_space<vmem>>, vector<1x8x16x4xf32>
    %127 = vector.shape_cast %126 : vector<1x8x16x4xf32> to vector<8x16x4xf32>
    %c0_160 = arith.constant 0 : index
    %c0_161 = arith.constant 0 : index
    %c0_162 = arith.constant 0 : index
    %128 = vector.load %arg7[%c0_160, %c0_161, %c0_162] : memref<8x16x8xf32, #tpu.memory_space<vmem>>, vector<8x16x8xf32>
    %c2_163 = arith.constant 2 : index
    %c0_164 = arith.constant 0 : index
    %c0_165 = arith.constant 0 : index
    %c0_166 = arith.constant 0 : index
    %129 = vector.load %arg3[%c2_163, %c0_164, %c0_165, %c0_166] : memref<4x4x4x8xf32, #tpu.memory_space<vmem>>, vector<1x1x4x8xf32>
    %130 = vector.shape_cast %129 : vector<1x1x4x8xf32> to vector<4x8xf32>
    "tpu.trace_start"() <{level = 10 : i32, message = "hwi,io->hwo"}> : () -> ()
    %cst_167 = arith.constant dense<0.000000e+00> : vector<8x16x8xf32>
    %131 = tpu.matmul %127, %130, %cst_167 {dimension_numbers = #tpu.dot_dimension_numbers<[2], [0], [0, 1], [1], [0, 0, 0, 1, 1, 1], [], []>} : vector<8x16x4xf32>, vector<4x8xf32>, vector<8x16x8xf32> -> vector<8x16x8xf32>
    "tpu.trace_stop"() : () -> ()
    %132 = arith.addf %128, %131 : vector<8x16x8xf32>
    %c0_168 = arith.constant 0 : index
    %c0_169 = arith.constant 0 : index
    %c0_170 = arith.constant 0 : index
    %133 = vector.load %arg7[%c0_168, %c0_169, %c0_170] : memref<8x16x8xf32, #tpu.memory_space<vmem>>, vector<8x16x8xf32>
    tpu.vector_store %arg7[%c0_168, %c0_169, %c0_170], %132 {strides = array<i32>} : memref<8x16x8xf32, #tpu.memory_space<vmem>>, vector<8x16x8xf32>,
    %c0_i32_171 = arith.constant 0 : i32
    %134 = arith.addi %0, %c0_i32_171 : i32
    %c1_i32_172 = arith.constant 1 : i32
    %135 = arith.addi %134, %c1_i32_172 : i32
    %c0_173 = arith.constant 0 : index
    %136 = arith.index_cast %135 : i32 to index
    %c1_174 = arith.constant 1 : index
    %c0_175 = arith.constant 0 : index
    %137 = vector.load %arg2[%c0_173, %136, %c1_174, %c0_175] : memref<1x18x18x4xf32, #tpu.memory_space<vmem>>, vector<1x8x16x4xf32>
    %138 = vector.shape_cast %137 : vector<1x8x16x4xf32> to vector<8x16x4xf32>
    %c0_176 = arith.constant 0 : index
    %c0_177 = arith.constant 0 : index
    %c0_178 = arith.constant 0 : index
    %139 = vector.load %arg7[%c0_176, %c0_177, %c0_178] : memref<8x16x8xf32, #tpu.memory_space<vmem>>, vector<8x16x8xf32>
    %c2_179 = arith.constant 2 : index
    %c1_180 = arith.constant 1 : index
    %c0_181 = arith.constant 0 : index
    %c0_182 = arith.constant 0 : index
    %140 = vector.load %arg3[%c2_179, %c1_180, %c0_181, %c0_182] : memref<4x4x4x8xf32, #tpu.memory_space<vmem>>, vector<1x1x4x8xf32>
    %141 = vector.shape_cast %140 : vector<1x1x4x8xf32> to vector<4x8xf32>
    "tpu.trace_start"() <{level = 10 : i32, message = "hwi,io->hwo"}> : () -> ()
    %cst_183 = arith.constant dense<0.000000e+00> : vector<8x16x8xf32>
    %142 = tpu.matmul %138, %141, %cst_183 {dimension_numbers = #tpu.dot_dimension_numbers<[2], [0], [0, 1], [1], [0, 0, 0, 1, 1, 1], [], []>} : vector<8x16x4xf32>, vector<4x8xf32>, vector<8x16x8xf32> -> vector<8x16x8xf32>
    "tpu.trace_stop"() : () -> ()
    %143 = arith.addf %139, %142 : vector<8x16x8xf32>
    %c0_184 = arith.constant 0 : index
    %c0_185 = arith.constant 0 : index
    %c0_186 = arith.constant 0 : index
    %144 = vector.load %arg7[%c0_184, %c0_185, %c0_186] : memref<8x16x8xf32, #tpu.memory_space<vmem>>, vector<8x16x8xf32>
    tpu.vector_store %arg7[%c0_184, %c0_185, %c0_186], %143 {strides = array<i32>} : memref<8x16x8xf32, #tpu.memory_space<vmem>>, vector<8x16x8xf32>,
    %c1_i32_187 = arith.constant 1 : i32
    %145 = arith.addi %0, %c1_i32_187 : i32
    %c1_i32_188 = arith.constant 1 : i32
    %146 = arith.addi %145, %c1_i32_188 : i32
    %c0_189 = arith.constant 0 : index
    %147 = arith.index_cast %146 : i32 to index
    %c0_190 = arith.constant 0 : index
    %c0_191 = arith.constant 0 : index
    %148 = vector.load %arg2[%c0_189, %147, %c0_190, %c0_191] : memref<1x18x18x4xf32, #tpu.memory_space<vmem>>, vector<1x8x16x4xf32>
    %149 = vector.shape_cast %148 : vector<1x8x16x4xf32> to vector<8x16x4xf32>
    %c0_192 = arith.constant 0 : index
    %c0_193 = arith.constant 0 : index
    %c0_194 = arith.constant 0 : index
    %150 = vector.load %arg7[%c0_192, %c0_193, %c0_194] : memref<8x16x8xf32, #tpu.memory_space<vmem>>, vector<8x16x8xf32>
    %c2_195 = arith.constant 2 : index
    %c2_196 = arith.constant 2 : index
    %c0_197 = arith.constant 0 : index
    %c0_198 = arith.constant 0 : index
    %151 = vector.load %arg3[%c2_195, %c2_196, %c0_197, %c0_198] : memref<4x4x4x8xf32, #tpu.memory_space<vmem>>, vector<1x1x4x8xf32>
    %152 = vector.shape_cast %151 : vector<1x1x4x8xf32> to vector<4x8xf32>
    "tpu.trace_start"() <{level = 10 : i32, message = "hwi,io->hwo"}> : () -> ()
    %cst_199 = arith.constant dense<0.000000e+00> : vector<8x16x8xf32>
    %153 = tpu.matmul %149, %152, %cst_199 {dimension_numbers = #tpu.dot_dimension_numbers<[2], [0], [0, 1], [1], [0, 0, 0, 1, 1, 1], [], []>} : vector<8x16x4xf32>, vector<4x8xf32>, vector<8x16x8xf32> -> vector<8x16x8xf32>
    "tpu.trace_stop"() : () -> ()
    %154 = arith.addf %150, %153 : vector<8x16x8xf32>
    %c0_200 = arith.constant 0 : index
    %c0_201 = arith.constant 0 : index
    %c0_202 = arith.constant 0 : index
    %155 = vector.load %arg7[%c0_200, %c0_201, %c0_202] : memref<8x16x8xf32, #tpu.memory_space<vmem>>, vector<8x16x8xf32>
    tpu.vector_store %arg7[%c0_200, %c0_201, %c0_202], %154 {strides = array<i32>} : memref<8x16x8xf32, #tpu.memory_space<vmem>>, vector<8x16x8xf32>,
    %c1_i32_203 = arith.constant 1 : i32
    %156 = arith.addi %0, %c1_i32_203 : i32
    %c1_i32_204 = arith.constant 1 : i32
    %157 = arith.addi %156, %c1_i32_204 : i32
    %c0_205 = arith.constant 0 : index
    %158 = arith.index_cast %157 : i32 to index
    %c1_206 = arith.constant 1 : index
    %c0_207 = arith.constant 0 : index
    %159 = vector.load %arg2[%c0_205, %158, %c1_206, %c0_207] : memref<1x18x18x4xf32, #tpu.memory_space<vmem>>, vector<1x8x16x4xf32>
    %160 = vector.shape_cast %159 : vector<1x8x16x4xf32> to vector<8x16x4xf32>
    %c0_208 = arith.constant 0 : index
    %c0_209 = arith.constant 0 : index
    %c0_210 = arith.constant 0 : index
    %161 = vector.load %arg7[%c0_208, %c0_209, %c0_210] : memref<8x16x8xf32, #tpu.memory_space<vmem>>, vector<8x16x8xf32>
    %c2_211 = arith.constant 2 : index
    %c3_212 = arith.constant 3 : index
    %c0_213 = arith.constant 0 : index
    %c0_214 = arith.constant 0 : index
    %162 = vector.load %arg3[%c2_211, %c3_212, %c0_213, %c0_214] : memref<4x4x4x8xf32, #tpu.memory_space<vmem>>, vector<1x1x4x8xf32>
    %163 = vector.shape_cast %162 : vector<1x1x4x8xf32> to vector<4x8xf32>
    "tpu.trace_start"() <{level = 10 : i32, message = "hwi,io->hwo"}> : () -> ()
    %cst_215 = arith.constant dense<0.000000e+00> : vector<8x16x8xf32>
    %164 = tpu.matmul %160, %163, %cst_215 {dimension_numbers = #tpu.dot_dimension_numbers<[2], [0], [0, 1], [1], [0, 0, 0, 1, 1, 1], [], []>} : vector<8x16x4xf32>, vector<4x8xf32>, vector<8x16x8xf32> -> vector<8x16x8xf32>
    "tpu.trace_stop"() : () -> ()
    %165 = arith.addf %161, %164 : vector<8x16x8xf32>
    %c0_216 = arith.constant 0 : index
    %c0_217 = arith.constant 0 : index
    %c0_218 = arith.constant 0 : index
    %166 = vector.load %arg7[%c0_216, %c0_217, %c0_218] : memref<8x16x8xf32, #tpu.memory_space<vmem>>, vector<8x16x8xf32>
    tpu.vector_store %arg7[%c0_216, %c0_217, %c0_218], %165 {strides = array<i32>} : memref<8x16x8xf32, #tpu.memory_space<vmem>>, vector<8x16x8xf32>,
    %c0_219 = arith.constant 0 : index
    %c0_220 = arith.constant 0 : index
    %c0_221 = arith.constant 0 : index
    %167 = vector.load %arg7[%c0_219, %c0_220, %c0_221] : memref<8x16x8xf32, #tpu.memory_space<vmem>>, vector<8x16x8xf32>
    %168 = vector.shape_cast %2 : vector<8xf32> to vector<1x1x8xf32>
    %169 = vector.broadcast %168 : vector<1x1x8xf32> to vector<8x16x8xf32>
    %170 = arith.mulf %167, %169 : vector<8x16x8xf32>
    %171 = vector.shape_cast %4 : vector<8xf32> to vector<1x1x8xf32>
    %172 = vector.broadcast %171 : vector<1x1x8xf32> to vector<8x16x8xf32>
    %173 = arith.addf %170, %172 : vector<8x16x8xf32>
    %cst_222 = arith.constant 0.000000e+00 : f32
    %174 = vector.broadcast %cst_222 : f32 to vector<8x16x8xf32>
    %175 = arith.maximumf %173, %174 : vector<8x16x8xf32>
    %c0_223 = arith.constant 0 : index
    %c2_224 = arith.constant 2 : index
    %c0_225 = arith.constant 0 : index
    %c0_226 = arith.constant 0 : index
    %c0_227 = arith.constant 0 : index
    %176 = vector.load %arg6[%c0_223, %c2_224, %c0_225, %c0_226, %c0_227] : memref<1x4x8x16x8xf32, #tpu.memory_space<vmem>>, vector<1x1x8x16x8xf32>
    %177 = vector.shape_cast %176 : vector<1x1x8x16x8xf32> to vector<8x16x8xf32>
    %178 = vector.shape_cast %175 : vector<8x16x8xf32> to vector<1x1x8x16x8xf32>
    tpu.vector_store %arg6[%c0_223, %c2_224, %c0_225, %c0_226, %c0_227], %178 {strides = array<i32>} : memref<1x4x8x16x8xf32, #tpu.memory_space<vmem>>, vector<1x1x8x16x8xf32>,
    %cst_228 = arith.constant 0.000000e+00 : f32
    %179 = vector.broadcast %cst_228 : f32 to vector<8x16x8xf32>
    %c0_229 = arith.constant 0 : index
    %c0_230 = arith.constant 0 : index
    %c0_231 = arith.constant 0 : index
    %180 = vector.load %arg7[%c0_229, %c0_230, %c0_231] : memref<8x16x8xf32, #tpu.memory_space<vmem>>, vector<8x16x8xf32>
    tpu.vector_store %arg7[%c0_229, %c0_230, %c0_231], %179 {strides = array<i32>} : memref<8x16x8xf32, #tpu.memory_space<vmem>>, vector<8x16x8xf32>,
    %c0_i32_232 = arith.constant 0 : i32
    %181 = arith.addi %0, %c0_i32_232 : i32
    %c1_i32_233 = arith.constant 1 : i32
    %182 = arith.addi %181, %c1_i32_233 : i32
    %c0_234 = arith.constant 0 : index
    %183 = arith.index_cast %182 : i32 to index
    %c1_235 = arith.constant 1 : index
    %c0_236 = arith.constant 0 : index
    %184 = vector.load %arg2[%c0_234, %183, %c1_235, %c0_236] : memref<1x18x18x4xf32, #tpu.memory_space<vmem>>, vector<1x8x16x4xf32>
    %185 = vector.shape_cast %184 : vector<1x8x16x4xf32> to vector<8x16x4xf32>
    %c0_237 = arith.constant 0 : index
    %c0_238 = arith.constant 0 : index
    %c0_239 = arith.constant 0 : index
    %186 = vector.load %arg7[%c0_237, %c0_238, %c0_239] : memref<8x16x8xf32, #tpu.memory_space<vmem>>, vector<8x16x8xf32>
    %c3_240 = arith.constant 3 : index
    %c0_241 = arith.constant 0 : index
    %c0_242 = arith.constant 0 : index
    %c0_243 = arith.constant 0 : index
    %187 = vector.load %arg3[%c3_240, %c0_241, %c0_242, %c0_243] : memref<4x4x4x8xf32, #tpu.memory_space<vmem>>, vector<1x1x4x8xf32>
    %188 = vector.shape_cast %187 : vector<1x1x4x8xf32> to vector<4x8xf32>
    "tpu.trace_start"() <{level = 10 : i32, message = "hwi,io->hwo"}> : () -> ()
    %cst_244 = arith.constant dense<0.000000e+00> : vector<8x16x8xf32>
    %189 = tpu.matmul %185, %188, %cst_244 {dimension_numbers = #tpu.dot_dimension_numbers<[2], [0], [0, 1], [1], [0, 0, 0, 1, 1, 1], [], []>} : vector<8x16x4xf32>, vector<4x8xf32>, vector<8x16x8xf32> -> vector<8x16x8xf32>
    "tpu.trace_stop"() : () -> ()
    %190 = arith.addf %186, %189 : vector<8x16x8xf32>
    %c0_245 = arith.constant 0 : index
    %c0_246 = arith.constant 0 : index
    %c0_247 = arith.constant 0 : index
    %191 = vector.load %arg7[%c0_245, %c0_246, %c0_247] : memref<8x16x8xf32, #tpu.memory_space<vmem>>, vector<8x16x8xf32>
    tpu.vector_store %arg7[%c0_245, %c0_246, %c0_247], %190 {strides = array<i32>} : memref<8x16x8xf32, #tpu.memory_space<vmem>>, vector<8x16x8xf32>,
    %c0_i32_248 = arith.constant 0 : i32
    %192 = arith.addi %0, %c0_i32_248 : i32
    %c1_i32_249 = arith.constant 1 : i32
    %193 = arith.addi %192, %c1_i32_249 : i32
    %c0_250 = arith.constant 0 : index
    %194 = arith.index_cast %193 : i32 to index
    %c2_251 = arith.constant 2 : index
    %c0_252 = arith.constant 0 : index
    %195 = vector.load %arg2[%c0_250, %194, %c2_251, %c0_252] : memref<1x18x18x4xf32, #tpu.memory_space<vmem>>, vector<1x8x16x4xf32>
    %196 = vector.shape_cast %195 : vector<1x8x16x4xf32> to vector<8x16x4xf32>
    %c0_253 = arith.constant 0 : index
    %c0_254 = arith.constant 0 : index
    %c0_255 = arith.constant 0 : index
    %197 = vector.load %arg7[%c0_253, %c0_254, %c0_255] : memref<8x16x8xf32, #tpu.memory_space<vmem>>, vector<8x16x8xf32>
    %c3_256 = arith.constant 3 : index
    %c1_257 = arith.constant 1 : index
    %c0_258 = arith.constant 0 : index
    %c0_259 = arith.constant 0 : index
    %198 = vector.load %arg3[%c3_256, %c1_257, %c0_258, %c0_259] : memref<4x4x4x8xf32, #tpu.memory_space<vmem>>, vector<1x1x4x8xf32>
    %199 = vector.shape_cast %198 : vector<1x1x4x8xf32> to vector<4x8xf32>
    "tpu.trace_start"() <{level = 10 : i32, message = "hwi,io->hwo"}> : () -> ()
    %cst_260 = arith.constant dense<0.000000e+00> : vector<8x16x8xf32>
    %200 = tpu.matmul %196, %199, %cst_260 {dimension_numbers = #tpu.dot_dimension_numbers<[2], [0], [0, 1], [1], [0, 0, 0, 1, 1, 1], [], []>} : vector<8x16x4xf32>, vector<4x8xf32>, vector<8x16x8xf32> -> vector<8x16x8xf32>
    "tpu.trace_stop"() : () -> ()
    %201 = arith.addf %197, %200 : vector<8x16x8xf32>
    %c0_261 = arith.constant 0 : index
    %c0_262 = arith.constant 0 : index
    %c0_263 = arith.constant 0 : index
    %202 = vector.load %arg7[%c0_261, %c0_262, %c0_263] : memref<8x16x8xf32, #tpu.memory_space<vmem>>, vector<8x16x8xf32>
    tpu.vector_store %arg7[%c0_261, %c0_262, %c0_263], %201 {strides = array<i32>} : memref<8x16x8xf32, #tpu.memory_space<vmem>>, vector<8x16x8xf32>,
    %c1_i32_264 = arith.constant 1 : i32
    %203 = arith.addi %0, %c1_i32_264 : i32
    %c1_i32_265 = arith.constant 1 : i32
    %204 = arith.addi %203, %c1_i32_265 : i32
    %c0_266 = arith.constant 0 : index
    %205 = arith.index_cast %204 : i32 to index
    %c1_267 = arith.constant 1 : index
    %c0_268 = arith.constant 0 : index
    %206 = vector.load %arg2[%c0_266, %205, %c1_267, %c0_268] : memref<1x18x18x4xf32, #tpu.memory_space<vmem>>, vector<1x8x16x4xf32>
    %207 = vector.shape_cast %206 : vector<1x8x16x4xf32> to vector<8x16x4xf32>
    %c0_269 = arith.constant 0 : index
    %c0_270 = arith.constant 0 : index
    %c0_271 = arith.constant 0 : index
    %208 = vector.load %arg7[%c0_269, %c0_270, %c0_271] : memref<8x16x8xf32, #tpu.memory_space<vmem>>, vector<8x16x8xf32>
    %c3_272 = arith.constant 3 : index
    %c2_273 = arith.constant 2 : index
    %c0_274 = arith.constant 0 : index
    %c0_275 = arith.constant 0 : index
    %209 = vector.load %arg3[%c3_272, %c2_273, %c0_274, %c0_275] : memref<4x4x4x8xf32, #tpu.memory_space<vmem>>, vector<1x1x4x8xf32>
    %210 = vector.shape_cast %209 : vector<1x1x4x8xf32> to vector<4x8xf32>
    "tpu.trace_start"() <{level = 10 : i32, message = "hwi,io->hwo"}> : () -> ()
    %cst_276 = arith.constant dense<0.000000e+00> : vector<8x16x8xf32>
    %211 = tpu.matmul %207, %210, %cst_276 {dimension_numbers = #tpu.dot_dimension_numbers<[2], [0], [0, 1], [1], [0, 0, 0, 1, 1, 1], [], []>} : vector<8x16x4xf32>, vector<4x8xf32>, vector<8x16x8xf32> -> vector<8x16x8xf32>
    "tpu.trace_stop"() : () -> ()
    %212 = arith.addf %208, %211 : vector<8x16x8xf32>
    %c0_277 = arith.constant 0 : index
    %c0_278 = arith.constant 0 : index
    %c0_279 = arith.constant 0 : index
    %213 = vector.load %arg7[%c0_277, %c0_278, %c0_279] : memref<8x16x8xf32, #tpu.memory_space<vmem>>, vector<8x16x8xf32>
    tpu.vector_store %arg7[%c0_277, %c0_278, %c0_279], %212 {strides = array<i32>} : memref<8x16x8xf32, #tpu.memory_space<vmem>>, vector<8x16x8xf32>,
    %c1_i32_280 = arith.constant 1 : i32
    %214 = arith.addi %0, %c1_i32_280 : i32
    %c1_i32_281 = arith.constant 1 : i32
    %215 = arith.addi %214, %c1_i32_281 : i32
    %c0_282 = arith.constant 0 : index
    %216 = arith.index_cast %215 : i32 to index
    %c2_283 = arith.constant 2 : index
    %c0_284 = arith.constant 0 : index
    %217 = vector.load %arg2[%c0_282, %216, %c2_283, %c0_284] : memref<1x18x18x4xf32, #tpu.memory_space<vmem>>, vector<1x8x16x4xf32>
    %218 = vector.shape_cast %217 : vector<1x8x16x4xf32> to vector<8x16x4xf32>
    %c0_285 = arith.constant 0 : index
    %c0_286 = arith.constant 0 : index
    %c0_287 = arith.constant 0 : index
    %219 = vector.load %arg7[%c0_285, %c0_286, %c0_287] : memref<8x16x8xf32, #tpu.memory_space<vmem>>, vector<8x16x8xf32>
    %c3_288 = arith.constant 3 : index
    %c3_289 = arith.constant 3 : index
    %c0_290 = arith.constant 0 : index
    %c0_291 = arith.constant 0 : index
    %220 = vector.load %arg3[%c3_288, %c3_289, %c0_290, %c0_291] : memref<4x4x4x8xf32, #tpu.memory_space<vmem>>, vector<1x1x4x8xf32>
    %221 = vector.shape_cast %220 : vector<1x1x4x8xf32> to vector<4x8xf32>
    "tpu.trace_start"() <{level = 10 : i32, message = "hwi,io->hwo"}> : () -> ()
    %cst_292 = arith.constant dense<0.000000e+00> : vector<8x16x8xf32>
    %222 = tpu.matmul %218, %221, %cst_292 {dimension_numbers = #tpu.dot_dimension_numbers<[2], [0], [0, 1], [1], [0, 0, 0, 1, 1, 1], [], []>} : vector<8x16x4xf32>, vector<4x8xf32>, vector<8x16x8xf32> -> vector<8x16x8xf32>
    "tpu.trace_stop"() : () -> ()
    %223 = arith.addf %219, %222 : vector<8x16x8xf32>
    %c0_293 = arith.constant 0 : index
    %c0_294 = arith.constant 0 : index
    %c0_295 = arith.constant 0 : index
    %224 = vector.load %arg7[%c0_293, %c0_294, %c0_295] : memref<8x16x8xf32, #tpu.memory_space<vmem>>, vector<8x16x8xf32>
    tpu.vector_store %arg7[%c0_293, %c0_294, %c0_295], %223 {strides = array<i32>} : memref<8x16x8xf32, #tpu.memory_space<vmem>>, vector<8x16x8xf32>,
    %c0_296 = arith.constant 0 : index
    %c0_297 = arith.constant 0 : index
    %c0_298 = arith.constant 0 : index
    %225 = vector.load %arg7[%c0_296, %c0_297, %c0_298] : memref<8x16x8xf32, #tpu.memory_space<vmem>>, vector<8x16x8xf32>
    %226 = vector.shape_cast %2 : vector<8xf32> to vector<1x1x8xf32>
    %227 = vector.broadcast %226 : vector<1x1x8xf32> to vector<8x16x8xf32>
    %228 = arith.mulf %225, %227 : vector<8x16x8xf32>
    %229 = vector.shape_cast %4 : vector<8xf32> to vector<1x1x8xf32>
    %230 = vector.broadcast %229 : vector<1x1x8xf32> to vector<8x16x8xf32>
    %231 = arith.addf %228, %230 : vector<8x16x8xf32>
    %cst_299 = arith.constant 0.000000e+00 : f32
    %232 = vector.broadcast %cst_299 : f32 to vector<8x16x8xf32>
    %233 = arith.maximumf %231, %232 : vector<8x16x8xf32>
    %c0_300 = arith.constant 0 : index
    %c3_301 = arith.constant 3 : index
    %c0_302 = arith.constant 0 : index
    %c0_303 = arith.constant 0 : index
    %c0_304 = arith.constant 0 : index
    %234 = vector.load %arg6[%c0_300, %c3_301, %c0_302, %c0_303, %c0_304] : memref<1x4x8x16x8xf32, #tpu.memory_space<vmem>>, vector<1x1x8x16x8xf32>
    %235 = vector.shape_cast %234 : vector<1x1x8x16x8xf32> to vector<8x16x8xf32>
    %236 = vector.shape_cast %233 : vector<8x16x8xf32> to vector<1x1x8x16x8xf32>
    tpu.vector_store %arg6[%c0_300, %c3_301, %c0_302, %c0_303, %c0_304], %236 {strides = array<i32>} : memref<1x4x8x16x8xf32, #tpu.memory_space<vmem>>, vector<1x1x8x16x8xf32>,
    return
  }
  func.func @transform_0(%arg0: i32, %arg1: i32) -> (i32, i32, i32, i32) {
    %c0_i32 = arith.constant 0 : i32
    %c0_i32_0 = arith.constant 0 : i32
    %c0_i32_1 = arith.constant 0 : i32
    %c0_i32_2 = arith.constant 0 : i32
    return %arg0, %c0_i32, %c0_i32_0, %c0_i32_1 : i32, i32, i32, i32
  }
  func.func @transform_1(%arg0: i32, %arg1: i32) -> (i32, i32, i32, i32) {
    %c0_i32 = arith.constant 0 : i32
    %c0_i32_0 = arith.constant 0 : i32
    %c0_i32_1 = arith.constant 0 : i32
    %c0_i32_2 = arith.constant 0 : i32
    %c0_i32_3 = arith.constant 0 : i32
    return %c0_i32, %c0_i32_0, %c0_i32_1, %c0_i32_2 : i32, i32, i32, i32
  }
  func.func @transform_2(%arg0: i32, %arg1: i32) -> (i32, i32) {
    %c0_i32 = arith.constant 0 : i32
    %c0_i32_0 = arith.constant 0 : i32
    %c0_i32_1 = arith.constant 0 : i32
    return %c0_i32, %c0_i32_0 : i32, i32
  }
  func.func @transform_3(%arg0: i32, %arg1: i32) -> (i32, i32) {
    %c0_i32 = arith.constant 0 : i32
    %c0_i32_0 = arith.constant 0 : i32
    %c0_i32_1 = arith.constant 0 : i32
    return %c0_i32, %c0_i32_0 : i32, i32
  }
  func.func @transform_4(%arg0: i32, %arg1: i32) -> (i32, i32, i32, i32, i32) {
    %c0_i32 = arith.constant 0 : i32
    %c0_i32_0 = arith.constant 0 : i32
    %c0_i32_1 = arith.constant 0 : i32
    %c0_i32_2 = arith.constant 0 : i32
    return %arg0, %c0_i32, %arg1, %c0_i32_0, %c0_i32_1 : i32, i32, i32, i32, i32
  }
}

</mosaic_0001>

<bundles_post_ra>
// kernel: tpu_custom_call.1
= control target key start
LH: loop header
LB: loop body
LE: loop exit
PB: predicated region body
PF: predicated region fallthrough
CT: control target
= control target key end

     0   :  { %s4594_s15 = smov 0   ;;  %s4596_s16 = smov 0   ;;  %s6319_s0 = inlined_call_operand.vmem [shape: f32[2,18,18,4], index: 0, kind: input, shape index: {}]   ;;  %s6320_s1 = inlined_call_operand.vmem [shape: f32[4,4,4,8], index: 1, kind: input, shape index: {}]   ;;  %s6321_s2 = inlined_call_operand.vmem [shape: f32[1,8], index: 2, kind: input, shape index: {}]   ;;  %s6322_s3 = inlined_call_operand.vmem [shape: f32[1,8], index: 3, kind: input, shape index: {}]   ;;  %s6323_s4 = inlined_call_operand.vmem [shape: f32[2,4,16,16,8], index: 4, kind: output, shape index: {}]  }
   0x1   :  { %s4598_s17 = smov 0   ;;  %s4600_s18 = smov 0  }
   0x2   :  { %s4602_s19 = smov 0   ;;  %s4604_s20 = smov 0  }
   0x3   :  { %s4606_s21 = smov 0  }
   0x4 LB: > { %s23_s22 = sadd.s32 1, %s4558_s19  ;;  %s26_s23 = sadd.s32 1, %s4562_s20  ;;  %s4566_s21 = sphi %s4606_s21, %s14_s21   ;;  %s4562_s20 = sphi %s4604_s20, %s6330_s20   ;;  %s4558_s19 = sphi %s4602_s19, %s6329_s19   ;;  %s4554_s18 = sphi %s4600_s18, %s6328_s18   ;;  %s4550_s17 = sphi %s4598_s17, %s6327_s17   ;;  %s4546_s16 = sphi %s4596_s16, %s6326_s16   ;;  %s4542_s15 = sphi %s4594_s15, %s6325_s15  }
   0x5   : > { %p24_p0 = scmp.ge.s32.totalorder %s23_s22, 2  ;;  %s3898_s24 = sadd.s32 4294967295, %s4566_s21  }
   0x6   : > { %p134_p1 = scmp.ne.s32.totalorder %s4546_s16, %s4542_s15  ;;  %p135_p2 = scmp.eq.s32.totalorder %s3898_s24, 3 }
   0x7   : > { %s6332_s22 = smov (%p24_p0, %s23_s22), 0  ;;  %s6334_s23 = smov (!%p24_p0, %s26_s23), %s4562_s20 }
   0x8   : > { %s120_s25 = ssub.s32 %s4558_s19, %s6332_s22  ;;  %p28_p3 = scmp.ge.s32.totalorder %s6334_s23, 2 }
   0x9   : > { %p3902_p4 = scmp.ge.s32.totalorder %s4566_s21, 1  ;;  %p4640_p5 = por %p135_p2, %p134_p1 }
   0xa   : > { %p176_p6 = scmp.lt.s32.totalorder %s4566_s21, 5  ;;  %s6336_s23 = smov (%p28_p3, %s6334_s23), 0 }
   0xb   : > { %s119_s27 = ssub.s32 %s4562_s20, %s6336_s23  ;;  %s124_s29 = sadd.s32 1, %s4546_s16 }
   0xc   : > { %p177_p7 = pnand %p3902_p4, %p176_p6  ;;  %s121_s28 = sor.u32 %s120_s25, %s119_s27 }
   0xd   : > { %p122_p8 = scmp.eq.s32.totalorder %s121_s28, 0  ;;  %p201_p9 = scmp.lt.s32.totalorder (!%p177_p7), %s4554_s18, 1 }
   0xe   : > { %180 = sbr.rel (%p177_p7) target bundleno = 736 (0x2e0), region = 36 }
   0xf   : > { %s4651_s30 = scalar_select %p122_p8, %s4546_s16, %s124_s29  }
  0x10   : > { %s3906_s7 = smul.u32 (!%p177_p7), 192, %s4550_s17 }
  0x13   : > { %v261_v0 = vld [vmem:[%s6320_s1] sm:$0xf]  ;;  %vm311_vm0 = vcmask 1043456   ;;  %v4012_v1 = vld [vmem:[%s6320_s1 + $0x10] sm:$0xf]  ;;  %s202_s14 = scalar_select %p201_p9, %s4554_s18, 1 }
  0x14   : > { %3907 = vmatpush.msk.msra.mxu0 %vm311_vm0, %v261_v0  ;;  %v3924_v2 = vld [vmem:[%s6320_s1 + $0x4] sm:$0xf]  ;;  %v4030_v3 = vld [vmem:[%s6320_s1 + $0x14] sm:$0xf]  ;;  %v3960_v4 = vld [vmem:[%s6320_s1 + $0x8] sm:$0xf] }
  0x15   : > { %3925 = vmatpush.msk.msra.mxu1 %vm311_vm0, %v3924_v2  ;;  %v4064_v5 = vld [vmem:[%s6320_s1 + $0x18] sm:$0xf]  ;;  %3961 = vmatpush.msk.msra.mxu2 %vm311_vm0, %v3960_v4  ;;  %v3994_v6 = vld [vmem:[%s6320_s1 + $0xc] sm:$0xf]  ;;  %v4098_v7 = vld [vmem:[%s6320_s1 + $0x1c] sm:$0xf] }
  0x16   : > { %4013 = vmatpush.msk.msrb.mxu0 %vm311_vm0, %v4012_v1  ;;  %s4446_s9 = smul.u32 432, %s202_s14  ;;  %3995 = vmatpush.msk.msra.mxu3 %vm311_vm0, %v3994_v6  ;;  %vm262_vm1 = vcmask 31744   ;;  %vm210_vm2 = vcmask 64512   ;;  %v4568_v35 = vmov 0.0   ;;  %v4148_v39 = vld [vmem:[%s6320_s1 + $0x20] sm:$0xf] }
  0x17   : > { %4031 = vmatpush.msk.msrb.mxu1 %vm311_vm0, %v4030_v3  ;;  %4065 = vmatpush.msk.msrb.mxu2 %vm311_vm0, %v4064_v5  ;;  %211 = vst.msk [vmem:[#allocation2] sm:$0xff] %vm210_vm2, %v4568_v35  ;;  %v4182_v42 = vld [vmem:[%s6320_s1 + $0x24] sm:$0xf]  ;;  %v4218_v45 = vld [vmem:[%s6320_s1 + $0x28] sm:$0xf]  ;;  %s4445_s28 = sshll.u32 (%p4640_p5), %s4550_s17, 4 }
  0x18   : > { %4099 = vmatpush.msk.msrb.mxu3 %vm311_vm0, %v4098_v7  ;;  %s205_s12 = scalar_lea.vmem %s6319_s0, %s4446_s9  ;;  %212 = vst.msk [vmem:[#allocation2 + $0x8] sm:$0xff] %vm210_vm2, %v4568_v35  ;;  %v4252_v48 = vld [vmem:[%s6320_s1 + $0x2c] sm:$0xf]  ;;  %s198_s9 = sand.u32 1, %s4542_s15  }
  0x19   : > { %s4691_s13 = scalar_lea.vmem %s205_s12, %s3906_s7  ;;  %213 = vst.msk [vmem:[#allocation2 + $0x10] sm:$0xff] %vm210_vm2, %v4568_v35  ;;  %s3903_s12 = sshll.u32 %s198_s9, 9 }
  0x1a   : > { %v229_v8 = vld [vmem:[%s4691_s13] sm:$0xff]  ;;  %v3944_v10 = vld [vmem:[%s4691_s13 + $0x18] sm:$0xff]  ;;  %v230_v12 = vld [vmem:[%s4691_s13 + $0x8] sm:$0xff]  ;;  %214 = vst.msk [vmem:[#allocation2 + $0x18] sm:$0xff] %vm210_vm2, %v4568_v35  ;;  %s4992_s15 = scalar_lea.vmem [#allocation3], %s3903_s12  ;;  %s4441_s29 = sshll.u32 (%p4640_p5), %s4554_s18, 7 }
  0x1b   : > { %v4695_v9 = vld [vmem:[%s4691_s13 + $0x1] sm:$0xff]  ;;  %3908 = vmatmul.msk.f32.vlgmr.msra.gmra.mxu0 %vm262_vm1, %v229_v8  ;;  %3962 = vmatmul.msk.f32.vlgmr.msra.gmra.mxu2 %vm262_vm1, %v3944_v10  ;;  %v4703_v11 = vld [vmem:[%s4691_s13 + $0x19] sm:$0xff]  ;;  %v4709_v13 = vld [vmem:[%s4691_s13 + $0x9] sm:$0xff]  ;;  %215 = vst.msk [vmem:[#allocation2 + $0x20] sm:$0xff] %vm210_vm2, %v4568_v35  ;;  %s3535_s5 = sadd.s32 (%p4640_p5), %s4445_s28, %s4441_s29 }
  0x1c   : > { %3926 = vmatmul.msk.f32.vlgmr.msra.gmra.mxu1 %vm262_vm1, %v4695_v9  ;;  %3996 = vmatmul.msk.f32.vlgmr.msra.gmra.mxu3 %vm262_vm1, %v4703_v11  ;;  %v3945_v14 = vld [vmem:[%s4691_s13 + $0x20] sm:$0xff]  ;;  %v3946_v16 = vld [vmem:[%s4691_s13 + $0x30] sm:$0xff]  ;;  %v3947_v18 = vld [vmem:[%s4691_s13 + $0x38] sm:$0xff]  ;;  %216 = vst.msk [vmem:[#allocation2 + $0x28] sm:$0xff] %vm210_vm2, %v4568_v35  ;;  %s4442_s6 = sshll.u32 (%p4640_p5), %s3535_s5, 3 }
  0x1d   : > { %v4713_v15 = vld [vmem:[%s4691_s13 + $0x21] sm:$0xff]  ;;  %v4723_v17 = vld [vmem:[%s4691_s13 + $0x31] sm:$0xff]  ;;  %v4733_v19 = vld [vmem:[%s4691_s13 + $0x39] sm:$0xff]  ;;  %217 = vst.msk [vmem:[#allocation2 + $0x30] sm:$0xff] %vm210_vm2, %v4568_v35  ;;  %4149 = vmatpush.msk.msra.mxu0 %vm311_vm0, %v4148_v39  ;;  %4183 = vmatpush.msk.msra.mxu1 %vm311_vm0, %v4182_v42  ;;  %s6170_s9 = scalar_lea.vmem (%p4640_p5), %s6323_s4, %s4442_s6 }
  0x1e   : > { %v3948_v20 = vld [vmem:[%s4691_s13 + $0x48] sm:$0xff]  ;;  %v3949_v22 = vld [vmem:[%s4691_s13 + $0x50] sm:$0xff]  ;;  %v3950_v24 = vld [vmem:[%s4691_s13 + $0x60] sm:$0xff]  ;;  %218 = vst.msk [vmem:[#allocation2 + $0x38] sm:$0xff] %vm210_vm2, %v4568_v35  ;;  %4219 = vmatpush.msk.msra.mxu2 %vm311_vm0, %v4218_v45  ;;  %4253 = vmatpush.msk.msra.mxu3 %vm311_vm0, %v4252_v48 }
  0x1f   : > { %v4743_v21 = vld [vmem:[%s4691_s13 + $0x49] sm:$0xff]  ;;  %v4753_v23 = vld [vmem:[%s4691_s13 + $0x51] sm:$0xff]  ;;  %v4763_v25 = vld [vmem:[%s4691_s13 + $0x61] sm:$0xff]  ;;  %219 = vst.msk [vmem:[#allocation2 + $0x40] sm:$0xff] %vm210_vm2, %v4568_v35 }
  0x20   : > { %v3951_v26 = vld [vmem:[%s4691_s13 + $0x68] sm:$0xff]  ;;  %v3952_v28 = vld [vmem:[%s4691_s13 + $0x78] sm:$0xff]  ;;  %v3953_v30 = vld [vmem:[%s4691_s13 + $0x80] sm:$0xff]  ;;  %220 = vst.msk [vmem:[#allocation2 + $0x48] sm:$0xff] %vm210_vm2, %v4568_v35 }
  0x21   : > { %v4773_v27 = vld [vmem:[%s4691_s13 + $0x69] sm:$0xff]  ;;  %v4783_v29 = vld [vmem:[%s4691_s13 + $0x79] sm:$0xff]  ;;  %v4793_v31 = vld [vmem:[%s4691_s13 + $0x81] sm:$0xff]  ;;  %221 = vst.msk [vmem:[#allocation2 + $0x50] sm:$0xff] %vm210_vm2, %v4568_v35 }
  0x22   : > { %v3954_v32 = vld [vmem:[%s4691_s13 + $0x90] sm:$0xff]  ;;  %v3955_v34 = vld [vmem:[%s4691_s13 + $0x98] sm:$0xff]  ;;  %v3956_v37 = vld [vmem:[%s4691_s13 + $0xa8] sm:$0xff]  ;;  %222 = vst.msk [vmem:[#allocation2 + $0x58] sm:$0xff] %vm210_vm2, %v4568_v35 }
  0x23   : > { %3909 = vmatmul.msk.f32.gmra.mxu0 %vm262_vm1, %v230_v12  ;;  %3963 = vmatmul.msk.f32.gmra.mxu2 %vm262_vm1, %v3945_v14  ;;  %v4803_v33 = vld [vmem:[%s4691_s13 + $0x91] sm:$0xff]  ;;  %v4815_v36 = vld [vmem:[%s4691_s13 + $0x99] sm:$0xff]  ;;  %v4841_v38 = vld [vmem:[%s4691_s13 + $0xa9] sm:$0xff]  ;;  %223 = vst.msk [vmem:[#allocation2 + $0x60] sm:$0xff] %vm210_vm2, %v4568_v35 }
  0x24   : > { %3927 = vmatmul.msk.f32.gmra.mxu1 %vm262_vm1, %v4709_v13  ;;  %3997 = vmatmul.msk.f32.gmra.mxu3 %vm262_vm1, %v4713_v15  ;;  %224 = vst.msk [vmem:[#allocation2 + $0x68] sm:$0xff] %vm210_vm2, %v4568_v35  ;;  %v3957_v40 = vld [vmem:[%s4691_s13 + $0xb0] sm:$0xff]  ;;  %v3958_v43 = vld [vmem:[%s4691_s13 + $0xc0] sm:$0xff]  ;;  %v3959_v46 = vld [vmem:[%s4691_s13 + $0xc8] sm:$0xff] }
  0x25   : > { %225 = vst.msk [vmem:[#allocation2 + $0x70] sm:$0xff] %vm210_vm2, %v4568_v35  ;;  %v4869_v41 = vld [vmem:[%s4691_s13 + $0xb1] sm:$0xff]  ;;  %v4883_v44 = vld [vmem:[%s4691_s13 + $0xc1] sm:$0xff]  ;;  %v4897_v47 = vld [vmem:[%s4691_s13 + $0xc9] sm:$0xff] }
  0x26   : > { %226 = vst.msk [vmem:[#allocation2 + $0x78] sm:$0xff] %vm210_vm2, %v4568_v35  ;;  %v245_v49 = vld [vmem:[#allocation2] sm:$0xff]  ;;  %v246_v55 = vld [vmem:[#allocation2 + $0x8] sm:$0xff]  ;;  %v247_v1 = vld [vmem:[#allocation2 + $0x10] sm:$0xff] }
  0x27   : > { %v1245_v52 = vld [vmem:[%s4691_s13 + $0x2] sm:$0xff]  ;;  %v4082_v54 = vld [vmem:[%s4691_s13 + $0x1a] sm:$0xff]  ;;  %v1246_v59 = vld [vmem:[%s4691_s13 + $0xa] sm:$0xff] }
  0x28   : > { %v4083_v63 = vld [vmem:[%s4691_s13 + $0x22] sm:$0xff]  ;;  %v4084_v8 = vld [vmem:[%s4691_s13 + $0x32] sm:$0xff] }
  0x2b   : > { %3910 = vmatmul.msk.f32.gmra.mxu0 %vm262_vm1, %v3944_v10  ;;  %3964 = vmatmul.msk.f32.gmra.mxu2 %vm262_vm1, %v3946_v16 }
  0x2c   : > { %3928 = vmatmul.msk.f32.gmra.mxu1 %vm262_vm1, %v4703_v11  ;;  %3998 = vmatmul.msk.f32.gmra.mxu3 %vm262_vm1, %v4723_v17 }
  0x33   : > { %3911 = vmatmul.msk.f32.gmra.mxu0 %vm262_vm1, %v3945_v14  ;;  %3965 = vmatmul.msk.f32.gmra.mxu2 %vm262_vm1, %v3947_v18 }
  0x34   : > { %3929 = vmatmul.msk.f32.gmra.mxu1 %vm262_vm1, %v4713_v15  ;;  %3999 = vmatmul.msk.f32.gmra.mxu3 %vm262_vm1, %v4733_v19 }
  0x3b   : > { %3912 = vmatmul.msk.f32.gmra.mxu0 %vm262_vm1, %v3946_v16  ;;  %3966 = vmatmul.msk.f32.gmra.mxu2 %vm262_vm1, %v3948_v20 }
  0x3c   : > { %3930 = vmatmul.msk.f32.gmra.mxu1 %vm262_vm1, %v4723_v17  ;;  %4000 = vmatmul.msk.f32.gmra.mxu3 %vm262_vm1, %v4743_v21 }
  0x43   : > { %3913 = vmatmul.msk.f32.gmra.mxu0 %vm262_vm1, %v3947_v18  ;;  %3967 = vmatmul.msk.f32.gmra.mxu2 %vm262_vm1, %v3949_v22 }
  0x44   : > { %3931 = vmatmul.msk.f32.gmra.mxu1 %vm262_vm1, %v4733_v19  ;;  %4001 = vmatmul.msk.f32.gmra.mxu3 %vm262_vm1, %v4753_v23 }
  0x4b   : > { %3914 = vmatmul.msk.f32.gmra.mxu0 %vm262_vm1, %v3948_v20  ;;  %3968 = vmatmul.msk.f32.gmra.mxu2 %vm262_vm1, %v3950_v24 }
  0x4c   : > { %3932 = vmatmul.msk.f32.gmra.mxu1 %vm262_vm1, %v4743_v21  ;;  %4002 = vmatmul.msk.f32.gmra.mxu3 %vm262_vm1, %v4763_v25 }
  0x53   : > { %3915 = vmatmul.msk.f32.gmra.mxu0 %vm262_vm1, %v3949_v22  ;;  %3969 = vmatmul.msk.f32.gmra.mxu2 %vm262_vm1, %v3951_v26 }
  0x54   : > { %3933 = vmatmul.msk.f32.gmra.mxu1 %vm262_vm1, %v4753_v23  ;;  %4003 = vmatmul.msk.f32.gmra.mxu3 %vm262_vm1, %v4773_v27 }
  0x5b   : > { %3916 = vmatmul.msk.f32.gmra.mxu0 %vm262_vm1, %v3950_v24  ;;  %3970 = vmatmul.msk.f32.gmra.mxu2 %vm262_vm1, %v3952_v28  ;;  %v4085_v24 = vld [vmem:[%s4691_s13 + $0x3a] sm:$0xff] }
  0x5c   : > { %3934 = vmatmul.msk.f32.gmra.mxu1 %vm262_vm1, %v4763_v25  ;;  %4004 = vmatmul.msk.f32.gmra.mxu3 %vm262_vm1, %v4783_v29 }
  0x63   : > { %3917 = vmatmul.msk.f32.gmra.mxu0 %vm262_vm1, %v3951_v26  ;;  %3971 = vmatmul.msk.f32.gmra.mxu2 %vm262_vm1, %v3953_v30 }
  0x64   : > { %3935 = vmatmul.msk.f32.gmra.mxu1 %vm262_vm1, %v4773_v27  ;;  %4005 = vmatmul.msk.f32.gmra.mxu3 %vm262_vm1, %v4793_v31 }
  0x6b   : > { %3918 = vmatmul.msk.f32.gmra.mxu0 %vm262_vm1, %v3952_v28  ;;  %3972 = vmatmul.msk.f32.gmra.mxu2 %vm262_vm1, %v3954_v32 }
  0x6c   : > { %3936 = vmatmul.msk.f32.gmra.mxu1 %vm262_vm1, %v4783_v29  ;;  %4006 = vmatmul.msk.f32.gmra.mxu3 %vm262_vm1, %v4803_v33 }
  0x73   : > { %3919 = vmatmul.msk.f32.gmra.mxu0 %vm262_vm1, %v3953_v30  ;;  %3973 = vmatmul.msk.f32.gmra.mxu2 %vm262_vm1, %v3955_v34 }
  0x74   : > { %3937 = vmatmul.msk.f32.gmra.mxu1 %vm262_vm1, %v4793_v31  ;;  %4007 = vmatmul.msk.f32.gmra.mxu3 %vm262_vm1, %v4815_v36 }
  0x7b   : > { %3920 = vmatmul.msk.f32.gmra.mxu0 %vm262_vm1, %v3954_v32  ;;  %3974 = vmatmul.msk.f32.gmra.mxu2 %vm262_vm1, %v3956_v37 }
  0x7c   : > { %3938 = vmatmul.msk.f32.gmra.mxu1 %vm262_vm1, %v4803_v33  ;;  %4008 = vmatmul.msk.f32.gmra.mxu3 %vm262_vm1, %v4841_v38 }
  0x83   : > { %3921 = vmatmul.msk.f32.gmra.mxu0 %vm262_vm1, %v3955_v34  ;;  %3975 = vmatmul.msk.f32.gmra.mxu2 %vm262_vm1, %v3957_v40  ;;  %v249_v34 = vld [vmem:[#allocation2 + $0x20] sm:$0xff] }
  0x84   : > { %3939 = vmatmul.msk.f32.gmra.mxu1 %vm262_vm1, %v4815_v36  ;;  %4009 = vmatmul.msk.f32.gmra.mxu3 %vm262_vm1, %v4869_v41 }
  0x8b   : > { %3922 = vmatmul.msk.f32.gmra.mxu0 %vm262_vm1, %v3956_v37  ;;  %3976 = vmatmul.msk.f32.gmra.mxu2 %vm262_vm1, %v3958_v43 }
  0x8c   : > { %3940 = vmatmul.msk.f32.gmra.mxu1 %vm262_vm1, %v4841_v38  ;;  %4010 = vmatmul.msk.f32.gmra.mxu3 %vm262_vm1, %v4883_v44 }
  0x93   : > { %3923 = vmatmul.msk.f32.gmra.mxu0 %vm262_vm1, %v3957_v40  ;;  %3977 = vmatmul.msk.f32.gmra.mxu2 %vm262_vm1, %v3959_v46  ;;  %v4086_v46 = vld [vmem:[%s4691_s13 + $0x4a] sm:$0xff] }
  0x94   : > { %3941 = vmatmul.msk.f32.gmra.mxu1 %vm262_vm1, %v4869_v41  ;;  %4011 = vmatmul.msk.f32.gmra.mxu3 %vm262_vm1, %v4897_v47 }
  0x98   : > { %v332_v50 = vpop.f32.mrf.mxu0 }
  0x99   : > { %v514_v51 = vpop.f32.mrf.mxu1  ;;  %v380_v53 = vadd.f32 %v332_v50, %v245_v49 }
  0x9b   : > { %396 = vst.msk [vmem:[#allocation2] sm:$0xff] %vm210_vm2, %v380_v53  ;;  %4014 = vmatmul.msk.f32.vlgmr.msrb.gmra.mxu0 %vm262_vm1, %v4695_v9  ;;  %4066 = vmatmul.msk.f32.vlgmr.msrb.gmra.mxu2 %vm262_vm1, %v4703_v11  ;;  %v250_v53 = vld [vmem:[#allocation2 + $0x28] sm:$0xff] }
  0x9c   : > { %4032 = vmatmul.msk.f32.vlgmr.msrb.gmra.mxu1 %vm262_vm1, %v1245_v52  ;;  %4100 = vmatmul.msk.f32.vlgmr.msrb.gmra.mxu3 %vm262_vm1, %v4082_v54 }
  0x9e   : > { %v699_v56 = vpop.f32.mrf.mxu2 }
  0x9f   : > { %v881_v61 = vpop.f32.mrf.mxu3 }
  0xa0   : > { %v335_v57 = vpop.f32.mrf.mxu0 }
  0xa1   : > { %v517_v58 = vpop.f32.mrf.mxu1  ;;  %v381_v60 = vadd.f32 %v335_v57, %v246_v55  ;;  %v4972_v55 = vld [vmem:[%s6322_s3] ss:$0 sm:$0xff] }
  0xa2   : > { %v428_v62 = vld [vmem:[#allocation2] sm:$0xff] }
  0xa3   : > { %397 = vst.msk [vmem:[#allocation2 + $0x8] sm:$0xff] %vm210_vm2, %v381_v60  ;;  %v562_v0 = vadd.f32 %v514_v51, %v428_v62  ;;  %4015 = vmatmul.msk.f32.gmra.mxu0 %vm262_vm1, %v4709_v13  ;;  %4067 = vmatmul.msk.f32.gmra.mxu2 %vm262_vm1, %v4713_v15  ;;  %v248_v13 = vld [vmem:[#allocation2 + $0x18] sm:$0xff]  ;;  %v4965_v51 = vld [vmem:[%s6321_s2] ss:$0 sm:$0xff] }
  0xa4   : > { %4033 = vmatmul.msk.f32.gmra.mxu1 %vm262_vm1, %v1246_v59  ;;  %4101 = vmatmul.msk.f32.gmra.mxu3 %vm262_vm1, %v4083_v63 }
  0xa5   : > { %578 = vst.msk [vmem:[#allocation2] sm:$0xff] %vm210_vm2, %v562_v0 }
  0xa6   : > { %v702_v2 = vpop.f32.mrf.mxu2 }
  0xa7   : > { %v884_v6 = vpop.f32.mrf.mxu3 }
  0xa8   : > { %v338_v3 = vpop.f32.mrf.mxu0 }
  0xa9   : > { %v520_v4 = vpop.f32.mrf.mxu1  ;;  %v382_v5 = vadd.f32 %v338_v3, %v247_v1 }
  0xaa   : > { %v429_v7 = vld [vmem:[#allocation2 + $0x8] sm:$0xff] }
  0xab   : > { %398 = vst.msk [vmem:[#allocation2 + $0x10] sm:$0xff] %vm210_vm2, %v382_v5  ;;  %v563_v9 = vadd.f32 %v517_v58, %v429_v7  ;;  %4016 = vmatmul.msk.f32.gmra.mxu0 %vm262_vm1, %v4703_v11  ;;  %4068 = vmatmul.msk.f32.gmra.mxu2 %vm262_vm1, %v4723_v17 }
  0xac   : > { %4034 = vmatmul.msk.f32.gmra.mxu1 %vm262_vm1, %v4082_v54  ;;  %v613_v10 = vld [vmem:[#allocation2] sm:$0xff]  ;;  %4102 = vmatmul.msk.f32.gmra.mxu3 %vm262_vm1, %v4084_v8 }
  0xad   : > { %579 = vst.msk [vmem:[#allocation2 + $0x8] sm:$0xff] %vm210_vm2, %v563_v9  ;;  %v747_v12 = vadd.f32 %v699_v56, %v613_v10 }
  0xae   : > { %v705_v14 = vpop.f32.mrf.mxu2 }
  0xaf   : > { %763 = vst.msk [vmem:[#allocation2] sm:$0xff] %vm210_vm2, %v747_v12  ;;  %v4938_v22 = vpop.f32.mrf.mxu3 }
  0xb0   : > { %v341_v16 = vpop.f32.mrf.mxu0 }
  0xb1   : > { %v523_v18 = vpop.f32.mrf.mxu1  ;;  %v383_v20 = vadd.f32 %v341_v16, %v248_v13 }
  0xb2   : > { %v430_v11 = vld [vmem:[#allocation2 + $0x10] sm:$0xff] }
  0xb3   : > { %399 = vst.msk [vmem:[#allocation2 + $0x18] sm:$0xff] %vm210_vm2, %v383_v20  ;;  %v564_v26 = vadd.f32 %v520_v4, %v430_v11  ;;  %4017 = vmatmul.msk.f32.gmra.mxu0 %vm262_vm1, %v4713_v15  ;;  %4069 = vmatmul.msk.f32.gmra.mxu2 %vm262_vm1, %v4733_v19 }
  0xb4   : > { %4035 = vmatmul.msk.f32.gmra.mxu1 %vm262_vm1, %v4083_v63  ;;  %v614_v28 = vld [vmem:[#allocation2 + $0x8] sm:$0xff]  ;;  %4103 = vmatmul.msk.f32.gmra.mxu3 %vm262_vm1, %v4085_v24  ;;  %v4087_v63 = vld [vmem:[%s4691_s13 + $0x52] sm:$0xff] }
  0xb5   : > { %580 = vst.msk [vmem:[#allocation2 + $0x10] sm:$0xff] %vm210_vm2, %v564_v26  ;;  %v748_v30 = vadd.f32 %v702_v2, %v614_v28 }
  0xb6   : > { %v795_v32 = vld [vmem:[#allocation2] sm:$0xff]  ;;  %v708_v39 = vpop.f32.mrf.mxu2 }
  0xb7   : > { %764 = vst.msk [vmem:[#allocation2 + $0x8] sm:$0xff] %vm210_vm2, %v748_v30  ;;  %v929_v37 = vadd.f32 %v881_v61, %v795_v32  ;;  %v4951_v43 = vpop.f32.mrf.mxu3  ;;  %v252_v30 = vld [vmem:[#allocation2 + $0x38] sm:$0xff] }
  0xb8   : > { %v344_v40 = vpop.f32.mrf.mxu0 }
  0xb9   : > { %v526_v15 = vpop.f32.mrf.mxu1  ;;  %945 = vst.msk [vmem:[#allocation2] sm:$0xff] %vm210_vm2, %v929_v37  ;;  %v384_v42 = vadd.f32 %v344_v40, %v249_v34 }
  0xba   : > { %v431_v45 = vld [vmem:[#allocation2 + $0x18] sm:$0xff] }
  0xbb   : > { %400 = vst.msk [vmem:[#allocation2 + $0x20] sm:$0xff] %vm210_vm2, %v384_v42  ;;  %v565_v48 = vadd.f32 %v523_v18, %v431_v45  ;;  %4018 = vmatmul.msk.f32.gmra.mxu0 %vm262_vm1, %v4723_v17  ;;  %4070 = vmatmul.msk.f32.gmra.mxu2 %vm262_vm1, %v4743_v21  ;;  %v4088_v18 = vld [vmem:[%s4691_s13 + $0x62] sm:$0xff] }
  0xbc   : > { %4036 = vmatmul.msk.f32.gmra.mxu1 %vm262_vm1, %v4084_v8  ;;  %v615_v49 = vld [vmem:[#allocation2 + $0x10] sm:$0xff]  ;;  %4104 = vmatmul.msk.f32.gmra.mxu3 %vm262_vm1, %v4086_v46 }
  0xbd   : > { %581 = vst.msk [vmem:[#allocation2 + $0x18] sm:$0xff] %vm210_vm2, %v565_v48  ;;  %v749_v50 = vadd.f32 %v705_v14, %v615_v49 }
  0xbe   : > { %v796_v52 = vld [vmem:[#allocation2 + $0x8] sm:$0xff]  ;;  %v711_v54 = vpop.f32.mrf.mxu2 }
  0xbf   : > { %765 = vst.msk [vmem:[#allocation2 + $0x10] sm:$0xff] %vm210_vm2, %v749_v50  ;;  %v930_v17 = vadd.f32 %v884_v6, %v796_v52  ;;  %v4975_v60 = vpop.f32.mrf.mxu3  ;;  %v251_v6 = vld [vmem:[#allocation2 + $0x30] sm:$0xff] }
  0xc0   : > { %v347_v56 = vpop.f32.mrf.mxu0  ;;  %v961_v58 = vld [vmem:[#allocation2] sm:$0xff] }
  0xc1   : > { %v529_v57 = vpop.f32.mrf.mxu1  ;;  %946 = vst.msk [vmem:[#allocation2 + $0x8] sm:$0xff] %vm210_vm2, %v930_v17  ;;  %v385_v59 = vadd.f32 %v347_v56, %v250_v53  ;;  %v980_v61 = vmul.f32 %v4965_v51, %v961_v58  ;;  %v253_v17 = vld [vmem:[#allocation2 + $0x40] sm:$0xff] }
  0xc2   : > { %v432_v62 = vld [vmem:[#allocation2 + $0x20] sm:$0xff]  ;;  %1047 = vst.msk [vmem:[#allocation2] sm:$0xff] %vm210_vm2, %v4568_v35 }
  0xc3   : > { %401 = vst.msk [vmem:[#allocation2 + $0x28] sm:$0xff] %vm210_vm2, %v385_v59  ;;  %v566_v0 = vadd.f32 %v526_v15, %v432_v62  ;;  %4019 = vmatmul.msk.f32.gmra.mxu0 %vm262_vm1, %v4733_v19  ;;  %v999_v1 = vadd.f32 %v4972_v55, %v980_v61  ;;  %4071 = vmatmul.msk.f32.gmra.mxu2 %vm262_vm1, %v4753_v23 }
  0xc4   : > { %4037 = vmatmul.msk.f32.gmra.mxu1 %vm262_vm1, %v4085_v24  ;;  %v616_v2 = vld [vmem:[#allocation2 + $0x18] sm:$0xff]  ;;  %4105 = vmatmul.msk.f32.gmra.mxu3 %vm262_vm1, %v4087_v63 }
  0xc5   : > { %582 = vst.msk [vmem:[#allocation2 + $0x20] sm:$0xff] %vm210_vm2, %v566_v0  ;;  %v750_v3 = vadd.f32 %v708_v39, %v616_v2  ;;  %v1015_v4 = vmax.f32 %v999_v1, 0.0  ;;  %v4090_v0 = vld [vmem:[%s4691_s13 + $0x7a] sm:$0xff] }
  0xc6   : > { %v797_v5 = vld [vmem:[#allocation2 + $0x10] sm:$0xff]  ;;  %v714_v7 = vpop.f32.mrf.mxu2 }
  0xc7   : > { %766 = vst.msk [vmem:[#allocation2 + $0x18] sm:$0xff] %vm210_vm2, %v750_v3  ;;  %v931_v19 = vadd.f32 %v4938_v22, %v797_v5  ;;  %v4997_v13 = vpop.f32.mrf.mxu3 }
  0xc8   : > { %v350_v8 = vpop.f32.mrf.mxu0  ;;  %1031 = vst.msk [vmem:[%s4992_s15] sm:$0xff] %vm210_vm2, %v1015_v4  ;;  %v962_v10 = vld [vmem:[#allocation2 + $0x8] sm:$0xff] }
  0xc9   : > { %v532_v9 = vpop.f32.mrf.mxu1  ;;  %947 = vst.msk [vmem:[#allocation2 + $0x10] sm:$0xff] %vm210_vm2, %v931_v19  ;;  %v386_v12 = vadd.f32 %v350_v8, %v251_v6  ;;  %v981_v14 = vmul.f32 %v4965_v51, %v962_v10  ;;  %v254_v6 = vld [vmem:[#allocation2 + $0x48] sm:$0xff] }
  0xca   : > { %v433_v16 = vld [vmem:[#allocation2 + $0x28] sm:$0xff]  ;;  %1048 = vst.msk [vmem:[#allocation2 + $0x8] sm:$0xff] %vm210_vm2, %v4568_v35 }
  0xcb   : > { %402 = vst.msk [vmem:[#allocation2 + $0x30] sm:$0xff] %vm210_vm2, %v386_v12  ;;  %v567_v20 = vadd.f32 %v529_v57, %v433_v16  ;;  %4020 = vmatmul.msk.f32.gmra.mxu0 %vm262_vm1, %v4743_v21  ;;  %v1000_v22 = vadd.f32 %v4972_v55, %v981_v14  ;;  %4072 = vmatmul.msk.f32.gmra.mxu2 %vm262_vm1, %v4763_v25 }
  0xcc   : > { %4038 = vmatmul.msk.f32.gmra.mxu1 %vm262_vm1, %v4086_v46  ;;  %v617_v11 = vld [vmem:[#allocation2 + $0x20] sm:$0xff]  ;;  %4106 = vmatmul.msk.f32.gmra.mxu3 %vm262_vm1, %v4088_v18  ;;  %v4089_v46 = vld [vmem:[%s4691_s13 + $0x6a] sm:$0xff] }
  0xcd   : > { %583 = vst.msk [vmem:[#allocation2 + $0x28] sm:$0xff] %vm210_vm2, %v567_v20  ;;  %v751_v24 = vadd.f32 %v711_v54, %v617_v11  ;;  %v1016_v26 = vmax.f32 %v1000_v22, 0.0 }
  0xce   : > { %v798_v28 = vld [vmem:[#allocation2 + $0x18] sm:$0xff]  ;;  %v717_v32 = vpop.f32.mrf.mxu2 }
  0xcf   : > { %767 = vst.msk [vmem:[#allocation2 + $0x20] sm:$0xff] %vm210_vm2, %v751_v24  ;;  %v932_v21 = vadd.f32 %v4951_v43, %v798_v28  ;;  %v5017_v15 = vpop.f32.mrf.mxu3  ;;  %v255_v28 = vld [vmem:[#allocation2 + $0x50] sm:$0xff] }
  0xd0   : > { %v353_v34 = vpop.f32.mrf.mxu0  ;;  %1032 = vst.msk [vmem:[%s4992_s15 + $0x8] sm:$0xff] %vm210_vm2, %v1016_v26  ;;  %v963_v39 = vld [vmem:[#allocation2 + $0x10] sm:$0xff] }
  0xd1   : > { %v535_v37 = vpop.f32.mrf.mxu1  ;;  %948 = vst.msk [vmem:[#allocation2 + $0x18] sm:$0xff] %vm210_vm2, %v932_v21  ;;  %v387_v40 = vadd.f32 %v353_v34, %v252_v30  ;;  %v982_v42 = vmul.f32 %v4965_v51, %v963_v39 }
  0xd2   : > { %v434_v45 = vld [vmem:[#allocation2 + $0x30] sm:$0xff]  ;;  %1049 = vst.msk [vmem:[#allocation2 + $0x10] sm:$0xff] %vm210_vm2, %v4568_v35 }
  0xd3   : > { %403 = vst.msk [vmem:[#allocation2 + $0x38] sm:$0xff] %vm210_vm2, %v387_v40  ;;  %v568_v43 = vadd.f32 %v532_v9, %v434_v45  ;;  %4021 = vmatmul.msk.f32.gmra.mxu0 %vm262_vm1, %v4753_v23  ;;  %v1001_v48 = vadd.f32 %v4972_v55, %v982_v42  ;;  %4073 = vmatmul.msk.f32.gmra.mxu2 %vm262_vm1, %v4773_v27  ;;  %v4092_v45 = vld [vmem:[%s4691_s13 + $0x92] sm:$0xff] }
  0xd4   : > { %4039 = vmatmul.msk.f32.gmra.mxu1 %vm262_vm1, %v4087_v63  ;;  %v618_v49 = vld [vmem:[#allocation2 + $0x28] sm:$0xff]  ;;  %4107 = vmatmul.msk.f32.gmra.mxu3 %vm262_vm1, %v4089_v46 }
  0xd5   : > { %584 = vst.msk [vmem:[#allocation2 + $0x30] sm:$0xff] %vm210_vm2, %v568_v43  ;;  %v752_v50 = vadd.f32 %v714_v7, %v618_v49  ;;  %v1017_v52 = vmax.f32 %v1001_v48, 0.0 }
  0xd6   : > { %v799_v53 = vld [vmem:[#allocation2 + $0x20] sm:$0xff]  ;;  %v720_v54 = vpop.f32.mrf.mxu2 }
  0xd7   : > { %768 = vst.msk [vmem:[#allocation2 + $0x28] sm:$0xff] %vm210_vm2, %v752_v50  ;;  %v933_v23 = vadd.f32 %v4975_v60, %v799_v53  ;;  %v5037_v61 = vpop.f32.mrf.mxu3 }
  0xd8   : > { %v356_v56 = vpop.f32.mrf.mxu0  ;;  %1033 = vst.msk [vmem:[%s4992_s15 + $0x10] sm:$0xff] %vm210_vm2, %v1017_v52  ;;  %v964_v58 = vld [vmem:[#allocation2 + $0x18] sm:$0xff] }
  0xd9   : > { %v538_v57 = vpop.f32.mrf.mxu1  ;;  %949 = vst.msk [vmem:[#allocation2 + $0x20] sm:$0xff] %vm210_vm2, %v933_v23  ;;  %v388_v59 = vadd.f32 %v356_v56, %v253_v17  ;;  %v983_v62 = vmul.f32 %v4965_v51, %v964_v58  ;;  %v256_v52 = vld [vmem:[#allocation2 + $0x58] sm:$0xff] }
  0xda   : > { %v435_v63 = vld [vmem:[#allocation2 + $0x38] sm:$0xff]  ;;  %1050 = vst.msk [vmem:[#allocation2 + $0x18] sm:$0xff] %vm210_vm2, %v4568_v35 }
  0xdb   : > { %404 = vst.msk [vmem:[#allocation2 + $0x40] sm:$0xff] %vm210_vm2, %v388_v59  ;;  %v569_v60 = vadd.f32 %v535_v37, %v435_v63  ;;  %4022 = vmatmul.msk.f32.gmra.mxu0 %vm262_vm1, %v4763_v25  ;;  %v1002_v1 = vadd.f32 %v4972_v55, %v983_v62  ;;  %4074 = vmatmul.msk.f32.gmra.mxu2 %vm262_vm1, %v4783_v29  ;;  %v4093_v62 = vld [vmem:[%s4691_s13 + $0x9a] sm:$0xff] }
  0xdc   : > { %4040 = vmatmul.msk.f32.gmra.mxu1 %vm262_vm1, %v4088_v18  ;;  %v619_v2 = vld [vmem:[#allocation2 + $0x30] sm:$0xff]  ;;  %4108 = vmatmul.msk.f32.gmra.mxu3 %vm262_vm1, %v4090_v0  ;;  %v4091_v18 = vld [vmem:[%s4691_s13 + $0x82] sm:$0xff] }
  0xdd   : > { %585 = vst.msk [vmem:[#allocation2 + $0x38] sm:$0xff] %vm210_vm2, %v569_v60  ;;  %v753_v3 = vadd.f32 %v717_v32, %v619_v2  ;;  %v1018_v4 = vmax.f32 %v1002_v1, 0.0 }
  0xde   : > { %v800_v5 = vld [vmem:[#allocation2 + $0x28] sm:$0xff]  ;;  %v723_v19 = vpop.f32.mrf.mxu2 }
  0xdf   : > { %769 = vst.msk [vmem:[#allocation2 + $0x30] sm:$0xff] %vm210_vm2, %v753_v3  ;;  %v934_v25 = vadd.f32 %v4997_v13, %v800_v5  ;;  %v5057_v12 = vpop.f32.mrf.mxu3  ;;  %v257_v3 = vld [vmem:[#allocation2 + $0x60] sm:$0xff] }
  0xe0   : > { %v359_v7 = vpop.f32.mrf.mxu0  ;;  %1034 = vst.msk [vmem:[%s4992_s15 + $0x18] sm:$0xff] %vm210_vm2, %v1018_v4  ;;  %v965_v9 = vld [vmem:[#allocation2 + $0x20] sm:$0xff] }
  0xe1   : > { %v541_v8 = vpop.f32.mrf.mxu1  ;;  %950 = vst.msk [vmem:[#allocation2 + $0x28] sm:$0xff] %vm210_vm2, %v934_v25  ;;  %v389_v10 = vadd.f32 %v359_v7, %v254_v6  ;;  %v984_v14 = vmul.f32 %v4965_v51, %v965_v9 }
  0xe2   : > { %v436_v16 = vld [vmem:[#allocation2 + $0x40] sm:$0xff]  ;;  %1051 = vst.msk [vmem:[#allocation2 + $0x20] sm:$0xff] %vm210_vm2, %v4568_v35 }
  0xe3   : > { %405 = vst.msk [vmem:[#allocation2 + $0x48] sm:$0xff] %vm210_vm2, %v389_v10  ;;  %v570_v13 = vadd.f32 %v538_v57, %v436_v16  ;;  %4023 = vmatmul.msk.f32.gmra.mxu0 %vm262_vm1, %v4773_v27  ;;  %v1003_v20 = vadd.f32 %v4972_v55, %v984_v14  ;;  %4075 = vmatmul.msk.f32.gmra.mxu2 %vm262_vm1, %v4793_v31  ;;  %v5121_v10 = vld [vmem:[%s4691_s13 + $0xaa] sm:$0xff] }
  0xe4   : > { %4041 = vmatmul.msk.f32.gmra.mxu1 %vm262_vm1, %v4089_v46  ;;  %v620_v22 = vld [vmem:[#allocation2 + $0x38] sm:$0xff]  ;;  %4109 = vmatmul.msk.f32.gmra.mxu3 %vm262_vm1, %v4091_v18 }
  0xe5   : > { %586 = vst.msk [vmem:[#allocation2 + $0x40] sm:$0xff] %vm210_vm2, %v570_v13  ;;  %v754_v11 = vadd.f32 %v720_v54, %v620_v22  ;;  %v1019_v24 = vmax.f32 %v1003_v20, 0.0  ;;  %v4302_v13 = vld [vmem:[%s6320_s1 + $0x30] sm:$0xf]  ;;  %v258_v22 = vld [vmem:[#allocation2 + $0x68] sm:$0xff] }
  0xe6   : > { %v801_v26 = vld [vmem:[#allocation2 + $0x30] sm:$0xff]  ;;  %v726_v30 = vpop.f32.mrf.mxu2  ;;  %4303 = vmatpush.msk.msrb.mxu0 %vm311_vm0, %v4302_v13  ;;  %v4132_v13 = vld [vmem:[%s4691_s13 + $0x18] sm:$0xff] }
  0xe7   : > { %770 = vst.msk [vmem:[#allocation2 + $0x38] sm:$0xff] %vm210_vm2, %v754_v11  ;;  %v935_v27 = vadd.f32 %v5017_v15, %v801_v26  ;;  %v5077_v39 = vpop.f32.mrf.mxu3 }
  0xe8   : > { %v362_v21 = vpop.f32.mrf.mxu0  ;;  %1035 = vst.msk [vmem:[%s4992_s15 + $0x20] sm:$0xff] %vm210_vm2, %v1019_v24  ;;  %v966_v34 = vld [vmem:[#allocation2 + $0x28] sm:$0xff] }
  0xe9   : > { %v544_v32 = vpop.f32.mrf.mxu1  ;;  %951 = vst.msk [vmem:[#allocation2 + $0x30] sm:$0xff] %vm210_vm2, %v935_v27  ;;  %v390_v37 = vadd.f32 %v362_v21, %v255_v28  ;;  %v985_v40 = vmul.f32 %v4965_v51, %v966_v34 }
  0xea   : > { %v437_v42 = vld [vmem:[#allocation2 + $0x48] sm:$0xff]  ;;  %1052 = vst.msk [vmem:[#allocation2 + $0x28] sm:$0xff] %vm210_vm2, %v4568_v35 }
  0xeb   : > { %406 = vst.msk [vmem:[#allocation2 + $0x50] sm:$0xff] %vm210_vm2, %v390_v37  ;;  %v571_v15 = vadd.f32 %v541_v8, %v437_v42  ;;  %4024 = vmatmul.msk.f32.gmra.mxu0 %vm262_vm1, %v4783_v29  ;;  %v1004_v46 = vadd.f32 %v4972_v55, %v985_v40  ;;  %4076 = vmatmul.msk.f32.gmra.mxu2 %vm262_vm1, %v4803_v33  ;;  %v5148_v37 = vld [vmem:[%s4691_s13 + $0xb2] sm:$0xff] }
  0xec   : > { %4042 = vmatmul.msk.f32.gmra.mxu1 %vm262_vm1, %v4090_v0  ;;  %v621_v43 = vld [vmem:[#allocation2 + $0x40] sm:$0xff]  ;;  %4110 = vmatmul.msk.f32.gmra.mxu3 %vm262_vm1, %v4092_v45 }
  0xed   : > { %587 = vst.msk [vmem:[#allocation2 + $0x48] sm:$0xff] %vm210_vm2, %v571_v15  ;;  %v755_v48 = vadd.f32 %v723_v19, %v621_v43  ;;  %v1020_v49 = vmax.f32 %v1004_v46, 0.0  ;;  %v259_v43 = vld [vmem:[#allocation2 + $0x70] sm:$0xff] }
  0xee   : > { %v802_v50 = vld [vmem:[#allocation2 + $0x38] sm:$0xff]  ;;  %v729_v53 = vpop.f32.mrf.mxu2 }
  0xef   : > { %771 = vst.msk [vmem:[#allocation2 + $0x40] sm:$0xff] %vm210_vm2, %v755_v48  ;;  %v936_v29 = vadd.f32 %v5037_v61, %v802_v50  ;;  %v5097_v57 = vpop.f32.mrf.mxu3 }
  0xf0   : > { %v365_v17 = vpop.f32.mrf.mxu0  ;;  %1036 = vst.msk [vmem:[%s4992_s15 + $0x28] sm:$0xff] %vm210_vm2, %v1020_v49  ;;  %v967_v54 = vld [vmem:[#allocation2 + $0x30] sm:$0xff] }
  0xf1   : > { %v547_v23 = vpop.f32.mrf.mxu1  ;;  %952 = vst.msk [vmem:[#allocation2 + $0x38] sm:$0xff] %vm210_vm2, %v936_v29  ;;  %v391_v56 = vadd.f32 %v365_v17, %v256_v52  ;;  %v986_v58 = vmul.f32 %v4965_v51, %v967_v54  ;;  %v4336_v49 = vld [vmem:[%s6320_s1 + $0x34] sm:$0xf] }
  0xf2   : > { %v438_v59 = vld [vmem:[#allocation2 + $0x50] sm:$0xff]  ;;  %1053 = vst.msk [vmem:[#allocation2 + $0x30] sm:$0xff] %vm210_vm2, %v4568_v35  ;;  %4337 = vmatpush.msk.msrb.mxu1 %vm311_vm0, %v4336_v49 }
  0xf3   : > { %407 = vst.msk [vmem:[#allocation2 + $0x58] sm:$0xff] %vm210_vm2, %v391_v56  ;;  %v572_v61 = vadd.f32 %v544_v32, %v438_v59  ;;  %4025 = vmatmul.msk.f32.gmra.mxu0 %vm262_vm1, %v4793_v31  ;;  %v1005_v63 = vadd.f32 %v4972_v55, %v986_v58  ;;  %4077 = vmatmul.msk.f32.gmra.mxu2 %vm262_vm1, %v4815_v36  ;;  %v4096_v56 = vld [vmem:[%s4691_s13 + $0xc2] sm:$0xff]  ;;  %v4370_v58 = vld [vmem:[%s6320_s1 + $0x38] sm:$0xf] }
  0xf4   : > { %4043 = vmatmul.msk.f32.gmra.mxu1 %vm262_vm1, %v4091_v18  ;;  %v622_v0 = vld [vmem:[#allocation2 + $0x48] sm:$0xff]  ;;  %4111 = vmatmul.msk.f32.gmra.mxu3 %vm262_vm1, %v4093_v62 }
  0xf5   : > { %588 = vst.msk [vmem:[#allocation2 + $0x50] sm:$0xff] %vm210_vm2, %v572_v61  ;;  %v756_v60 = vadd.f32 %v726_v30, %v622_v0  ;;  %v1021_v1 = vmax.f32 %v1005_v63, 0.0  ;;  %4371 = vmatpush.msk.msrb.mxu2 %vm311_vm0, %v4370_v58  ;;  %v260_v0 = vld [vmem:[#allocation2 + $0x78] sm:$0xff] }
  0xf6   : > { %v803_v2 = vld [vmem:[#allocation2 + $0x40] sm:$0xff]  ;;  %v732_v4 = vpop.f32.mrf.mxu2 }
  0xf7   : > { %772 = vst.msk [vmem:[#allocation2 + $0x48] sm:$0xff] %vm210_vm2, %v756_v60  ;;  %v937_v31 = vadd.f32 %v5057_v12, %v803_v2  ;;  %v5117_v7 = vpop.f32.mrf.mxu3 }
  0xf8   : > { %v368_v5 = vpop.f32.mrf.mxu0  ;;  %1037 = vst.msk [vmem:[%s4992_s15 + $0x30] sm:$0xff] %vm210_vm2, %v1021_v1  ;;  %v968_v25 = vld [vmem:[#allocation2 + $0x38] sm:$0xff] }
  0xf9   : > { %v550_v6 = vpop.f32.mrf.mxu1  ;;  %953 = vst.msk [vmem:[#allocation2 + $0x40] sm:$0xff] %vm210_vm2, %v937_v31  ;;  %v392_v19 = vadd.f32 %v368_v5, %v257_v3  ;;  %v987_v8 = vmul.f32 %v4965_v51, %v968_v25  ;;  %v4097_v25 = vld [vmem:[%s4691_s13 + $0xca] sm:$0xff] }
  0xfa   : > { %v439_v9 = vld [vmem:[#allocation2 + $0x58] sm:$0xff]  ;;  %1054 = vst.msk [vmem:[#allocation2 + $0x38] sm:$0xff] %vm210_vm2, %v4568_v35 }
  0xfb   : > { %408 = vst.msk [vmem:[#allocation2 + $0x60] sm:$0xff] %vm210_vm2, %v392_v19  ;;  %v573_v12 = vadd.f32 %v547_v23, %v439_v9  ;;  %4026 = vmatmul.msk.f32.gmra.mxu0 %vm262_vm1, %v4803_v33  ;;  %v1006_v14 = vadd.f32 %v4972_v55, %v987_v8  ;;  %4078 = vmatmul.msk.f32.gmra.mxu2 %vm262_vm1, %v4841_v38 }
  0xfc   : > { %4044 = vmatmul.msk.f32.gmra.mxu1 %vm262_vm1, %v4092_v45  ;;  %v623_v16 = vld [vmem:[#allocation2 + $0x50] sm:$0xff]  ;;  %4112 = vmatmul.msk.f32.gmra.mxu3 %vm262_vm1, %v5121_v10 }
  0xfd   : > { %589 = vst.msk [vmem:[#allocation2 + $0x58] sm:$0xff] %vm210_vm2, %v573_v12  ;;  %v757_v18 = vadd.f32 %v729_v53, %v623_v16  ;;  %v1022_v33 = vmax.f32 %v1006_v14, 0.0  ;;  %v1079_v14 = vld [vmem:[#allocation2] sm:$0xff] }
  0xfe   : > { %v804_v20 = vld [vmem:[#allocation2 + $0x48] sm:$0xff]  ;;  %v735_v24 = vpop.f32.mrf.mxu2 }
  0xff   : > { %773 = vst.msk [vmem:[#allocation2 + $0x50] sm:$0xff] %vm210_vm2, %v757_v18  ;;  %v938_v11 = vadd.f32 %v5077_v39, %v804_v20  ;;  %v5144_v21 = vpop.f32.mrf.mxu3  ;;  %v5220_v20 = vld [vmem:[%s4691_s13 + $0x19] sm:$0xff] }
 0x100   : > { %v371_v26 = vpop.f32.mrf.mxu0  ;;  %1038 = vst.msk [vmem:[%s4992_s15 + $0x38] sm:$0xff] %vm210_vm2, %v1022_v33  ;;  %v969_v27 = vld [vmem:[#allocation2 + $0x40] sm:$0xff] }
 0x101   : > { %v553_v28 = vpop.f32.mrf.mxu1  ;;  %954 = vst.msk [vmem:[#allocation2 + $0x48] sm:$0xff] %vm210_vm2, %v938_v11  ;;  %v393_v30 = vadd.f32 %v371_v26, %v258_v22  ;;  %v988_v32 = vmul.f32 %v4965_v51, %v969_v27 }
 0x102   : > { %v440_v34 = vld [vmem:[#allocation2 + $0x60] sm:$0xff]  ;;  %1055 = vst.msk [vmem:[#allocation2 + $0x40] sm:$0xff] %vm210_vm2, %v4568_v35 }
 0x103   : > { %409 = vst.msk [vmem:[#allocation2 + $0x68] sm:$0xff] %vm210_vm2, %v393_v30  ;;  %v574_v39 = vadd.f32 %v550_v6, %v440_v34  ;;  %4027 = vmatmul.msk.f32.gmra.mxu0 %vm262_vm1, %v4815_v36  ;;  %v1007_v40 = vadd.f32 %v4972_v55, %v988_v32  ;;  %4079 = vmatmul.msk.f32.gmra.mxu2 %vm262_vm1, %v4869_v41  ;;  %v5232_v30 = vld [vmem:[%s4691_s13 + $0x31] sm:$0xff] }
 0x104   : > { %4045 = vmatmul.msk.f32.gmra.mxu1 %vm262_vm1, %v4093_v62  ;;  %v624_v42 = vld [vmem:[#allocation2 + $0x58] sm:$0xff]  ;;  %4113 = vmatmul.msk.f32.gmra.mxu3 %vm262_vm1, %v5148_v37 }
 0x105   : > { %590 = vst.msk [vmem:[#allocation2 + $0x60] sm:$0xff] %vm210_vm2, %v574_v39  ;;  %v758_v45 = vadd.f32 %v732_v4, %v624_v42  ;;  %v1023_v15 = vmax.f32 %v1007_v40, 0.0  ;;  %v1080_v42 = vld [vmem:[#allocation2 + $0x8] sm:$0xff] }
 0x106   : > { %v805_v46 = vld [vmem:[#allocation2 + $0x50] sm:$0xff]  ;;  %v738_v48 = vpop.f32.mrf.mxu2 }
 0x107   : > { %774 = vst.msk [vmem:[#allocation2 + $0x58] sm:$0xff] %vm210_vm2, %v758_v45  ;;  %v939_v36 = vadd.f32 %v5097_v57, %v805_v46  ;;  %v5171_v17 = vpop.f32.mrf.mxu3 }
 0x108   : > { %v374_v50 = vpop.f32.mrf.mxu0  ;;  %1039 = vst.msk [vmem:[%s4992_s15 + $0x40] sm:$0xff] %vm210_vm2, %v1023_v15  ;;  %v970_v29 = vld [vmem:[#allocation2 + $0x48] sm:$0xff] }
 0x109   : > { %v556_v52 = vpop.f32.mrf.mxu1  ;;  %955 = vst.msk [vmem:[#allocation2 + $0x50] sm:$0xff] %vm210_vm2, %v939_v36  ;;  %v394_v53 = vadd.f32 %v374_v50, %v259_v43  ;;  %v989_v23 = vmul.f32 %v4965_v51, %v970_v29  ;;  %v4133_v43 = vld [vmem:[%s4691_s13 + $0x20] sm:$0xff] }
 0x10a   : > { %v441_v54 = vld [vmem:[#allocation2 + $0x68] sm:$0xff]  ;;  %1056 = vst.msk [vmem:[#allocation2 + $0x48] sm:$0xff] %vm210_vm2, %v4568_v35 }
 0x10b   : > { %410 = vst.msk [vmem:[#allocation2 + $0x70] sm:$0xff] %vm210_vm2, %v394_v53  ;;  %v575_v57 = vadd.f32 %v553_v28, %v441_v54  ;;  %4028 = vmatmul.msk.f32.gmra.mxu0 %vm262_vm1, %v4841_v38  ;;  %v1008_v59 = vadd.f32 %v4972_v55, %v989_v23  ;;  %4080 = vmatmul.msk.f32.gmra.mxu2 %vm262_vm1, %v4883_v44 }
 0x10c   : > { %4046 = vmatmul.msk.f32.gmra.mxu1 %vm262_vm1, %v5121_v10  ;;  %v625_v62 = vld [vmem:[#allocation2 + $0x60] sm:$0xff]  ;;  %4114 = vmatmul.msk.f32.gmra.mxu3 %vm262_vm1, %v4096_v56 }
 0x10d   : > { %591 = vst.msk [vmem:[#allocation2 + $0x68] sm:$0xff] %vm210_vm2, %v575_v57  ;;  %v759_v61 = vadd.f32 %v735_v24, %v625_v62  ;;  %v1024_v38 = vmax.f32 %v1008_v59, 0.0  ;;  %v5226_v24 = vld [vmem:[%s4691_s13 + $0x30] sm:$0xff] }
 0x10e   : > { %v806_v63 = vld [vmem:[#allocation2 + $0x58] sm:$0xff]  ;;  %v741_v1 = vpop.f32.mrf.mxu2 }
 0x10f   : > { %775 = vst.msk [vmem:[#allocation2 + $0x60] sm:$0xff] %vm210_vm2, %v759_v61  ;;  %v940_v60 = vadd.f32 %v5117_v7, %v806_v63  ;;  %v5196_v4 = vpop.f32.mrf.mxu3  ;;  %v1081_v61 = vld [vmem:[#allocation2 + $0x10] sm:$0xff] }
 0x110   : > { %v377_v2 = vpop.f32.mrf.mxu0  ;;  %1040 = vst.msk [vmem:[%s4992_s15 + $0x48] sm:$0xff] %vm210_vm2, %v1024_v38  ;;  %v971_v44 = vld [vmem:[#allocation2 + $0x50] sm:$0xff] }
 0x111   : > { %v559_v3 = vpop.f32.mrf.mxu1  ;;  %956 = vst.msk [vmem:[#allocation2 + $0x58] sm:$0xff] %vm210_vm2, %v940_v60  ;;  %v395_v31 = vadd.f32 %v377_v2, %v260_v0  ;;  %v990_v5 = vmul.f32 %v4965_v51, %v971_v44 }
 0x112   : > { %v442_v6 = vld [vmem:[#allocation2 + $0x70] sm:$0xff]  ;;  %1057 = vst.msk [vmem:[#allocation2 + $0x50] sm:$0xff] %vm210_vm2, %v4568_v35 }
 0x113   : > { %411 = vst.msk [vmem:[#allocation2 + $0x78] sm:$0xff] %vm210_vm2, %v395_v31  ;;  %v576_v19 = vadd.f32 %v556_v52, %v442_v6  ;;  %4029 = vmatmul.msk.f32.gmra.mxu0 %vm262_vm1, %v4869_v41  ;;  %v1009_v7 = vadd.f32 %v4972_v55, %v990_v5  ;;  %4081 = vmatmul.msk.f32.gmra.mxu2 %vm262_vm1, %v4897_v47  ;;  %v4404_v41 = vld [vmem:[%s6320_s1 + $0x3c] sm:$0xf]  ;;  %v5288_v6 = vld [vmem:[%s4691_s13 + $0x49] sm:$0xff] }
 0x114   : > { %4047 = vmatmul.msk.f32.gmra.mxu1 %vm262_vm1, %v5148_v37  ;;  %v626_v8 = vld [vmem:[#allocation2 + $0x68] sm:$0xff]  ;;  %4115 = vmatmul.msk.f32.gmra.mxu3 %vm262_vm1, %v4097_v25  ;;  %v5256_v52 = vld [vmem:[%s4691_s13 + $0x38] sm:$0xff] }
 0x115   : > { %592 = vst.msk [vmem:[#allocation2 + $0x70] sm:$0xff] %vm210_vm2, %v576_v19  ;;  %v760_v9 = vadd.f32 %v738_v48, %v626_v8  ;;  %v1025_v10 = vmax.f32 %v1009_v7, 0.0  ;;  %4405 = vmatpush.msk.msrb.mxu3 %vm311_vm0, %v4404_v41  ;;  %v5250_v48 = vld [vmem:[%s4691_s13 + $0x21] sm:$0xff]  ;;  %v1082_v41 = vld [vmem:[#allocation2 + $0x18] sm:$0xff] }
 0x116   : > { %v807_v12 = vld [vmem:[#allocation2 + $0x60] sm:$0xff]  ;;  %v744_v16 = vpop.f32.mrf.mxu2 }
 0x117   : > { %776 = vst.msk [vmem:[#allocation2 + $0x68] sm:$0xff] %vm210_vm2, %v760_v9  ;;  %v941_v47 = vadd.f32 %v5144_v21, %v807_v12  ;;  %v5228_v26 = vpop.f32.mrf.mxu3 }
 0x118   : > { %v1165_v18 = vpop.f32.mrf.mxu0  ;;  %1041 = vst.msk [vmem:[%s4992_s15 + $0x50] sm:$0xff] %vm210_vm2, %v1025_v10  ;;  %v972_v22 = vld [vmem:[#allocation2 + $0x58] sm:$0xff] }
 0x119   : > { %v1347_v33 = vpop.f32.mrf.mxu1  ;;  %957 = vst.msk [vmem:[#allocation2 + $0x60] sm:$0xff] %vm210_vm2, %v941_v47  ;;  %v1213_v11 = vadd.f32 %v1165_v18, %v1079_v14  ;;  %v991_v28 = vmul.f32 %v4965_v51, %v972_v22 }
 0x11a   : > { %v443_v27 = vld [vmem:[#allocation2 + $0x78] sm:$0xff]  ;;  %1058 = vst.msk [vmem:[#allocation2 + $0x58] sm:$0xff] %vm210_vm2, %v4568_v35 }
 0x11b   : > { %1229 = vst.msk [vmem:[#allocation2] sm:$0xff] %vm210_vm2, %v1213_v11  ;;  %v577_v21 = vadd.f32 %v559_v3, %v443_v27  ;;  %4150 = vmatmul.msk.f32.vlgmr.msra.gmra.mxu0 %vm262_vm1, %v4132_v13  ;;  %v1010_v32 = vadd.f32 %v4972_v55, %v991_v28  ;;  %4220 = vmatmul.msk.f32.vlgmr.msra.gmra.mxu2 %vm262_vm1, %v5226_v24  ;;  %v5282_v3 = vld [vmem:[%s4691_s13 + $0x48] sm:$0xff]  ;;  %v5309_v13 = vld [vmem:[%s4691_s13 + $0x50] sm:$0xff] }
 0x11c   : > { %4184 = vmatmul.msk.f32.vlgmr.msra.gmra.mxu1 %vm262_vm1, %v5220_v20  ;;  %v627_v34 = vld [vmem:[#allocation2 + $0x70] sm:$0xff]  ;;  %4254 = vmatmul.msk.f32.vlgmr.msra.gmra.mxu3 %vm262_vm1, %v5232_v30 }
 0x11d   : > { %593 = vst.msk [vmem:[#allocation2 + $0x78] sm:$0xff] %vm210_vm2, %v577_v21  ;;  %v761_v37 = vadd.f32 %v741_v1, %v627_v34  ;;  %v1026_v39 = vmax.f32 %v1010_v32, 0.0 }
 0x11e   : > { %v808_v40 = vld [vmem:[#allocation2 + $0x68] sm:$0xff]  ;;  %v1529_v15 = vpop.f32.mrf.mxu2 }
 0x11f   : > { %777 = vst.msk [vmem:[#allocation2 + $0x70] sm:$0xff] %vm210_vm2, %v761_v37  ;;  %v942_v45 = vadd.f32 %v5171_v17, %v808_v40  ;;  %v5258_v29 = vpop.f32.mrf.mxu3  ;;  %v5262_v17 = vld [vmem:[%s4691_s13 + $0x39] sm:$0xff] }
 0x120   : > { %v1168_v46 = vpop.f32.mrf.mxu0  ;;  %1042 = vst.msk [vmem:[%s4992_s15 + $0x58] sm:$0xff] %vm210_vm2, %v1026_v39  ;;  %v973_v49 = vld [vmem:[#allocation2 + $0x60] sm:$0xff] }
 0x121   : > { %v1350_v36 = vpop.f32.mrf.mxu1  ;;  %958 = vst.msk [vmem:[#allocation2 + $0x68] sm:$0xff] %vm210_vm2, %v942_v45  ;;  %v1214_v50 = vadd.f32 %v1168_v46, %v1080_v42  ;;  %v992_v53 = vmul.f32 %v4965_v51, %v973_v49  ;;  %v1083_v37 = vld [vmem:[#allocation2 + $0x20] sm:$0xff] }
 0x122   : > { %v1261_v23 = vld [vmem:[#allocation2] sm:$0xff]  ;;  %1059 = vst.msk [vmem:[#allocation2 + $0x60] sm:$0xff] %vm210_vm2, %v4568_v35 }
 0x123   : > { %1230 = vst.msk [vmem:[#allocation2 + $0x8] sm:$0xff] %vm210_vm2, %v1214_v50  ;;  %v1395_v54 = vadd.f32 %v1347_v33, %v1261_v23  ;;  %4151 = vmatmul.msk.f32.gmra.mxu0 %vm262_vm1, %v4133_v43  ;;  %v1011_v56 = vadd.f32 %v4972_v55, %v992_v53  ;;  %4221 = vmatmul.msk.f32.gmra.mxu2 %vm262_vm1, %v5256_v52  ;;  %v5336_v43 = vld [vmem:[%s4691_s13 + $0x60] sm:$0xff] }
 0x124   : > { %4185 = vmatmul.msk.f32.gmra.mxu1 %vm262_vm1, %v5250_v48  ;;  %v628_v57 = vld [vmem:[#allocation2 + $0x78] sm:$0xff]  ;;  %4255 = vmatmul.msk.f32.gmra.mxu3 %vm262_vm1, %v5262_v17 }
 0x125   : > { %1411 = vst.msk [vmem:[#allocation2] sm:$0xff] %vm210_vm2, %v1395_v54  ;;  %v762_v58 = vadd.f32 %v744_v16, %v628_v57  ;;  %v1027_v59 = vmax.f32 %v1011_v56, 0.0 }
 0x126   : > { %v809_v62 = vld [vmem:[#allocation2 + $0x70] sm:$0xff]  ;;  %v1532_v63 = vpop.f32.mrf.mxu2 }
 0x127   : > { %778 = vst.msk [vmem:[#allocation2 + $0x78] sm:$0xff] %vm210_vm2, %v762_v58  ;;  %v943_v38 = vadd.f32 %v5196_v4, %v809_v62  ;;  %v5284_v44 = vpop.f32.mrf.mxu3  ;;  %v1084_v58 = vld [vmem:[#allocation2 + $0x28] sm:$0xff] }
 0x128   : > { %v1171_v0 = vpop.f32.mrf.mxu0  ;;  %1043 = vst.msk [vmem:[%s4992_s15 + $0x60] sm:$0xff] %vm210_vm2, %v1027_v59  ;;  %v974_v1 = vld [vmem:[#allocation2 + $0x68] sm:$0xff] }
 0x129   : > { %v1353_v60 = vpop.f32.mrf.mxu1  ;;  %959 = vst.msk [vmem:[#allocation2 + $0x70] sm:$0xff] %vm210_vm2, %v943_v38  ;;  %v1215_v2 = vadd.f32 %v1171_v0, %v1081_v61  ;;  %v993_v31 = vmul.f32 %v4965_v51, %v974_v1 }
 0x12a   : > { %v1262_v5 = vld [vmem:[#allocation2 + $0x8] sm:$0xff]  ;;  %1060 = vst.msk [vmem:[#allocation2 + $0x68] sm:$0xff] %vm210_vm2, %v4568_v35 }
 0x12b   : > { %1231 = vst.msk [vmem:[#allocation2 + $0x10] sm:$0xff] %vm210_vm2, %v1215_v2  ;;  %v1396_v4 = vadd.f32 %v1350_v36, %v1262_v5  ;;  %4152 = vmatmul.msk.f32.gmra.mxu0 %vm262_vm1, %v5226_v24  ;;  %v1012_v25 = vadd.f32 %v4972_v55, %v993_v31  ;;  %4222 = vmatmul.msk.f32.gmra.mxu2 %vm262_vm1, %v5282_v3  ;;  %v5315_v24 = vld [vmem:[%s4691_s13 + $0x51] sm:$0xff]  ;;  %v5369_v31 = vld [vmem:[%s4691_s13 + $0x69] sm:$0xff] }
 0x12c   : > { %4186 = vmatmul.msk.f32.gmra.mxu1 %vm262_vm1, %v5232_v30  ;;  %v1443_v19 = vld [vmem:[#allocation2] sm:$0xff]  ;;  %4256 = vmatmul.msk.f32.gmra.mxu3 %vm262_vm1, %v5288_v6 }
 0x12d   : > { %1412 = vst.msk [vmem:[#allocation2 + $0x8] sm:$0xff] %vm210_vm2, %v1396_v4  ;;  %v1577_v7 = vadd.f32 %v1529_v15, %v1443_v19  ;;  %v1028_v8 = vmax.f32 %v1012_v25, 0.0 }
 0x12e   : > { %v810_v9 = vld [vmem:[#allocation2 + $0x78] sm:$0xff]  ;;  %v1535_v12 = vpop.f32.mrf.mxu2 }
 0x12f   : > { %1593 = vst.msk [vmem:[#allocation2] sm:$0xff] %vm210_vm2, %v1577_v7  ;;  %v944_v10 = vadd.f32 %v5228_v26, %v810_v9  ;;  %v5311_v33 = vpop.f32.mrf.mxu3 }
 0x130   : > { %v1174_v14 = vpop.f32.mrf.mxu0  ;;  %1044 = vst.msk [vmem:[%s4992_s15 + $0x68] sm:$0xff] %vm210_vm2, %v1028_v8  ;;  %v975_v16 = vld [vmem:[#allocation2 + $0x70] sm:$0xff] }
 0x131   : > { %v1356_v47 = vpop.f32.mrf.mxu1  ;;  %960 = vst.msk [vmem:[#allocation2 + $0x78] sm:$0xff] %vm210_vm2, %v944_v10  ;;  %v1216_v18 = vadd.f32 %v1174_v14, %v1082_v41  ;;  %v994_v22 = vmul.f32 %v4965_v51, %v975_v16  ;;  %v1085_v8 = vld [vmem:[#allocation2 + $0x30] sm:$0xff]  ;;  %v5390_v16 = vld [vmem:[%s4691_s13 + $0x78] sm:$0xff] }
 0x132   : > { %v1263_v11 = vld [vmem:[#allocation2 + $0x10] sm:$0xff]  ;;  %1061 = vst.msk [vmem:[#allocation2 + $0x70] sm:$0xff] %vm210_vm2, %v4568_v35 }
 0x133   : > { %1232 = vst.msk [vmem:[#allocation2 + $0x18] sm:$0xff] %vm210_vm2, %v1216_v18  ;;  %v1397_v26 = vadd.f32 %v1353_v60, %v1263_v11  ;;  %4153 = vmatmul.msk.f32.gmra.mxu0 %vm262_vm1, %v5256_v52  ;;  %v1013_v28 = vadd.f32 %v4972_v55, %v994_v22  ;;  %4223 = vmatmul.msk.f32.gmra.mxu2 %vm262_vm1, %v5309_v13  ;;  %v5342_v52 = vld [vmem:[%s4691_s13 + $0x61] sm:$0xff]  ;;  %v5396_v11 = vld [vmem:[%s4691_s13 + $0x79] sm:$0xff] }
 0x134   : > { %4187 = vmatmul.msk.f32.gmra.mxu1 %vm262_vm1, %v5262_v17  ;;  %v1444_v27 = vld [vmem:[#allocation2 + $0x8] sm:$0xff]  ;;  %4257 = vmatmul.msk.f32.gmra.mxu3 %vm262_vm1, %v5315_v24 }
 0x135   : > { %1413 = vst.msk [vmem:[#allocation2 + $0x10] sm:$0xff] %vm210_vm2, %v1397_v26  ;;  %v1578_v21 = vadd.f32 %v1532_v63, %v1444_v27  ;;  %v1029_v32 = vmax.f32 %v1013_v28, 0.0  ;;  %v5363_v60 = vld [vmem:[%s4691_s13 + $0x68] sm:$0xff] }
 0x136   : > { %v1625_v34 = vld [vmem:[#allocation2] sm:$0xff]  ;;  %v1538_v40 = vpop.f32.mrf.mxu2 }
 0x137   : > { %1594 = vst.msk [vmem:[#allocation2 + $0x8] sm:$0xff] %vm210_vm2, %v1578_v21  ;;  %v1759_v39 = vadd.f32 %v5258_v29, %v1625_v34  ;;  %v5338_v36 = vpop.f32.mrf.mxu3 }
 0x138   : > { %v1177_v42 = vpop.f32.mrf.mxu0  ;;  %1045 = vst.msk [vmem:[%s4992_s15 + $0x70] sm:$0xff] %vm210_vm2, %v1029_v32  ;;  %v976_v15 = vld [vmem:[#allocation2 + $0x78] sm:$0xff] }
 0x139   : > { %v1359_v45 = vpop.f32.mrf.mxu1  ;;  %1775 = vst.msk [vmem:[#allocation2] sm:$0xff] %vm210_vm2, %v1759_v39  ;;  %v1217_v46 = vadd.f32 %v1177_v42, %v1083_v37  ;;  %v995_v49 = vmul.f32 %v4965_v51, %v976_v15  ;;  %v1086_v32 = vld [vmem:[#allocation2 + $0x38] sm:$0xff] }
 0x13a   : > { %v1264_v50 = vld [vmem:[#allocation2 + $0x18] sm:$0xff]  ;;  %1062 = vst.msk [vmem:[#allocation2 + $0x78] sm:$0xff] %vm210_vm2, %v4568_v35 }
 0x13b   : > { %1233 = vst.msk [vmem:[#allocation2 + $0x20] sm:$0xff] %vm210_vm2, %v1217_v46  ;;  %v1398_v29 = vadd.f32 %v1356_v47, %v1264_v50  ;;  %4154 = vmatmul.msk.f32.gmra.mxu0 %vm262_vm1, %v5282_v3  ;;  %v1014_v53 = vadd.f32 %v4972_v55, %v995_v49  ;;  %4224 = vmatmul.msk.f32.gmra.mxu2 %vm262_vm1, %v5336_v43  ;;  %v5424_v46 = vld [vmem:[%s6321_s2] ss:$0 sm:$0xff]  ;;  %v5428_v49 = vld [vmem:[%s4691_s13 + $0x81] sm:$0xff] }
 0x13c   : > { %4188 = vmatmul.msk.f32.gmra.mxu1 %vm262_vm1, %v5288_v6  ;;  %v1445_v23 = vld [vmem:[#allocation2 + $0x10] sm:$0xff]  ;;  %4258 = vmatmul.msk.f32.gmra.mxu3 %vm262_vm1, %v5342_v52 }
 0x13d   : > { %1414 = vst.msk [vmem:[#allocation2 + $0x18] sm:$0xff] %vm210_vm2, %v1398_v29  ;;  %v1579_v54 = vadd.f32 %v1535_v12, %v1445_v23  ;;  %v1030_v56 = vmax.f32 %v1014_v53, 0.0  ;;  %v5440_v29 = vld [vmem:[%s6322_s3] ss:$0 sm:$0xff] }
 0x13e   : > { %v1626_v57 = vld [vmem:[#allocation2 + $0x8] sm:$0xff]  ;;  %v1541_v62 = vpop.f32.mrf.mxu2 }
 0x13f   : > { %1595 = vst.msk [vmem:[#allocation2 + $0x10] sm:$0xff] %vm210_vm2, %v1579_v54  ;;  %v1760_v59 = vadd.f32 %v5284_v44, %v1626_v57  ;;  %v5365_v1 = vpop.f32.mrf.mxu3 }
 0x140   : > { %v1180_v61 = vpop.f32.mrf.mxu0  ;;  %1046 = vst.msk [vmem:[%s4992_s15 + $0x78] sm:$0xff] %vm210_vm2, %v1030_v56  ;;  %v1791_v63 = vld [vmem:[#allocation2] sm:$0xff] }
 0x141   : > { %v1362_v38 = vpop.f32.mrf.mxu1  ;;  %1776 = vst.msk [vmem:[#allocation2 + $0x8] sm:$0xff] %vm210_vm2, %v1760_v59  ;;  %v1218_v0 = vadd.f32 %v1180_v61, %v1084_v58  ;;  %v1807_v2 = vmul.f32 %v4965_v51, %v1791_v63  ;;  %v1087_v58 = vld [vmem:[#allocation2 + $0x40] sm:$0xff] }
 0x142   : > { %v1265_v3 = vld [vmem:[#allocation2 + $0x20] sm:$0xff]  ;;  %1872 = vst.msk [vmem:[#allocation2] sm:$0xff] %vm210_vm2, %v4568_v35 }
 0x143   : > { %1234 = vst.msk [vmem:[#allocation2 + $0x28] sm:$0xff] %vm210_vm2, %v1218_v0  ;;  %v1399_v44 = vadd.f32 %v1359_v45, %v1265_v3  ;;  %4155 = vmatmul.msk.f32.gmra.mxu0 %vm262_vm1, %v5309_v13  ;;  %v1823_v5 = vadd.f32 %v4972_v55, %v1807_v2  ;;  %4225 = vmatmul.msk.f32.gmra.mxu2 %vm262_vm1, %v5363_v60  ;;  %v5417_v45 = vld [vmem:[%s4691_s13 + $0x80] sm:$0xff] }
 0x144   : > { %4189 = vmatmul.msk.f32.gmra.mxu1 %vm262_vm1, %v5315_v24  ;;  %v1446_v4 = vld [vmem:[#allocation2 + $0x18] sm:$0xff]  ;;  %4259 = vmatmul.msk.f32.gmra.mxu3 %vm262_vm1, %v5369_v31 }
 0x145   : > { %1415 = vst.msk [vmem:[#allocation2 + $0x20] sm:$0xff] %vm210_vm2, %v1399_v44  ;;  %v1580_v25 = vadd.f32 %v1538_v40, %v1446_v4  ;;  %v1839_v19 = vmax.f32 %v1823_v5, 0.0  ;;  %v5460_v5 = vld [vmem:[%s4691_s13 + $0x91] sm:$0xff] }
 0x146   : > { %v1627_v7 = vld [vmem:[#allocation2 + $0x10] sm:$0xff]  ;;  %v1544_v41 = vpop.f32.mrf.mxu2 }
 0x147   : > { %1596 = vst.msk [vmem:[#allocation2 + $0x18] sm:$0xff] %vm210_vm2, %v1580_v25  ;;  %v1761_v9 = vadd.f32 %v5311_v33, %v1627_v7  ;;  %v5392_v18 = vpop.f32.mrf.mxu3 }
 0x148   : > { %v1183_v10 = vpop.f32.mrf.mxu0  ;;  %4116 = vst.msk [vmem:[%s4992_s15 + $0x80] sm:$0xff] %vm210_vm2, %v1839_v19  ;;  %v1792_v14 = vld [vmem:[#allocation2 + $0x8] sm:$0xff] }
 0x149   : > { %v1365_v12 = vpop.f32.mrf.mxu1  ;;  %1777 = vst.msk [vmem:[#allocation2 + $0x10] sm:$0xff] %vm210_vm2, %v1761_v9  ;;  %v1219_v47 = vadd.f32 %v1183_v10, %v1085_v8  ;;  %v1808_v13 = vmul.f32 %v4965_v51, %v1792_v14  ;;  %v1088_v9 = vld [vmem:[#allocation2 + $0x48] sm:$0xff] }
 0x14a   : > { %v1266_v22 = vld [vmem:[#allocation2 + $0x28] sm:$0xff]  ;;  %1873 = vst.msk [vmem:[#allocation2 + $0x8] sm:$0xff] %vm210_vm2, %v4568_v35 }
 0x14b   : > { %1235 = vst.msk [vmem:[#allocation2 + $0x30] sm:$0xff] %vm210_vm2, %v1219_v47  ;;  %v1400_v33 = vadd.f32 %v1362_v38, %v1266_v22  ;;  %4156 = vmatmul.msk.f32.gmra.mxu0 %vm262_vm1, %v5336_v43  ;;  %v1824_v26 = vadd.f32 %v4972_v55, %v1808_v13  ;;  %4226 = vmatmul.msk.f32.gmra.mxu2 %vm262_vm1, %v5390_v16  ;;  %v5481_v13 = vld [vmem:[%s4691_s13 + $0x98] sm:$0xff] }
 0x14c   : > { %4190 = vmatmul.msk.f32.gmra.mxu1 %vm262_vm1, %v5342_v52  ;;  %v1447_v28 = vld [vmem:[#allocation2 + $0x20] sm:$0xff]  ;;  %4260 = vmatmul.msk.f32.gmra.mxu3 %vm262_vm1, %v5396_v11 }
 0x14d   : > { %1416 = vst.msk [vmem:[#allocation2 + $0x28] sm:$0xff] %vm210_vm2, %v1400_v33  ;;  %v1581_v51 = vadd.f32 %v1541_v62, %v1447_v28  ;;  %v1840_v27 = vmax.f32 %v1824_v26, 0.0  ;;  %v5487_v28 = vld [vmem:[%s4691_s13 + $0x99] sm:$0xff] }
 0x14e   : > { %v1628_v21 = vld [vmem:[#allocation2 + $0x18] sm:$0xff]  ;;  %v1547_v55 = vpop.f32.mrf.mxu2 }
 0x14f   : > { %1597 = vst.msk [vmem:[#allocation2 + $0x20] sm:$0xff] %vm210_vm2, %v1581_v51  ;;  %v1762_v34 = vadd.f32 %v5338_v36, %v1628_v21  ;;  %v5419_v15 = vpop.f32.mrf.mxu3 }
 0x150   : > { %v1186_v37 = vpop.f32.mrf.mxu0  ;;  %4117 = vst.msk [vmem:[%s4992_s15 + $0x88] sm:$0xff] %vm210_vm2, %v1840_v27  ;;  %v1793_v40 = vld [vmem:[#allocation2 + $0x10] sm:$0xff] }
 0x151   : > { %v1368_v39 = vpop.f32.mrf.mxu1  ;;  %1778 = vst.msk [vmem:[#allocation2 + $0x18] sm:$0xff] %vm210_vm2, %v1762_v34  ;;  %v1220_v42 = vadd.f32 %v1186_v37, %v1086_v32  ;;  %v1809_v43 = vmul.f32 %v5424_v46, %v1793_v40 }
 0x152   : > { %v1267_v36 = vld [vmem:[#allocation2 + $0x30] sm:$0xff]  ;;  %1874 = vst.msk [vmem:[#allocation2 + $0x10] sm:$0xff] %vm210_vm2, %v4568_v35 }
 0x153   : > { %1236 = vst.msk [vmem:[#allocation2 + $0x38] sm:$0xff] %vm210_vm2, %v1220_v42  ;;  %v1401_v50 = vadd.f32 %v1365_v12, %v1267_v36  ;;  %4157 = vmatmul.msk.f32.gmra.mxu0 %vm262_vm1, %v5363_v60  ;;  %v1825_v53 = vadd.f32 %v5440_v29, %v1809_v43  ;;  %4227 = vmatmul.msk.f32.gmra.mxu2 %vm262_vm1, %v5417_v45  ;;  %v5454_v60 = vld [vmem:[%s4691_s13 + $0x90] sm:$0xff]  ;;  %v5508_v36 = vld [vmem:[%s4691_s13 + $0xa8] sm:$0xff] }
 0x154   : > { %4191 = vmatmul.msk.f32.gmra.mxu1 %vm262_vm1, %v5369_v31  ;;  %v1448_v23 = vld [vmem:[#allocation2 + $0x28] sm:$0xff]  ;;  %4261 = vmatmul.msk.f32.gmra.mxu3 %vm262_vm1, %v5428_v49 }
 0x155   : > { %1417 = vst.msk [vmem:[#allocation2 + $0x30] sm:$0xff] %vm210_vm2, %v1401_v50  ;;  %v1582_v54 = vadd.f32 %v1544_v41, %v1448_v23  ;;  %v1841_v56 = vmax.f32 %v1825_v53, 0.0 }
 0x156   : > { %v1629_v57 = vld [vmem:[#allocation2 + $0x20] sm:$0xff]  ;;  %v1550_v62 = vpop.f32.mrf.mxu2 }
 0x157   : > { %1598 = vst.msk [vmem:[#allocation2 + $0x28] sm:$0xff] %vm210_vm2, %v1582_v54  ;;  %v1763_v59 = vadd.f32 %v5365_v1, %v1629_v57  ;;  %v5456_v2 = vpop.f32.mrf.mxu3  ;;  %v5514_v54 = vld [vmem:[%s4691_s13 + $0xa9] sm:$0xff] }
 0x158   : > { %v1189_v61 = vpop.f32.mrf.mxu0  ;;  %4118 = vst.msk [vmem:[%s4992_s15 + $0x90] sm:$0xff] %vm210_vm2, %v1841_v56  ;;  %v1794_v63 = vld [vmem:[#allocation2 + $0x18] sm:$0xff] }
 0x159   : > { %v1371_v38 = vpop.f32.mrf.mxu1  ;;  %1779 = vst.msk [vmem:[#allocation2 + $0x20] sm:$0xff] %vm210_vm2, %v1763_v59  ;;  %v1221_v0 = vadd.f32 %v1189_v61, %v1087_v58  ;;  %v1810_v3 = vmul.f32 %v5424_v46, %v1794_v63  ;;  %v1090_v61 = vld [vmem:[#allocation2 + $0x58] sm:$0xff] }
 0x15a   : > { %v1268_v44 = vld [vmem:[#allocation2 + $0x38] sm:$0xff]  ;;  %1875 = vst.msk [vmem:[#allocation2 + $0x18] sm:$0xff] %vm210_vm2, %v4568_v35 }
 0x15b   : > { %1237 = vst.msk [vmem:[#allocation2 + $0x40] sm:$0xff] %vm210_vm2, %v1221_v0  ;;  %v1402_v1 = vadd.f32 %v1368_v39, %v1268_v44  ;;  %4158 = vmatmul.msk.f32.gmra.mxu0 %vm262_vm1, %v5390_v16  ;;  %v1826_v4 = vadd.f32 %v5440_v29, %v1810_v3  ;;  %4228 = vmatmul.msk.f32.gmra.mxu2 %vm262_vm1, %v5454_v60 }
 0x15c   : > { %4192 = vmatmul.msk.f32.gmra.mxu1 %vm262_vm1, %v5396_v11  ;;  %v1449_v25 = vld [vmem:[#allocation2 + $0x30] sm:$0xff]  ;;  %4262 = vmatmul.msk.f32.gmra.mxu3 %vm262_vm1, %v5460_v5 }
 0x15d   : > { %1418 = vst.msk [vmem:[#allocation2 + $0x38] sm:$0xff] %vm210_vm2, %v1402_v1  ;;  %v1583_v19 = vadd.f32 %v1547_v55, %v1449_v25  ;;  %v1842_v7 = vmax.f32 %v1826_v4, 0.0  ;;  %v1089_v55 = vld [vmem:[#allocation2 + $0x50] sm:$0xff] }
 0x15e   : > { %v1630_v8 = vld [vmem:[#allocation2 + $0x28] sm:$0xff]  ;;  %v1553_v10 = vpop.f32.mrf.mxu2  ;;  %v5535_v1 = vld [vmem:[%s4691_s13 + $0xb0] sm:$0xff] }
 0x15f   : > { %1599 = vst.msk [vmem:[#allocation2 + $0x30] sm:$0xff] %vm210_vm2, %v1583_v19  ;;  %v1764_v41 = vadd.f32 %v5392_v18, %v1630_v8  ;;  %v5483_v22 = vpop.f32.mrf.mxu3 }
 0x160   : > { %v1192_v12 = vpop.f32.mrf.mxu0  ;;  %4119 = vst.msk [vmem:[%s4992_s15 + $0x98] sm:$0xff] %vm210_vm2, %v1842_v7  ;;  %v1795_v47 = vld [vmem:[#allocation2 + $0x20] sm:$0xff]  ;;  %v5541_v7 = vld [vmem:[%s4691_s13 + $0xb1] sm:$0xff] }
 0x161   : > { %v1374_v14 = vpop.f32.mrf.mxu1  ;;  %1780 = vst.msk [vmem:[#allocation2 + $0x28] sm:$0xff] %vm210_vm2, %v1764_v41  ;;  %v1222_v16 = vadd.f32 %v1192_v12, %v1088_v9  ;;  %v1811_v33 = vmul.f32 %v5424_v46, %v1795_v47 }
 0x162   : > { %v1269_v26 = vld [vmem:[#allocation2 + $0x40] sm:$0xff]  ;;  %1876 = vst.msk [vmem:[#allocation2 + $0x20] sm:$0xff] %vm210_vm2, %v4568_v35 }
 0x163   : > { %1238 = vst.msk [vmem:[#allocation2 + $0x48] sm:$0xff] %vm210_vm2, %v1222_v16  ;;  %v1403_v18 = vadd.f32 %v1371_v38, %v1269_v26  ;;  %4159 = vmatmul.msk.f32.gmra.mxu0 %vm262_vm1, %v5417_v45  ;;  %v1827_v51 = vadd.f32 %v5440_v29, %v1811_v33  ;;  %4229 = vmatmul.msk.f32.gmra.mxu2 %vm262_vm1, %v5481_v13 }
 0x164   : > { %4193 = vmatmul.msk.f32.gmra.mxu1 %vm262_vm1, %v5428_v49  ;;  %v1450_v27 = vld [vmem:[#allocation2 + $0x38] sm:$0xff]  ;;  %4263 = vmatmul.msk.f32.gmra.mxu3 %vm262_vm1, %v5487_v28 }
 0x165   : > { %1419 = vst.msk [vmem:[#allocation2 + $0x40] sm:$0xff] %vm210_vm2, %v1403_v18  ;;  %v1584_v21 = vadd.f32 %v1550_v62, %v1450_v27  ;;  %v1843_v32 = vmax.f32 %v1827_v51, 0.0  ;;  %v5562_v51 = vld [vmem:[%s4691_s13 + $0xc0] sm:$0xff] }
 0x166   : > { %v1631_v34 = vld [vmem:[#allocation2 + $0x30] sm:$0xff]  ;;  %v1556_v39 = vpop.f32.mrf.mxu2 }
 0x167   : > { %1600 = vst.msk [vmem:[#allocation2 + $0x38] sm:$0xff] %vm210_vm2, %v1584_v21  ;;  %v1765_v37 = vadd.f32 %v5419_v15, %v1631_v34  ;;  %v5510_v50 = vpop.f32.mrf.mxu3  ;;  %v5568_v34 = vld [vmem:[%s4691_s13 + $0xc1] sm:$0xff] }
 0x168   : > { %v1195_v40 = vpop.f32.mrf.mxu0  ;;  %4120 = vst.msk [vmem:[%s4992_s15 + $0xa0] sm:$0xff] %vm210_vm2, %v1843_v32  ;;  %v1796_v45 = vld [vmem:[#allocation2 + $0x28] sm:$0xff] }
 0x169   : > { %v1377_v42 = vpop.f32.mrf.mxu1  ;;  %1781 = vst.msk [vmem:[#allocation2 + $0x30] sm:$0xff] %vm210_vm2, %v1765_v37  ;;  %v1223_v43 = vadd.f32 %v1195_v40, %v1089_v55  ;;  %v1812_v53 = vmul.f32 %v5424_v46, %v1796_v45  ;;  %v1092_v45 = vld [vmem:[#allocation2 + $0x68] sm:$0xff] }
 0x16a   : > { %v1270_v23 = vld [vmem:[#allocation2 + $0x48] sm:$0xff]  ;;  %1877 = vst.msk [vmem:[#allocation2 + $0x28] sm:$0xff] %vm210_vm2, %v4568_v35 }
 0x16b   : > { %1239 = vst.msk [vmem:[#allocation2 + $0x50] sm:$0xff] %vm210_vm2, %v1223_v43  ;;  %v1404_v15 = vadd.f32 %v1374_v14, %v1270_v23  ;;  %4160 = vmatmul.msk.f32.gmra.mxu0 %vm262_vm1, %v5454_v60  ;;  %v1828_v56 = vadd.f32 %v5440_v29, %v1812_v53  ;;  %4230 = vmatmul.msk.f32.gmra.mxu2 %vm262_vm1, %v5508_v36  ;;  %v1091_v14 = vld [vmem:[#allocation2 + $0x60] sm:$0xff] }
 0x16c   : > { %4194 = vmatmul.msk.f32.gmra.mxu1 %vm262_vm1, %v5460_v5  ;;  %v1451_v57 = vld [vmem:[#allocation2 + $0x40] sm:$0xff]  ;;  %4264 = vmatmul.msk.f32.gmra.mxu3 %vm262_vm1, %v5514_v54 }
 0x16d   : > { %1420 = vst.msk [vmem:[#allocation2 + $0x48] sm:$0xff] %vm210_vm2, %v1404_v15  ;;  %v1585_v58 = vadd.f32 %v1553_v10, %v1451_v57  ;;  %v1844_v59 = vmax.f32 %v1828_v56, 0.0  ;;  %v5589_v57 = vld [vmem:[%s4691_s13 + $0xc8] sm:$0xff] }
 0x16e   : > { %v1632_v62 = vld [vmem:[#allocation2 + $0x38] sm:$0xff]  ;;  %v1559_v63 = vpop.f32.mrf.mxu2 }
 0x16f   : > { %1601 = vst.msk [vmem:[#allocation2 + $0x40] sm:$0xff] %vm210_vm2, %v1585_v58  ;;  %v1766_v38 = vadd.f32 %v5456_v2, %v1632_v62  ;;  %v5537_v4 = vpop.f32.mrf.mxu3 }
 0x170   : > { %v1198_v0 = vpop.f32.mrf.mxu0  ;;  %4121 = vst.msk [vmem:[%s4992_s15 + $0xa8] sm:$0xff] %vm210_vm2, %v1844_v59  ;;  %v1797_v3 = vld [vmem:[#allocation2 + $0x30] sm:$0xff] }
 0x171   : > { %v1380_v60 = vpop.f32.mrf.mxu1  ;;  %1782 = vst.msk [vmem:[#allocation2 + $0x38] sm:$0xff] %vm210_vm2, %v1766_v38  ;;  %v1224_v44 = vadd.f32 %v1198_v0, %v1090_v61  ;;  %v1813_v25 = vmul.f32 %v5424_v46, %v1797_v3  ;;  %v5595_v61 = vld [vmem:[%s4691_s13 + $0xc9] sm:$0xff] }
 0x172   : > { %v1271_v19 = vld [vmem:[#allocation2 + $0x50] sm:$0xff]  ;;  %1878 = vst.msk [vmem:[#allocation2 + $0x30] sm:$0xff] %vm210_vm2, %v4568_v35 }
 0x173   : > { %1240 = vst.msk [vmem:[#allocation2 + $0x58] sm:$0xff] %vm210_vm2, %v1224_v44  ;;  %v1405_v2 = vadd.f32 %v1377_v42, %v1271_v19  ;;  %4161 = vmatmul.msk.f32.gmra.mxu0 %vm262_vm1, %v5481_v13  ;;  %v1829_v8 = vadd.f32 %v5440_v29, %v1813_v25  ;;  %4231 = vmatmul.msk.f32.gmra.mxu2 %vm262_vm1, %v5535_v1  ;;  %v1093_v44 = vld [vmem:[#allocation2 + $0x70] sm:$0xff] }
 0x174   : > { %4195 = vmatmul.msk.f32.gmra.mxu1 %vm262_vm1, %v5487_v28  ;;  %v1452_v9 = vld [vmem:[#allocation2 + $0x48] sm:$0xff]  ;;  %4265 = vmatmul.msk.f32.gmra.mxu3 %vm262_vm1, %v5541_v7 }
 0x175   : > { %1421 = vst.msk [vmem:[#allocation2 + $0x50] sm:$0xff] %vm210_vm2, %v1405_v2  ;;  %v1586_v41 = vadd.f32 %v1556_v39, %v1452_v9  ;;  %v1845_v10 = vmax.f32 %v1829_v8, 0.0 }
 0x176   : > { %v1633_v12 = vld [vmem:[#allocation2 + $0x40] sm:$0xff]  ;;  %v1562_v16 = vpop.f32.mrf.mxu2 }
 0x177   : > { %1602 = vst.msk [vmem:[#allocation2 + $0x48] sm:$0xff] %vm210_vm2, %v1586_v41  ;;  %v1767_v47 = vadd.f32 %v5483_v22, %v1633_v12  ;;  %v5564_v27 = vpop.f32.mrf.mxu3  ;;  %v4216_v41 = vld [vmem:[%s4691_s13 + $0xd8] sm:$0xff] }
 0x178   : > { %v1201_v13 = vpop.f32.mrf.mxu0  ;;  %4122 = vst.msk [vmem:[%s4992_s15 + $0xb0] sm:$0xff] %vm210_vm2, %v1845_v10  ;;  %v1798_v26 = vld [vmem:[#allocation2 + $0x38] sm:$0xff] }
 0x179   : > { %v1383_v33 = vpop.f32.mrf.mxu1  ;;  %1783 = vst.msk [vmem:[#allocation2 + $0x40] sm:$0xff] %vm210_vm2, %v1767_v47  ;;  %v1225_v18 = vadd.f32 %v1201_v13, %v1091_v14  ;;  %v1814_v21 = vmul.f32 %v5424_v46, %v1798_v26  ;;  %v5620_v47 = vld [vmem:[%s4691_s13 + $0xd9] sm:$0xff] }
 0x17a   : > { %v1272_v32 = vld [vmem:[#allocation2 + $0x58] sm:$0xff]  ;;  %1879 = vst.msk [vmem:[#allocation2 + $0x38] sm:$0xff] %vm210_vm2, %v4568_v35 }
 0x17b   : > { %1241 = vst.msk [vmem:[#allocation2 + $0x60] sm:$0xff] %vm210_vm2, %v1225_v18  ;;  %v1406_v22 = vadd.f32 %v1380_v60, %v1272_v32  ;;  %4162 = vmatmul.msk.f32.gmra.mxu0 %vm262_vm1, %v5508_v36  ;;  %v1830_v55 = vadd.f32 %v5440_v29, %v1814_v21  ;;  %4232 = vmatmul.msk.f32.gmra.mxu2 %vm262_vm1, %v5562_v51 }
 0x17c   : > { %4196 = vmatmul.msk.f32.gmra.mxu1 %vm262_vm1, %v5514_v54  ;;  %v1453_v37 = vld [vmem:[#allocation2 + $0x50] sm:$0xff]  ;;  %4266 = vmatmul.msk.f32.gmra.mxu3 %vm262_vm1, %v5568_v34 }
 0x17d   : > { %1422 = vst.msk [vmem:[#allocation2 + $0x58] sm:$0xff] %vm210_vm2, %v1406_v22  ;;  %v1587_v39 = vadd.f32 %v1559_v63, %v1453_v37  ;;  %v1846_v40 = vmax.f32 %v1830_v55, 0.0 }
 0x17e   : > { %v1634_v42 = vld [vmem:[#allocation2 + $0x48] sm:$0xff]  ;;  %v1565_v36 = vpop.f32.mrf.mxu2 }
 0x17f   : > { %1603 = vst.msk [vmem:[#allocation2 + $0x50] sm:$0xff] %vm210_vm2, %v1587_v39  ;;  %v1768_v43 = vadd.f32 %v5510_v50, %v1634_v42  ;;  %v5591_v58 = vpop.f32.mrf.mxu3 }
 0x180   : > { %v1204_v53 = vpop.f32.mrf.mxu0  ;;  %4123 = vst.msk [vmem:[%s4992_s15 + $0xb8] sm:$0xff] %vm210_vm2, %v1846_v40  ;;  %v1799_v15 = vld [vmem:[#allocation2 + $0x40] sm:$0xff] }
 0x181   : > { %v1386_v23 = vpop.f32.mrf.mxu1  ;;  %1784 = vst.msk [vmem:[#allocation2 + $0x48] sm:$0xff] %vm210_vm2, %v1768_v43  ;;  %v1226_v56 = vadd.f32 %v1204_v53, %v1092_v45  ;;  %v1815_v59 = vmul.f32 %v5424_v46, %v1799_v15  ;;  %v4217_v40 = vld [vmem:[%s4691_s13 + $0xe0] sm:$0xff] }
 0x182   : > { %v1273_v62 = vld [vmem:[#allocation2 + $0x60] sm:$0xff]  ;;  %1880 = vst.msk [vmem:[#allocation2 + $0x40] sm:$0xff] %vm210_vm2, %v4568_v35 }
 0x183   : > { %1242 = vst.msk [vmem:[#allocation2 + $0x68] sm:$0xff] %vm210_vm2, %v1226_v56  ;;  %v1407_v50 = vadd.f32 %v1383_v33, %v1273_v62  ;;  %4163 = vmatmul.msk.f32.gmra.mxu0 %vm262_vm1, %v5535_v1  ;;  %v1831_v38 = vadd.f32 %v5440_v29, %v1815_v59  ;;  %4233 = vmatmul.msk.f32.gmra.mxu2 %vm262_vm1, %v5589_v57 }
 0x184   : > { %4197 = vmatmul.msk.f32.gmra.mxu1 %vm262_vm1, %v5541_v7  ;;  %v1454_v63 = vld [vmem:[#allocation2 + $0x58] sm:$0xff]  ;;  %4267 = vmatmul.msk.f32.gmra.mxu3 %vm262_vm1, %v5595_v61 }
 0x185   : > { %1423 = vst.msk [vmem:[#allocation2 + $0x60] sm:$0xff] %vm210_vm2, %v1407_v50  ;;  %v1588_v0 = vadd.f32 %v1562_v16, %v1454_v63  ;;  %v1847_v60 = vmax.f32 %v1831_v38, 0.0 }
 0x186   : > { %v1635_v3 = vld [vmem:[#allocation2 + $0x50] sm:$0xff]  ;;  %v1568_v25 = vpop.f32.mrf.mxu2 }
 0x187   : > { %1604 = vst.msk [vmem:[#allocation2 + $0x58] sm:$0xff] %vm210_vm2, %v1588_v0  ;;  %v1769_v1 = vadd.f32 %v5537_v4, %v1635_v3  ;;  %v5616_v10 = vpop.f32.mrf.mxu3  ;;  %v4320_v0 = vld [vmem:[%s4691_s13 + $0x1a] sm:$0xff] }
 0x188   : > { %v1207_v19 = vpop.f32.mrf.mxu0  ;;  %4124 = vst.msk [vmem:[%s4992_s15 + $0xc0] sm:$0xff] %vm210_vm2, %v1847_v60  ;;  %v1800_v8 = vld [vmem:[#allocation2 + $0x48] sm:$0xff] }
 0x189   : > { %v1389_v2 = vpop.f32.mrf.mxu1  ;;  %1785 = vst.msk [vmem:[#allocation2 + $0x50] sm:$0xff] %vm210_vm2, %v1769_v1  ;;  %v1227_v9 = vadd.f32 %v1207_v19, %v1093_v44  ;;  %v1816_v12 = vmul.f32 %v5424_v46, %v1800_v8  ;;  %v4388_v19 = vld [vmem:[%s4691_s13 + $0x32] sm:$0xff] }
 0x18a   : > { %v1274_v14 = vld [vmem:[#allocation2 + $0x68] sm:$0xff]  ;;  %1881 = vst.msk [vmem:[#allocation2 + $0x48] sm:$0xff] %vm210_vm2, %v4568_v35 }
 0x18b   : > { %1243 = vst.msk [vmem:[#allocation2 + $0x70] sm:$0xff] %vm210_vm2, %v1227_v9  ;;  %v1408_v4 = vadd.f32 %v1386_v23, %v1274_v14  ;;  %4164 = vmatmul.msk.f32.gmra.mxu0 %vm262_vm1, %v5562_v51  ;;  %v1832_v16 = vadd.f32 %v5440_v29, %v1816_v12  ;;  %4234 = vmatmul.msk.f32.gmra.mxu2 %vm262_vm1, %v4216_v41  ;;  %v1094_v51 = vld [vmem:[#allocation2 + $0x78] sm:$0xff]  ;;  %v1905_v14 = vld [vmem:[#allocation2 + $0x8] sm:$0xff] }
 0x18c   : > { %4198 = vmatmul.msk.f32.gmra.mxu1 %vm262_vm1, %v5568_v34  ;;  %v1455_v13 = vld [vmem:[#allocation2 + $0x60] sm:$0xff]  ;;  %4268 = vmatmul.msk.f32.gmra.mxu3 %vm262_vm1, %v5620_v47 }
 0x18d   : > { %1424 = vst.msk [vmem:[#allocation2 + $0x68] sm:$0xff] %vm210_vm2, %v1408_v4  ;;  %v1589_v33 = vadd.f32 %v1565_v36, %v1455_v13  ;;  %v1848_v26 = vmax.f32 %v1832_v16, 0.0  ;;  %v5644_v36 = vld [vmem:[%s4691_s13 + $0xe1] sm:$0xff] }
 0x18e   : > { %v1636_v18 = vld [vmem:[#allocation2 + $0x58] sm:$0xff]  ;;  %v1571_v32 = vpop.f32.mrf.mxu2 }
 0x18f   : > { %1605 = vst.msk [vmem:[#allocation2 + $0x60] sm:$0xff] %vm210_vm2, %v1589_v33  ;;  %v1770_v21 = vadd.f32 %v5564_v27, %v1636_v18  ;;  %v5640_v42 = vpop.f32.mrf.mxu3  ;;  %v4321_v33 = vld [vmem:[%s4691_s13 + $0x22] sm:$0xff] }
 0x190   : > { %v1210_v22 = vpop.f32.mrf.mxu0  ;;  %4125 = vst.msk [vmem:[%s4992_s15 + $0xc8] sm:$0xff] %vm210_vm2, %v1848_v26  ;;  %v1801_v37 = vld [vmem:[#allocation2 + $0x50] sm:$0xff] }
 0x191   : > { %v1392_v55 = vpop.f32.mrf.mxu1  ;;  %1786 = vst.msk [vmem:[#allocation2 + $0x58] sm:$0xff] %vm210_vm2, %v1770_v21  ;;  %v1228_v39 = vadd.f32 %v1210_v22, %v1094_v51  ;;  %v1817_v45 = vmul.f32 %v5424_v46, %v1801_v37  ;;  %v4389_v22 = vld [vmem:[%s4691_s13 + $0x3a] sm:$0xff] }
 0x192   : > { %v1275_v43 = vld [vmem:[#allocation2 + $0x70] sm:$0xff]  ;;  %1882 = vst.msk [vmem:[#allocation2 + $0x50] sm:$0xff] %vm210_vm2, %v4568_v35 }
 0x193   : > { %1244 = vst.msk [vmem:[#allocation2 + $0x78] sm:$0xff] %vm210_vm2, %v1228_v39  ;;  %v1409_v27 = vadd.f32 %v1389_v2, %v1275_v43  ;;  %4165 = vmatmul.msk.f32.gmra.mxu0 %vm262_vm1, %v5589_v57  ;;  %v1833_v53 = vadd.f32 %v5440_v29, %v1817_v45  ;;  %4235 = vmatmul.msk.f32.gmra.mxu2 %vm262_vm1, %v4217_v40  ;;  %v1904_v57 = vld [vmem:[#allocation2] sm:$0xff]  ;;  %v1906_v43 = vld [vmem:[#allocation2 + $0x10] sm:$0xff] }
 0x194   : > { %4199 = vmatmul.msk.f32.gmra.mxu1 %vm262_vm1, %v5595_v61  ;;  %v1456_v23 = vld [vmem:[#allocation2 + $0x68] sm:$0xff]  ;;  %4269 = vmatmul.msk.f32.gmra.mxu3 %vm262_vm1, %v5644_v36 }
 0x195   : > { %1425 = vst.msk [vmem:[#allocation2 + $0x70] sm:$0xff] %vm210_vm2, %v1409_v27  ;;  %v1590_v15 = vadd.f32 %v1568_v25, %v1456_v23  ;;  %v1849_v56 = vmax.f32 %v1833_v53, 0.0 }
 0x196   : > { %v1637_v59 = vld [vmem:[#allocation2 + $0x60] sm:$0xff]  ;;  %v1574_v50 = vpop.f32.mrf.mxu2 }
 0x197   : > { %1606 = vst.msk [vmem:[#allocation2 + $0x68] sm:$0xff] %vm210_vm2, %v1590_v15  ;;  %v1771_v62 = vadd.f32 %v5591_v58, %v1637_v59  ;;  %v5664_v44 = vpop.f32.mrf.mxu3 }
 0x198   : > { %v1990_v38 = vpop.f32.mrf.mxu0  ;;  %4126 = vst.msk [vmem:[%s4992_s15 + $0xd0] sm:$0xff] %vm210_vm2, %v1849_v56  ;;  %v1802_v60 = vld [vmem:[#allocation2 + $0x58] sm:$0xff] }
 0x199   : > { %v2172_v63 = vpop.f32.mrf.mxu1  ;;  %1787 = vst.msk [vmem:[#allocation2 + $0x60] sm:$0xff] %vm210_vm2, %v1771_v62  ;;  %v2038_v3 = vadd.f32 %v1990_v38, %v1904_v57  ;;  %v1818_v1 = vmul.f32 %v5424_v46, %v1802_v60 }
 0x19a   : > { %v1276_v25 = vld [vmem:[#allocation2 + $0x78] sm:$0xff]  ;;  %1883 = vst.msk [vmem:[#allocation2 + $0x58] sm:$0xff] %vm210_vm2, %v4568_v35 }
 0x19b   : > { %2054 = vst.msk [vmem:[#allocation2] sm:$0xff] %vm210_vm2, %v2038_v3  ;;  %v1410_v58 = vadd.f32 %v1392_v55, %v1276_v25  ;;  %4304 = vmatmul.msk.f32.vlgmr.msrb.gmra.mxu0 %vm262_vm1, %v5220_v20  ;;  %v1834_v2 = vadd.f32 %v5440_v29, %v1818_v1  ;;  %4372 = vmatmul.msk.f32.vlgmr.msrb.gmra.mxu2 %vm262_vm1, %v5232_v30  ;;  %v1907_v1 = vld [vmem:[#allocation2 + $0x18] sm:$0xff] }
 0x19c   : > { %4338 = vmatmul.msk.f32.vlgmr.msrb.gmra.mxu1 %vm262_vm1, %v4320_v0  ;;  %v1457_v8 = vld [vmem:[#allocation2 + $0x70] sm:$0xff]  ;;  %4406 = vmatmul.msk.f32.vlgmr.msrb.gmra.mxu3 %vm262_vm1, %v4388_v19 }
 0x19d   : > { %1426 = vst.msk [vmem:[#allocation2 + $0x78] sm:$0xff] %vm210_vm2, %v1410_v58  ;;  %v1591_v9 = vadd.f32 %v1571_v32, %v1457_v8  ;;  %v1850_v41 = vmax.f32 %v1834_v2, 0.0 }
 0x19e   : > { %v1638_v12 = vld [vmem:[#allocation2 + $0x68] sm:$0xff]  ;;  %v2357_v4 = vpop.f32.mrf.mxu2 }
 0x19f   : > { %1607 = vst.msk [vmem:[#allocation2 + $0x70] sm:$0xff] %vm210_vm2, %v1591_v9  ;;  %v1772_v20 = vadd.f32 %v5616_v10, %v1638_v12  ;;  %v5685_v51 = vpop.f32.mrf.mxu3 }
 0x1a0   : > { %v1993_v16 = vpop.f32.mrf.mxu0  ;;  %4127 = vst.msk [vmem:[%s4992_s15 + $0xd8] sm:$0xff] %vm210_vm2, %v1850_v41  ;;  %v1803_v26 = vld [vmem:[#allocation2 + $0x60] sm:$0xff] }
 0x1a1   : > { %v2175_v13 = vpop.f32.mrf.mxu1  ;;  %1788 = vst.msk [vmem:[#allocation2 + $0x68] sm:$0xff] %vm210_vm2, %v1772_v20  ;;  %v2039_v18 = vadd.f32 %v1993_v16, %v1905_v14  ;;  %v1819_v21 = vmul.f32 %v5424_v46, %v1803_v26  ;;  %v4391_v14 = vld [vmem:[%s4691_s13 + $0x52] sm:$0xff]  ;;  %v1908_v26 = vld [vmem:[#allocation2 + $0x20] sm:$0xff] }
 0x1a2   : > { %v2086_v32 = vld [vmem:[#allocation2] sm:$0xff]  ;;  %1884 = vst.msk [vmem:[#allocation2 + $0x60] sm:$0xff] %vm210_vm2, %v4568_v35 }
 0x1a3   : > { %2055 = vst.msk [vmem:[#allocation2 + $0x8] sm:$0xff] %vm210_vm2, %v2039_v18  ;;  %v2220_v10 = vadd.f32 %v2172_v63, %v2086_v32  ;;  %4305 = vmatmul.msk.f32.gmra.mxu0 %vm262_vm1, %v5250_v48  ;;  %v1835_v55 = vadd.f32 %v5440_v29, %v1819_v21  ;;  %4373 = vmatmul.msk.f32.gmra.mxu2 %vm262_vm1, %v5262_v17 }
 0x1a4   : > { %4339 = vmatmul.msk.f32.gmra.mxu1 %vm262_vm1, %v4321_v33  ;;  %v1458_v37 = vld [vmem:[#allocation2 + $0x78] sm:$0xff]  ;;  %4407 = vmatmul.msk.f32.gmra.mxu3 %vm262_vm1, %v4389_v22 }
 0x1a5   : > { %2236 = vst.msk [vmem:[#allocation2] sm:$0xff] %vm210_vm2, %v2220_v10  ;;  %v1592_v39 = vadd.f32 %v1574_v50, %v1458_v37  ;;  %v1851_v40 = vmax.f32 %v1835_v55, 0.0  ;;  %v4390_v50 = vld [vmem:[%s4691_s13 + $0x4a] sm:$0xff] }
 0x1a6   : > { %v1639_v45 = vld [vmem:[#allocation2 + $0x70] sm:$0xff]  ;;  %v2360_v27 = vpop.f32.mrf.mxu2 }
 0x1a7   : > { %1608 = vst.msk [vmem:[#allocation2 + $0x78] sm:$0xff] %vm210_vm2, %v1592_v39  ;;  %v1773_v48 = vadd.f32 %v5640_v42, %v1639_v45  ;;  %v5705_v59 = vpop.f32.mrf.mxu3 }
 0x1a8   : > { %v1996_v53 = vpop.f32.mrf.mxu0  ;;  %4128 = vst.msk [vmem:[%s4992_s15 + $0xe0] sm:$0xff] %vm210_vm2, %v1851_v40  ;;  %v1804_v15 = vld [vmem:[#allocation2 + $0x68] sm:$0xff] }
 0x1a9   : > { %v2178_v23 = vpop.f32.mrf.mxu1  ;;  %1789 = vst.msk [vmem:[#allocation2 + $0x70] sm:$0xff] %vm210_vm2, %v1773_v48  ;;  %v2040_v56 = vadd.f32 %v1996_v53, %v1906_v43  ;;  %v1820_v57 = vmul.f32 %v5424_v46, %v1804_v15  ;;  %v4392_v40 = vld [vmem:[%s4691_s13 + $0x62] sm:$0xff] }
 0x1aa   : > { %v2087_v62 = vld [vmem:[#allocation2 + $0x8] sm:$0xff]  ;;  %1885 = vst.msk [vmem:[#allocation2 + $0x68] sm:$0xff] %vm210_vm2, %v4568_v35 }
 0x1ab   : > { %2056 = vst.msk [vmem:[#allocation2 + $0x10] sm:$0xff] %vm210_vm2, %v2040_v56  ;;  %v2221_v42 = vadd.f32 %v2175_v13, %v2087_v62  ;;  %4306 = vmatmul.msk.f32.gmra.mxu0 %vm262_vm1, %v5232_v30  ;;  %v1836_v38 = vadd.f32 %v5440_v29, %v1820_v57  ;;  %4374 = vmatmul.msk.f32.gmra.mxu2 %vm262_vm1, %v5288_v6 }
 0x1ac   : > { %4340 = vmatmul.msk.f32.gmra.mxu1 %vm262_vm1, %v4388_v19  ;;  %v2271_v63 = vld [vmem:[#allocation2] sm:$0xff]  ;;  %4408 = vmatmul.msk.f32.gmra.mxu3 %vm262_vm1, %v4390_v50 }
 0x1ad   : > { %2237 = vst.msk [vmem:[#allocation2 + $0x8] sm:$0xff] %vm210_vm2, %v2221_v42  ;;  %v2405_v0 = vadd.f32 %v2357_v4, %v2271_v63  ;;  %v1852_v60 = vmax.f32 %v1836_v38, 0.0 }
 0x1ae   : > { %v1640_v3 = vld [vmem:[#allocation2 + $0x78] sm:$0xff]  ;;  %v2363_v25 = vpop.f32.mrf.mxu2 }
 0x1af   : > { %2421 = vst.msk [vmem:[#allocation2] sm:$0xff] %vm210_vm2, %v2405_v0  ;;  %v1774_v30 = vadd.f32 %v5664_v44, %v1640_v3  ;;  %v5725_v9 = vpop.f32.mrf.mxu3  ;;  %v4393_v0 = vld [vmem:[%s4691_s13 + $0x6a] sm:$0xff] }
 0x1b0   : > { %v1999_v19 = vpop.f32.mrf.mxu0  ;;  %4129 = vst.msk [vmem:[%s4992_s15 + $0xe8] sm:$0xff] %vm210_vm2, %v1852_v60  ;;  %v1805_v2 = vld [vmem:[#allocation2 + $0x70] sm:$0xff] }
 0x1b1   : > { %v2181_v58 = vpop.f32.mrf.mxu1  ;;  %1790 = vst.msk [vmem:[#allocation2 + $0x78] sm:$0xff] %vm210_vm2, %v1774_v30  ;;  %v2041_v8 = vadd.f32 %v1999_v19, %v1907_v1  ;;  %v1821_v41 = vmul.f32 %v5424_v46, %v1805_v2  ;;  %v1910_v19 = vld [vmem:[#allocation2 + $0x30] sm:$0xff] }
 0x1b2   : > { %v2088_v12 = vld [vmem:[#allocation2 + $0x10] sm:$0xff]  ;;  %1886 = vst.msk [vmem:[#allocation2 + $0x70] sm:$0xff] %vm210_vm2, %v4568_v35 }
 0x1b3   : > { %2057 = vst.msk [vmem:[#allocation2 + $0x18] sm:$0xff] %vm210_vm2, %v2041_v8  ;;  %v2222_v44 = vadd.f32 %v2178_v23, %v2088_v12  ;;  %4307 = vmatmul.msk.f32.gmra.mxu0 %vm262_vm1, %v5262_v17  ;;  %v1837_v20 = vadd.f32 %v5440_v29, %v1821_v41  ;;  %4375 = vmatmul.msk.f32.gmra.mxu2 %vm262_vm1, %v5315_v24  ;;  %v1909_v23 = vld [vmem:[#allocation2 + $0x28] sm:$0xff] }
 0x1b4   : > { %4341 = vmatmul.msk.f32.gmra.mxu1 %vm262_vm1, %v4389_v22  ;;  %v2272_v4 = vld [vmem:[#allocation2 + $0x8] sm:$0xff]  ;;  %4409 = vmatmul.msk.f32.gmra.mxu3 %vm262_vm1, %v4391_v14 }
 0x1b5   : > { %2238 = vst.msk [vmem:[#allocation2 + $0x10] sm:$0xff] %vm210_vm2, %v2222_v44  ;;  %v2406_v16 = vadd.f32 %v2360_v27, %v2272_v4  ;;  %v1853_v13 = vmax.f32 %v1837_v20, 0.0  ;;  %v4394_v4 = vld [vmem:[%s4691_s13 + $0x7a] sm:$0xff] }
 0x1b6   : > { %v2453_v33 = vld [vmem:[#allocation2] sm:$0xff]  ;;  %v2366_v18 = vpop.f32.mrf.mxu2 }
 0x1b7   : > { %2422 = vst.msk [vmem:[#allocation2 + $0x8] sm:$0xff] %vm210_vm2, %v2406_v16  ;;  %v2587_v17 = vadd.f32 %v5685_v51, %v2453_v33  ;;  %v5745_v55 = vpop.f32.mrf.mxu3 }
 0x1b8   : > { %v2002_v21 = vpop.f32.mrf.mxu0  ;;  %4130 = vst.msk [vmem:[%s4992_s15 + $0xf0] sm:$0xff] %vm210_vm2, %v1853_v13  ;;  %v1806_v22 = vld [vmem:[#allocation2 + $0x78] sm:$0xff] }
 0x1b9   : > { %v2184_v32 = vpop.f32.mrf.mxu1  ;;  %2603 = vst.msk [vmem:[#allocation2] sm:$0xff] %vm210_vm2, %v2587_v17  ;;  %v2042_v10 = vadd.f32 %v2002_v21, %v1908_v26  ;;  %v1822_v37 = vmul.f32 %v5424_v46, %v1806_v22 }
 0x1ba   : > { %v2089_v39 = vld [vmem:[#allocation2 + $0x18] sm:$0xff]  ;;  %1887 = vst.msk [vmem:[#allocation2 + $0x78] sm:$0xff] %vm210_vm2, %v4568_v35 }
 0x1bb   : > { %2058 = vst.msk [vmem:[#allocation2 + $0x20] sm:$0xff] %vm210_vm2, %v2042_v10  ;;  %v2223_v51 = vadd.f32 %v2181_v58, %v2089_v39  ;;  %4308 = vmatmul.msk.f32.gmra.mxu0 %vm262_vm1, %v5288_v6  ;;  %v1838_v45 = vadd.f32 %v5440_v29, %v1822_v37  ;;  %4376 = vmatmul.msk.f32.gmra.mxu2 %vm262_vm1, %v5342_v52 }
 0x1bc   : > { %4342 = vmatmul.msk.f32.gmra.mxu1 %vm262_vm1, %v4390_v50  ;;  %v2273_v43 = vld [vmem:[#allocation2 + $0x10] sm:$0xff]  ;;  %4410 = vmatmul.msk.f32.gmra.mxu3 %vm262_vm1, %v4392_v40 }
 0x1bd   : > { %2239 = vst.msk [vmem:[#allocation2 + $0x18] sm:$0xff] %vm210_vm2, %v2223_v51  ;;  %v2407_v48 = vadd.f32 %v2363_v25, %v2273_v43  ;;  %v1854_v27 = vmax.f32 %v1838_v45, 0.0  ;;  %v4395_v45 = vld [vmem:[%s4691_s13 + $0x82] sm:$0xff] }
 0x1be   : > { %v2454_v53 = vld [vmem:[#allocation2 + $0x8] sm:$0xff]  ;;  %v2369_v15 = vpop.f32.mrf.mxu2 }
 0x1bf   : > { %2423 = vst.msk [vmem:[#allocation2 + $0x10] sm:$0xff] %vm210_vm2, %v2407_v48  ;;  %v2588_v6 = vadd.f32 %v5705_v59, %v2454_v53  ;;  %v5765_v42 = vpop.f32.mrf.mxu3 }
 0x1c0   : > { %v2005_v56 = vpop.f32.mrf.mxu0  ;;  %4131 = vst.msk [vmem:[%s4992_s15 + $0xf8] sm:$0xff] %vm210_vm2, %v1854_v27  ;;  %v2619_v62 = vld [vmem:[#allocation2] sm:$0xff] }
 0x1c1   : > { %v2187_v57 = vpop.f32.mrf.mxu1  ;;  %2604 = vst.msk [vmem:[#allocation2 + $0x8] sm:$0xff] %vm210_vm2, %v2588_v6  ;;  %v2043_v50 = vadd.f32 %v2005_v56, %v1909_v23  ;;  %v2635_v38 = vmul.f32 %v5424_v46, %v2619_v62  ;;  %v1912_v6 = vld [vmem:[#allocation2 + $0x40] sm:$0xff] }
 0x1c2   : > { %v2090_v63 = vld [vmem:[#allocation2 + $0x20] sm:$0xff]  ;;  %2700 = vst.msk [vmem:[#allocation2] sm:$0xff] %vm210_vm2, %v4568_v35 }
 0x1c3   : > { %2059 = vst.msk [vmem:[#allocation2 + $0x28] sm:$0xff] %vm210_vm2, %v2043_v50  ;;  %v2224_v59 = vadd.f32 %v2184_v32, %v2090_v63  ;;  %4309 = vmatmul.msk.f32.gmra.mxu0 %vm262_vm1, %v5315_v24  ;;  %v2651_v60 = vadd.f32 %v5440_v29, %v2635_v38  ;;  %4377 = vmatmul.msk.f32.gmra.mxu2 %vm262_vm1, %v5369_v31 }
 0x1c4   : > { %4343 = vmatmul.msk.f32.gmra.mxu1 %vm262_vm1, %v4391_v14  ;;  %v2274_v3 = vld [vmem:[#allocation2 + $0x18] sm:$0xff]  ;;  %4411 = vmatmul.msk.f32.gmra.mxu3 %vm262_vm1, %v4393_v0 }
 0x1c5   : > { %2240 = vst.msk [vmem:[#allocation2 + $0x20] sm:$0xff] %vm210_vm2, %v2224_v59  ;;  %v2408_v1 = vadd.f32 %v2366_v18, %v2274_v3  ;;  %v2667_v30 = vmax.f32 %v2651_v60, 0.0  ;;  %v1911_v18 = vld [vmem:[#allocation2 + $0x38] sm:$0xff] }
 0x1c6   : > { %v2455_v25 = vld [vmem:[#allocation2 + $0x10] sm:$0xff]  ;;  %v2372_v58 = vpop.f32.mrf.mxu2 }
 0x1c7   : > { %2424 = vst.msk [vmem:[#allocation2 + $0x18] sm:$0xff] %vm210_vm2, %v2408_v1  ;;  %v2589_v24 = vadd.f32 %v5725_v9, %v2455_v25  ;;  %v5785_v14 = vpop.f32.mrf.mxu3  ;;  %v4396_v59 = vld [vmem:[%s4691_s13 + $0x92] sm:$0xff] }
 0x1c8   : > { %v2008_v2 = vpop.f32.mrf.mxu0  ;;  %4270 = vst.msk [vmem:[%s4992_s15 + $0x100] sm:$0xff] %vm210_vm2, %v2667_v30  ;;  %v2620_v41 = vld [vmem:[#allocation2 + $0x8] sm:$0xff] }
 0x1c9   : > { %v2190_v8 = vpop.f32.mrf.mxu1  ;;  %2605 = vst.msk [vmem:[#allocation2 + $0x10] sm:$0xff] %vm210_vm2, %v2589_v24  ;;  %v2044_v12 = vadd.f32 %v2008_v2, %v1910_v19  ;;  %v2636_v44 = vmul.f32 %v5424_v46, %v2620_v41  ;;  %v1913_v19 = vld [vmem:[#allocation2 + $0x48] sm:$0xff] }
 0x1ca   : > { %v2091_v20 = vld [vmem:[#allocation2 + $0x28] sm:$0xff]  ;;  %2701 = vst.msk [vmem:[#allocation2 + $0x8] sm:$0xff] %vm210_vm2, %v4568_v35 }
 0x1cb   : > { %2060 = vst.msk [vmem:[#allocation2 + $0x30] sm:$0xff] %vm210_vm2, %v2044_v12  ;;  %v2225_v9 = vadd.f32 %v2187_v57, %v2091_v20  ;;  %4310 = vmatmul.msk.f32.gmra.mxu0 %vm262_vm1, %v5342_v52  ;;  %v2652_v16 = vadd.f32 %v5440_v29, %v2636_v44  ;;  %4378 = vmatmul.msk.f32.gmra.mxu2 %vm262_vm1, %v5396_v11 }
 0x1cc   : > { %4344 = vmatmul.msk.f32.gmra.mxu1 %vm262_vm1, %v4392_v40  ;;  %v2275_v13 = vld [vmem:[#allocation2 + $0x20] sm:$0xff]  ;;  %4412 = vmatmul.msk.f32.gmra.mxu3 %vm262_vm1, %v4394_v4 }
 0x1cd   : > { %2241 = vst.msk [vmem:[#allocation2 + $0x28] sm:$0xff] %vm210_vm2, %v2225_v9  ;;  %v2409_v33 = vadd.f32 %v2369_v15, %v2275_v13  ;;  %v2668_v26 = vmax.f32 %v2652_v16, 0.0 }
 0x1ce   : > { %v2456_v17 = vld [vmem:[#allocation2 + $0x18] sm:$0xff]  ;;  %v2375_v21 = vpop.f32.mrf.mxu2 }
 0x1cf   : > { %2425 = vst.msk [vmem:[#allocation2 + $0x20] sm:$0xff] %vm210_vm2, %v2409_v33  ;;  %v2590_v52 = vadd.f32 %v5745_v55, %v2456_v17  ;;  %v5805_v39 = vpop.f32.mrf.mxu3 }
 0x1d0   : > { %v2011_v32 = vpop.f32.mrf.mxu0  ;;  %4271 = vst.msk [vmem:[%s4992_s15 + $0x108] sm:$0xff] %vm210_vm2, %v2668_v26  ;;  %v2621_v10 = vld [vmem:[#allocation2 + $0x10] sm:$0xff] }
 0x1d1   : > { %v2193_v22 = vpop.f32.mrf.mxu1  ;;  %2606 = vst.msk [vmem:[#allocation2 + $0x18] sm:$0xff] %vm210_vm2, %v2590_v52  ;;  %v2045_v37 = vadd.f32 %v2011_v32, %v1911_v18  ;;  %v2637_v40 = vmul.f32 %v5424_v46, %v2621_v10  ;;  %v1914_v26 = vld [vmem:[#allocation2 + $0x50] sm:$0xff] }
 0x1d2   : > { %v2092_v51 = vld [vmem:[#allocation2 + $0x30] sm:$0xff]  ;;  %2702 = vst.msk [vmem:[#allocation2 + $0x10] sm:$0xff] %vm210_vm2, %v4568_v35 }
 0x1d3   : > { %2061 = vst.msk [vmem:[#allocation2 + $0x38] sm:$0xff] %vm210_vm2, %v2045_v37  ;;  %v2226_v55 = vadd.f32 %v2190_v8, %v2092_v51  ;;  %4311 = vmatmul.msk.f32.gmra.mxu0 %vm262_vm1, %v5369_v31  ;;  %v2653_v43 = vadd.f32 %v5440_v29, %v2637_v40  ;;  %4379 = vmatmul.msk.f32.gmra.mxu2 %vm262_vm1, %v5428_v49  ;;  %v5883_v51 = vld [vmem:[%s6322_s3] ss:$0 sm:$0xff] }
 0x1d4   : > { %4345 = vmatmul.msk.f32.gmra.mxu1 %vm262_vm1, %v4393_v0  ;;  %v2276_v48 = vld [vmem:[#allocation2 + $0x28] sm:$0xff]  ;;  %4413 = vmatmul.msk.f32.gmra.mxu3 %vm262_vm1, %v4395_v45 }
 0x1d5   : > { %2242 = vst.msk [vmem:[#allocation2 + $0x30] sm:$0xff] %vm210_vm2, %v2226_v55  ;;  %v2410_v27 = vadd.f32 %v2372_v58, %v2276_v48  ;;  %v2669_v53 = vmax.f32 %v2653_v43, 0.0 }
 0x1d6   : > { %v2457_v23 = vld [vmem:[#allocation2 + $0x20] sm:$0xff]  ;;  %v2378_v15 = vpop.f32.mrf.mxu2 }
 0x1d7   : > { %2426 = vst.msk [vmem:[#allocation2 + $0x28] sm:$0xff] %vm210_vm2, %v2410_v27  ;;  %v2591_v31 = vadd.f32 %v5765_v42, %v2457_v23  ;;  %v5825_v38 = vpop.f32.mrf.mxu3  ;;  %v1915_v27 = vld [vmem:[#allocation2 + $0x58] sm:$0xff] }
 0x1d8   : > { %v2014_v56 = vpop.f32.mrf.mxu0  ;;  %4272 = vst.msk [vmem:[%s4992_s15 + $0x110] sm:$0xff] %vm210_vm2, %v2669_v53  ;;  %v2622_v62 = vld [vmem:[#allocation2 + $0x18] sm:$0xff] }
 0x1d9   : > { %v2196_v57 = vpop.f32.mrf.mxu1  ;;  %2607 = vst.msk [vmem:[#allocation2 + $0x20] sm:$0xff] %vm210_vm2, %v2591_v31  ;;  %v2046_v50 = vadd.f32 %v2014_v56, %v1912_v6  ;;  %v2638_v63 = vmul.f32 %v5424_v46, %v2622_v62 }
 0x1da   : > { %v2093_v0 = vld [vmem:[#allocation2 + $0x38] sm:$0xff]  ;;  %2703 = vst.msk [vmem:[#allocation2 + $0x18] sm:$0xff] %vm210_vm2, %v4568_v35 }
 0x1db   : > { %2062 = vst.msk [vmem:[#allocation2 + $0x40] sm:$0xff] %vm210_vm2, %v2046_v50  ;;  %v2227_v42 = vadd.f32 %v2193_v22, %v2093_v0  ;;  %4312 = vmatmul.msk.f32.gmra.mxu0 %vm262_vm1, %v5396_v11  ;;  %v2654_v60 = vadd.f32 %v5440_v29, %v2638_v63  ;;  %4380 = vmatmul.msk.f32.gmra.mxu2 %vm262_vm1, %v5460_v5  ;;  %v5870_v22 = vld [vmem:[%s6321_s2] ss:$0 sm:$0xff]  ;;  %v4399_v63 = vld [vmem:[%s4691_s13 + $0xb2] sm:$0xff] }
 0x1dc   : > { %4346 = vmatmul.msk.f32.gmra.mxu1 %vm262_vm1, %v4394_v4  ;;  %v2277_v3 = vld [vmem:[#allocation2 + $0x30] sm:$0xff]  ;;  %4414 = vmatmul.msk.f32.gmra.mxu3 %vm262_vm1, %v4396_v59  ;;  %v4397_v4 = vld [vmem:[%s4691_s13 + $0x9a] sm:$0xff] }
 0x1dd   : > { %2243 = vst.msk [vmem:[#allocation2 + $0x38] sm:$0xff] %vm210_vm2, %v2227_v42  ;;  %v2411_v1 = vadd.f32 %v2375_v21, %v2277_v3  ;;  %v2670_v30 = vmax.f32 %v2654_v60, 0.0 }
 0x1de   : > { %v2458_v25 = vld [vmem:[#allocation2 + $0x28] sm:$0xff]  ;;  %v2381_v24 = vpop.f32.mrf.mxu2 }
 0x1df   : > { %2427 = vst.msk [vmem:[#allocation2 + $0x30] sm:$0xff] %vm210_vm2, %v2411_v1  ;;  %v2592_v11 = vadd.f32 %v5785_v14, %v2458_v25  ;;  %v5845_v12 = vpop.f32.mrf.mxu3  ;;  %v1916_v1 = vld [vmem:[#allocation2 + $0x60] sm:$0xff] }
 0x1e0   : > { %v2017_v58 = vpop.f32.mrf.mxu0  ;;  %4273 = vst.msk [vmem:[%s4992_s15 + $0x118] sm:$0xff] %vm210_vm2, %v2670_v30  ;;  %v2623_v8 = vld [vmem:[#allocation2 + $0x20] sm:$0xff] }
 0x1e1   : > { %v2199_v2 = vpop.f32.mrf.mxu1  ;;  %2608 = vst.msk [vmem:[#allocation2 + $0x28] sm:$0xff] %vm210_vm2, %v2592_v11  ;;  %v2047_v41 = vadd.f32 %v2017_v58, %v1913_v19  ;;  %v2639_v44 = vmul.f32 %v5424_v46, %v2623_v8 }
 0x1e2   : > { %v2094_v20 = vld [vmem:[#allocation2 + $0x40] sm:$0xff]  ;;  %2704 = vst.msk [vmem:[#allocation2 + $0x20] sm:$0xff] %vm210_vm2, %v4568_v35 }
 0x1e3   : > { %2063 = vst.msk [vmem:[#allocation2 + $0x48] sm:$0xff] %vm210_vm2, %v2047_v41  ;;  %v2228_v14 = vadd.f32 %v2196_v57, %v2094_v20  ;;  %4313 = vmatmul.msk.f32.gmra.mxu0 %vm262_vm1, %v5428_v49  ;;  %v2655_v9 = vadd.f32 %v5440_v29, %v2639_v44  ;;  %4381 = vmatmul.msk.f32.gmra.mxu2 %vm262_vm1, %v5487_v28  ;;  %v4400_v41 = vld [vmem:[%s4691_s13 + $0xc2] sm:$0xff] }
 0x1e4   : > { %4347 = vmatmul.msk.f32.gmra.mxu1 %vm262_vm1, %v4395_v45  ;;  %v2278_v16 = vld [vmem:[#allocation2 + $0x38] sm:$0xff]  ;;  %4415 = vmatmul.msk.f32.gmra.mxu3 %vm262_vm1, %v4397_v4 }
 0x1e5   : > { %2244 = vst.msk [vmem:[#allocation2 + $0x40] sm:$0xff] %vm210_vm2, %v2228_v14  ;;  %v2412_v46 = vadd.f32 %v2378_v15, %v2278_v16  ;;  %v2671_v13 = vmax.f32 %v2655_v9, 0.0  ;;  %v1917_v16 = vld [vmem:[#allocation2 + $0x68] sm:$0xff] }
 0x1e6   : > { %v2459_v33 = vld [vmem:[#allocation2 + $0x30] sm:$0xff]  ;;  %v2384_v17 = vpop.f32.mrf.mxu2 }
 0x1e7   : > { %2428 = vst.msk [vmem:[#allocation2 + $0x38] sm:$0xff] %vm210_vm2, %v2412_v46  ;;  %v2593_v49 = vadd.f32 %v5805_v39, %v2459_v33  ;;  %v5865_v32 = vpop.f32.mrf.mxu3  ;;  %v4398_v39 = vld [vmem:[%s4691_s13 + $0xaa] sm:$0xff] }
 0x1e8   : > { %v2020_v18 = vpop.f32.mrf.mxu0  ;;  %4274 = vst.msk [vmem:[%s4992_s15 + $0x120] sm:$0xff] %vm210_vm2, %v2671_v13  ;;  %v2624_v52 = vld [vmem:[#allocation2 + $0x28] sm:$0xff] }
 0x1e9   : > { %v2202_v29 = vpop.f32.mrf.mxu1  ;;  %2609 = vst.msk [vmem:[#allocation2 + $0x30] sm:$0xff] %vm210_vm2, %v2593_v49  ;;  %v2048_v21 = vadd.f32 %v2020_v18, %v1914_v26  ;;  %v2640_v10 = vmul.f32 %v5870_v22, %v2624_v52  ;;  %v4401_v52 = vld [vmem:[%s4691_s13 + $0xca] sm:$0xff] }
 0x1ea   : > { %v2095_v37 = vld [vmem:[#allocation2 + $0x48] sm:$0xff]  ;;  %2705 = vst.msk [vmem:[#allocation2 + $0x28] sm:$0xff] %vm210_vm2, %v4568_v35 }
 0x1eb   : > { %2064 = vst.msk [vmem:[#allocation2 + $0x50] sm:$0xff] %vm210_vm2, %v2048_v21  ;;  %v2229_v40 = vadd.f32 %v2199_v2, %v2095_v37  ;;  %4314 = vmatmul.msk.f32.gmra.mxu0 %vm262_vm1, %v5460_v5  ;;  %v2656_v45 = vadd.f32 %v5883_v51, %v2640_v10  ;;  %4382 = vmatmul.msk.f32.gmra.mxu2 %vm262_vm1, %v5514_v54 }
 0x1ec   : > { %4348 = vmatmul.msk.f32.gmra.mxu1 %vm262_vm1, %v4396_v59  ;;  %v2279_v55 = vld [vmem:[#allocation2 + $0x40] sm:$0xff]  ;;  %4416 = vmatmul.msk.f32.gmra.mxu3 %vm262_vm1, %v4398_v39 }
 0x1ed   : > { %2245 = vst.msk [vmem:[#allocation2 + $0x48] sm:$0xff] %vm210_vm2, %v2229_v40  ;;  %v2413_v43 = vadd.f32 %v2381_v24, %v2279_v55  ;;  %v2672_v5 = vmax.f32 %v2656_v45, 0.0  ;;  %v1918_v45 = vld [vmem:[#allocation2 + $0x70] sm:$0xff] }
 0x1ee   : > { %v2460_v48 = vld [vmem:[#allocation2 + $0x38] sm:$0xff]  ;;  %v2387_v23 = vpop.f32.mrf.mxu2 }
 0x1ef   : > { %2429 = vst.msk [vmem:[#allocation2 + $0x40] sm:$0xff] %vm210_vm2, %v2413_v43  ;;  %v2594_v53 = vadd.f32 %v5825_v38, %v2460_v48  ;;  %v5895_v57 = vpop.f32.mrf.mxu3 }
 0x1f0   : > { %v2023_v6 = vpop.f32.mrf.mxu0  ;;  %4275 = vst.msk [vmem:[%s4992_s15 + $0x128] sm:$0xff] %vm210_vm2, %v2672_v5  ;;  %v2625_v15 = vld [vmem:[#allocation2 + $0x30] sm:$0xff] }
 0x1f1   : > { %v2205_v31 = vpop.f32.mrf.mxu1  ;;  %2610 = vst.msk [vmem:[#allocation2 + $0x38] sm:$0xff] %vm210_vm2, %v2594_v53  ;;  %v2049_v56 = vadd.f32 %v2023_v6, %v1915_v27  ;;  %v2641_v62 = vmul.f32 %v5870_v22, %v2625_v15 }
 0x1f2   : > { %v2096_v50 = vld [vmem:[#allocation2 + $0x50] sm:$0xff]  ;;  %2706 = vst.msk [vmem:[#allocation2 + $0x30] sm:$0xff] %vm210_vm2, %v4568_v35 }
 0x1f3   : > { %2065 = vst.msk [vmem:[#allocation2 + $0x58] sm:$0xff] %vm210_vm2, %v2049_v56  ;;  %v2230_v38 = vadd.f32 %v2202_v29, %v2096_v50  ;;  %4315 = vmatmul.msk.f32.gmra.mxu0 %vm262_vm1, %v5487_v28  ;;  %v2657_v0 = vadd.f32 %v5883_v51, %v2641_v62  ;;  %4383 = vmatmul.msk.f32.gmra.mxu2 %vm262_vm1, %v5541_v7 }
 0x1f4   : > { %4349 = vmatmul.msk.f32.gmra.mxu1 %vm262_vm1, %v4397_v4  ;;  %v2280_v59 = vld [vmem:[#allocation2 + $0x48] sm:$0xff]  ;;  %4417 = vmatmul.msk.f32.gmra.mxu3 %vm262_vm1, %v4399_v63 }
 0x1f5   : > { %2246 = vst.msk [vmem:[#allocation2 + $0x50] sm:$0xff] %vm210_vm2, %v2230_v38  ;;  %v2414_v42 = vadd.f32 %v2384_v17, %v2280_v59  ;;  %v2673_v60 = vmax.f32 %v2657_v0, 0.0  ;;  %v1919_v38 = vld [vmem:[#allocation2 + $0x78] sm:$0xff] }
 0x1f6   : > { %v2461_v3 = vld [vmem:[#allocation2 + $0x40] sm:$0xff]  ;;  %v2390_v30 = vpop.f32.mrf.mxu2 }
 0x1f7   : > { %2430 = vst.msk [vmem:[#allocation2 + $0x48] sm:$0xff] %vm210_vm2, %v2414_v42  ;;  %v2595_v28 = vadd.f32 %v5845_v12, %v2461_v3  ;;  %v5915_v58 = vpop.f32.mrf.mxu3 }
 0x1f8   : > { %v2026_v25 = vpop.f32.mrf.mxu0  ;;  %4276 = vst.msk [vmem:[%s4992_s15 + $0x130] sm:$0xff] %vm210_vm2, %v2673_v60  ;;  %v2626_v11 = vld [vmem:[#allocation2 + $0x38] sm:$0xff] }
 0x1f9   : > { %v2208_v19 = vpop.f32.mrf.mxu1  ;;  %2611 = vst.msk [vmem:[#allocation2 + $0x40] sm:$0xff] %vm210_vm2, %v2595_v28  ;;  %v2050_v24 = vadd.f32 %v2026_v25, %v1916_v1  ;;  %v2642_v2 = vmul.f32 %v5870_v22, %v2626_v11 }
 0x1fa   : > { %v2097_v8 = vld [vmem:[#allocation2 + $0x58] sm:$0xff]  ;;  %2707 = vst.msk [vmem:[#allocation2 + $0x38] sm:$0xff] %vm210_vm2, %v4568_v35 }
 0x1fb   : > { %2066 = vst.msk [vmem:[#allocation2 + $0x60] sm:$0xff] %vm210_vm2, %v2050_v24  ;;  %v2231_v12 = vadd.f32 %v2205_v31, %v2097_v8  ;;  %4316 = vmatmul.msk.f32.gmra.mxu0 %vm262_vm1, %v5514_v54  ;;  %v2658_v44 = vadd.f32 %v5883_v51, %v2642_v2  ;;  %4384 = vmatmul.msk.f32.gmra.mxu2 %vm262_vm1, %v5568_v34  ;;  %v4402_v31 = vld [vmem:[%s4691_s13 + $0xda] sm:$0xff] }
 0x1fc   : > { %4350 = vmatmul.msk.f32.gmra.mxu1 %vm262_vm1, %v4398_v39  ;;  %v2281_v20 = vld [vmem:[#allocation2 + $0x50] sm:$0xff]  ;;  %4418 = vmatmul.msk.f32.gmra.mxu3 %vm262_vm1, %v4400_v41  ;;  %v2732_v8 = vld [vmem:[#allocation2] sm:$0xff] }
 0x1fd   : > { %2247 = vst.msk [vmem:[#allocation2 + $0x58] sm:$0xff] %vm210_vm2, %v2231_v12  ;;  %v2415_v4 = vadd.f32 %v2387_v23, %v2281_v20  ;;  %v2674_v14 = vmax.f32 %v2658_v44, 0.0 }
 0x1fe   : > { %v2462_v9 = vld [vmem:[#allocation2 + $0x48] sm:$0xff]  ;;  %v2393_v46 = vpop.f32.mrf.mxu2 }
 0x1ff   : > { %2431 = vst.msk [vmem:[#allocation2 + $0x50] sm:$0xff] %vm210_vm2, %v2415_v4  ;;  %v2596_v54 = vadd.f32 %v5865_v32, %v2462_v9  ;;  %v5935_v17 = vpop.f32.mrf.mxu3 }
 0x200   : > { %v2029_v13 = vpop.f32.mrf.mxu0  ;;  %4277 = vst.msk [vmem:[%s4992_s15 + $0x138] sm:$0xff] %vm210_vm2, %v2674_v14  ;;  %v2627_v26 = vld [vmem:[#allocation2 + $0x40] sm:$0xff] }
 0x201   : > { %v2211_v33 = vpop.f32.mrf.mxu1  ;;  %2612 = vst.msk [vmem:[#allocation2 + $0x48] sm:$0xff] %vm210_vm2, %v2596_v54  ;;  %v2051_v49 = vadd.f32 %v2029_v13, %v1917_v16  ;;  %v2643_v18 = vmul.f32 %v5870_v22, %v2627_v26 }
 0x202   : > { %v2098_v29 = vld [vmem:[#allocation2 + $0x60] sm:$0xff]  ;;  %2708 = vst.msk [vmem:[#allocation2 + $0x40] sm:$0xff] %vm210_vm2, %v4568_v35 }
 0x203   : > { %2067 = vst.msk [vmem:[#allocation2 + $0x68] sm:$0xff] %vm210_vm2, %v2051_v49  ;;  %v2232_v21 = vadd.f32 %v2208_v19, %v2098_v29  ;;  %4317 = vmatmul.msk.f32.gmra.mxu0 %vm262_vm1, %v5541_v7  ;;  %v2659_v32 = vadd.f32 %v5883_v51, %v2643_v18  ;;  %4385 = vmatmul.msk.f32.gmra.mxu2 %vm262_vm1, %v5595_v61  ;;  %v2733_v49 = vld [vmem:[#allocation2 + $0x8] sm:$0xff] }
 0x204   : > { %4351 = vmatmul.msk.f32.gmra.mxu1 %vm262_vm1, %v4399_v63  ;;  %v2282_v10 = vld [vmem:[#allocation2 + $0x58] sm:$0xff]  ;;  %4419 = vmatmul.msk.f32.gmra.mxu3 %vm262_vm1, %v4401_v52 }
 0x205   : > { %2248 = vst.msk [vmem:[#allocation2 + $0x60] sm:$0xff] %vm210_vm2, %v2232_v21  ;;  %v2416_v37 = vadd.f32 %v2390_v30, %v2282_v10  ;;  %v2675_v39 = vmax.f32 %v2659_v32, 0.0  ;;  %v4403_v30 = vld [vmem:[%s4691_s13 + $0xe2] sm:$0xff] }
 0x206   : > { %v2463_v40 = vld [vmem:[#allocation2 + $0x50] sm:$0xff]  ;;  %v2396_v55 = vpop.f32.mrf.mxu2 }
 0x207   : > { %2432 = vst.msk [vmem:[#allocation2 + $0x58] sm:$0xff] %vm210_vm2, %v2416_v37  ;;  %v2597_v7 = vadd.f32 %v5895_v57, %v2463_v40  ;;  %v5955_v53 = vpop.f32.mrf.mxu3 }
 0x208   : > { %v2032_v43 = vpop.f32.mrf.mxu0  ;;  %4278 = vst.msk [vmem:[%s4992_s15 + $0x140] sm:$0xff] %vm210_vm2, %v2675_v39  ;;  %v2628_v48 = vld [vmem:[#allocation2 + $0x48] sm:$0xff] }
 0x209   : > { %v2214_v5 = vpop.f32.mrf.mxu1  ;;  %2613 = vst.msk [vmem:[#allocation2 + $0x50] sm:$0xff] %vm210_vm2, %v2597_v7  ;;  %v2052_v27 = vadd.f32 %v2032_v43, %v1918_v45  ;;  %v2644_v23 = vmul.f32 %v5870_v22, %v2628_v48  ;;  %v2734_v48 = vld [vmem:[#allocation2 + $0x10] sm:$0xff] }
 0x20a   : > { %v2099_v6 = vld [vmem:[#allocation2 + $0x68] sm:$0xff]  ;;  %2709 = vst.msk [vmem:[#allocation2 + $0x48] sm:$0xff] %vm210_vm2, %v4568_v35 }
 0x20b   : > { %2068 = vst.msk [vmem:[#allocation2 + $0x70] sm:$0xff] %vm210_vm2, %v2052_v27  ;;  %v2233_v15 = vadd.f32 %v2211_v33, %v2099_v6  ;;  %4318 = vmatmul.msk.f32.gmra.mxu0 %vm262_vm1, %v5568_v34  ;;  %v2660_v56 = vadd.f32 %v5883_v51, %v2644_v23  ;;  %4386 = vmatmul.msk.f32.gmra.mxu2 %vm262_vm1, %v5620_v47 }
 0x20c   : > { %4352 = vmatmul.msk.f32.gmra.mxu1 %vm262_vm1, %v4400_v41  ;;  %v2283_v57 = vld [vmem:[#allocation2 + $0x60] sm:$0xff]  ;;  %4420 = vmatmul.msk.f32.gmra.mxu3 %vm262_vm1, %v4402_v31 }
 0x20d   : > { %2249 = vst.msk [vmem:[#allocation2 + $0x68] sm:$0xff] %vm210_vm2, %v2233_v15  ;;  %v2417_v62 = vadd.f32 %v2393_v46, %v2283_v57  ;;  %v2676_v50 = vmax.f32 %v2660_v56, 0.0 }
 0x20e   : > { %v2464_v63 = vld [vmem:[#allocation2 + $0x58] sm:$0xff]  ;;  %v2399_v0 = vpop.f32.mrf.mxu2 }
 0x20f   : > { %2433 = vst.msk [vmem:[#allocation2 + $0x60] sm:$0xff] %vm210_vm2, %v2417_v62  ;;  %v2598_v34 = vadd.f32 %v5915_v58, %v2464_v63  ;;  %v5975_v3 = vpop.f32.mrf.mxu3 }
 0x210   : > { %v2035_v59 = vpop.f32.mrf.mxu0  ;;  %4279 = vst.msk [vmem:[%s4992_s15 + $0x148] sm:$0xff] %vm210_vm2, %v2676_v50  ;;  %v2629_v60 = vld [vmem:[#allocation2 + $0x50] sm:$0xff] }
 0x211   : > { %v2217_v42 = vpop.f32.mrf.mxu1  ;;  %2614 = vst.msk [vmem:[#allocation2 + $0x58] sm:$0xff] %vm210_vm2, %v2598_v34  ;;  %v2053_v47 = vadd.f32 %v2035_v59, %v1919_v38  ;;  %v2645_v1 = vmul.f32 %v5870_v22, %v2629_v60 }
 0x212   : > { %v2100_v28 = vld [vmem:[#allocation2 + $0x70] sm:$0xff]  ;;  %2710 = vst.msk [vmem:[#allocation2 + $0x50] sm:$0xff] %vm210_vm2, %v4568_v35 }
 0x213   : > { %2069 = vst.msk [vmem:[#allocation2 + $0x78] sm:$0xff] %vm210_vm2, %v2053_v47  ;;  %v2234_v25 = vadd.f32 %v2214_v5, %v2100_v28  ;;  %4319 = vmatmul.msk.f32.gmra.mxu0 %vm262_vm1, %v5595_v61  ;;  %v2661_v19 = vadd.f32 %v5883_v51, %v2645_v1  ;;  %4387 = vmatmul.msk.f32.gmra.mxu2 %vm262_vm1, %v5644_v36 }
 0x214   : > { %4353 = vmatmul.msk.f32.gmra.mxu1 %vm262_vm1, %v4401_v52  ;;  %v2284_v11 = vld [vmem:[#allocation2 + $0x68] sm:$0xff]  ;;  %4421 = vmatmul.msk.f32.gmra.mxu3 %vm262_vm1, %v4403_v30 }
 0x215   : > { %2250 = vst.msk [vmem:[#allocation2 + $0x70] sm:$0xff] %vm210_vm2, %v2234_v25  ;;  %v2418_v24 = vadd.f32 %v2396_v55, %v2284_v11  ;;  %v2677_v58 = vmax.f32 %v2661_v19, 0.0 }
 0x216   : > { %v2465_v2 = vld [vmem:[#allocation2 + $0x60] sm:$0xff]  ;;  %v2402_v41 = vpop.f32.mrf.mxu2 }
 0x217   : > { %2434 = vst.msk [vmem:[#allocation2 + $0x68] sm:$0xff] %vm210_vm2, %v2418_v24  ;;  %v2599_v61 = vadd.f32 %v5935_v17, %v2465_v2  ;;  %v2584_v4 = vpop.f32.mrf.mxu3 }
 0x218   : > { %v2818_v12 = vpop.f32.mrf.mxu0  ;;  %4280 = vst.msk [vmem:[%s4992_s15 + $0x150] sm:$0xff] %vm210_vm2, %v2677_v58  ;;  %v2630_v20 = vld [vmem:[#allocation2 + $0x58] sm:$0xff] }
 0x219   : > { %v3000_v44 = vpop.f32.mrf.mxu1  ;;  %2615 = vst.msk [vmem:[#allocation2 + $0x60] sm:$0xff] %vm210_vm2, %v2599_v61  ;;  %v2866_v36 = vadd.f32 %v2818_v12, %v2732_v8  ;;  %v2646_v14 = vmul.f32 %v5870_v22, %v2630_v20  ;;  %v2736_v12 = vld [vmem:[#allocation2 + $0x20] sm:$0xff] }
 0x21a   : > { %v2101_v9 = vld [vmem:[#allocation2 + $0x78] sm:$0xff]  ;;  %2711 = vst.msk [vmem:[#allocation2 + $0x58] sm:$0xff] %vm210_vm2, %v4568_v35 }
 0x21b   : > { %2882 = vst.msk [vmem:[#allocation2] sm:$0xff] %vm210_vm2, %v2866_v36  ;;  %v2235_v16 = vadd.f32 %v2217_v42, %v2101_v9  ;;  %v2662_v54 = vadd.f32 %v5883_v51, %v2646_v14  ;;  %v2735_v42 = vld [vmem:[#allocation2 + $0x18] sm:$0xff] }
 0x21c   : > { %v2285_v46 = vld [vmem:[#allocation2 + $0x70] sm:$0xff] }
 0x21d   : > { %2251 = vst.msk [vmem:[#allocation2 + $0x78] sm:$0xff] %vm210_vm2, %v2235_v16  ;;  %v2419_v13 = vadd.f32 %v2399_v0, %v2285_v46  ;;  %v2678_v33 = vmax.f32 %v2662_v54, 0.0 }
 0x21e   : > { %v2466_v26 = vld [vmem:[#allocation2 + $0x68] sm:$0xff]  ;;  %v3182_v18 = vpop.f32.mrf.mxu2 }
 0x21f   : > { %2435 = vst.msk [vmem:[#allocation2 + $0x70] sm:$0xff] %vm210_vm2, %v2419_v13  ;;  %v2600_v17 = vadd.f32 %v5955_v53, %v2466_v26  ;;  %v3364_v10 = vpop.f32.mrf.mxu3 }
 0x220   : > { %v2821_v29 = vpop.f32.mrf.mxu0  ;;  %4281 = vst.msk [vmem:[%s4992_s15 + $0x158] sm:$0xff] %vm210_vm2, %v2678_v33  ;;  %v2631_v21 = vld [vmem:[#allocation2 + $0x60] sm:$0xff] }
 0x221   : > { %v3003_v52 = vpop.f32.mrf.mxu1  ;;  %2616 = vst.msk [vmem:[#allocation2 + $0x68] sm:$0xff] %vm210_vm2, %v2600_v17  ;;  %v2867_v32 = vadd.f32 %v2821_v29, %v2733_v49  ;;  %v2647_v37 = vmul.f32 %v5870_v22, %v2631_v21  ;;  %v2737_v29 = vld [vmem:[#allocation2 + $0x28] sm:$0xff] }
 0x222   : > { %v2914_v39 = vld [vmem:[#allocation2] sm:$0xff]  ;;  %2712 = vst.msk [vmem:[#allocation2 + $0x60] sm:$0xff] %vm210_vm2, %v4568_v35 }
 0x223   : > { %2883 = vst.msk [vmem:[#allocation2 + $0x8] sm:$0xff] %vm210_vm2, %v2867_v32  ;;  %v3048_v40 = vadd.f32 %v3000_v44, %v2914_v39  ;;  %v2663_v45 = vadd.f32 %v5883_v51, %v2647_v37 }
 0x224   : > { %v2286_v7 = vld [vmem:[#allocation2 + $0x78] sm:$0xff] }
 0x225   : > { %3064 = vst.msk [vmem:[#allocation2] sm:$0xff] %vm210_vm2, %v3048_v40  ;;  %v2420_v55 = vadd.f32 %v2402_v41, %v2286_v7  ;;  %v2679_v43 = vmax.f32 %v2663_v45, 0.0 }
 0x226   : > { %v2467_v5 = vld [vmem:[#allocation2 + $0x70] sm:$0xff]  ;;  %v3185_v53 = vpop.f32.mrf.mxu2 }
 0x227   : > { %2436 = vst.msk [vmem:[#allocation2 + $0x78] sm:$0xff] %vm210_vm2, %v2420_v55  ;;  %v2601_v27 = vadd.f32 %v5975_v3, %v2467_v5  ;;  %v3367_v56 = vpop.f32.mrf.mxu3 }
 0x228   : > { %v2824_v23 = vpop.f32.mrf.mxu0  ;;  %4282 = vst.msk [vmem:[%s4992_s15 + $0x160] sm:$0xff] %vm210_vm2, %v2679_v43  ;;  %v2632_v31 = vld [vmem:[#allocation2 + $0x68] sm:$0xff] }
 0x229   : > { %v3006_v6 = vpop.f32.mrf.mxu1  ;;  %2617 = vst.msk [vmem:[#allocation2 + $0x70] sm:$0xff] %vm210_vm2, %v2601_v27  ;;  %v2868_v15 = vadd.f32 %v2824_v23, %v2734_v48  ;;  %v2648_v57 = vmul.f32 %v5870_v22, %v2632_v31 }
 0x22a   : > { %v2915_v62 = vld [vmem:[#allocation2 + $0x8] sm:$0xff]  ;;  %2713 = vst.msk [vmem:[#allocation2 + $0x68] sm:$0xff] %vm210_vm2, %v4568_v35 }
 0x22b   : > { %2884 = vst.msk [vmem:[#allocation2 + $0x10] sm:$0xff] %vm210_vm2, %v2868_v15  ;;  %v3049_v50 = vadd.f32 %v3003_v52, %v2915_v62  ;;  %v2664_v63 = vadd.f32 %v5883_v51, %v2648_v57 }
 0x22c   : > { %v3096_v38 = vld [vmem:[#allocation2] sm:$0xff] }
 0x22d   : > { %3065 = vst.msk [vmem:[#allocation2 + $0x8] sm:$0xff] %vm210_vm2, %v3049_v50  ;;  %v3230_v34 = vadd.f32 %v3182_v18, %v3096_v38  ;;  %v2680_v0 = vmax.f32 %v2664_v63, 0.0 }
 0x22e   : > { %v2468_v59 = vld [vmem:[#allocation2 + $0x78] sm:$0xff]  ;;  %v3188_v47 = vpop.f32.mrf.mxu2 }
 0x22f   : > { %3246 = vst.msk [vmem:[#allocation2] sm:$0xff] %vm210_vm2, %v3230_v34  ;;  %v2602_v60 = vadd.f32 %v2584_v4, %v2468_v59  ;;  %v3370_v25 = vpop.f32.mrf.mxu3 }
 0x230   : > { %v2827_v3 = vpop.f32.mrf.mxu0  ;;  %4283 = vst.msk [vmem:[%s4992_s15 + $0x168] sm:$0xff] %vm210_vm2, %v2680_v0  ;;  %v2633_v28 = vld [vmem:[#allocation2 + $0x70] sm:$0xff] }
 0x231   : > { %v3009_v1 = vpop.f32.mrf.mxu1  ;;  %2618 = vst.msk [vmem:[#allocation2 + $0x78] sm:$0xff] %vm210_vm2, %v2602_v60  ;;  %v2869_v30 = vadd.f32 %v2827_v3, %v2735_v42  ;;  %v2649_v19 = vmul.f32 %v5870_v22, %v2633_v28  ;;  %v2739_v60 = vld [vmem:[#allocation2 + $0x38] sm:$0xff] }
 0x232   : > { %v2916_v11 = vld [vmem:[#allocation2 + $0x10] sm:$0xff]  ;;  %2714 = vst.msk [vmem:[#allocation2 + $0x70] sm:$0xff] %vm210_vm2, %v4568_v35 }
 0x233   : > { %2885 = vst.msk [vmem:[#allocation2 + $0x18] sm:$0xff] %vm210_vm2, %v2869_v30  ;;  %v3050_v24 = vadd.f32 %v3006_v6, %v2916_v11  ;;  %v2665_v58 = vadd.f32 %v5883_v51, %v2649_v19 }
 0x234   : > { %v3097_v2 = vld [vmem:[#allocation2 + $0x8] sm:$0xff] }
 0x235   : > { %3066 = vst.msk [vmem:[#allocation2 + $0x10] sm:$0xff] %vm210_vm2, %v3050_v24  ;;  %v3231_v8 = vadd.f32 %v3185_v53, %v3097_v2  ;;  %v2681_v61 = vmax.f32 %v2665_v58, 0.0  ;;  %v2738_v53 = vld [vmem:[#allocation2 + $0x30] sm:$0xff] }
 0x236   : > { %v3278_v41 = vld [vmem:[#allocation2] sm:$0xff]  ;;  %v3191_v20 = vpop.f32.mrf.mxu2 }
 0x237   : > { %3247 = vst.msk [vmem:[#allocation2 + $0x8] sm:$0xff] %vm210_vm2, %v3231_v8  ;;  %v3412_v44 = vadd.f32 %v3364_v10, %v3278_v41  ;;  %v3373_v16 = vpop.f32.mrf.mxu3 }
 0x238   : > { %v2830_v36 = vpop.f32.mrf.mxu0  ;;  %4284 = vst.msk [vmem:[%s4992_s15 + $0x170] sm:$0xff] %vm210_vm2, %v2681_v61  ;;  %v2634_v14 = vld [vmem:[#allocation2 + $0x78] sm:$0xff] }
 0x239   : > { %v3012_v4 = vpop.f32.mrf.mxu1  ;;  %3428 = vst.msk [vmem:[#allocation2] sm:$0xff] %vm210_vm2, %v3412_v44  ;;  %v2870_v9 = vadd.f32 %v2830_v36, %v2736_v12  ;;  %v2650_v54 = vmul.f32 %v5870_v22, %v2634_v14  ;;  %v2740_v44 = vld [vmem:[#allocation2 + $0x40] sm:$0xff] }
 0x23a   : > { %v2917_v46 = vld [vmem:[#allocation2 + $0x18] sm:$0xff]  ;;  %2715 = vst.msk [vmem:[#allocation2 + $0x78] sm:$0xff] %vm210_vm2, %v4568_v35 }
 0x23b   : > { %2886 = vst.msk [vmem:[#allocation2 + $0x20] sm:$0xff] %vm210_vm2, %v2870_v9  ;;  %v3051_v13 = vadd.f32 %v3009_v1, %v2917_v46  ;;  %v2666_v33 = vadd.f32 %v5883_v51, %v2650_v54 }
 0x23c   : > { %v3098_v26 = vld [vmem:[#allocation2 + $0x10] sm:$0xff] }
 0x23d   : > { %3067 = vst.msk [vmem:[#allocation2 + $0x18] sm:$0xff] %vm210_vm2, %v3051_v13  ;;  %v3232_v49 = vadd.f32 %v3188_v47, %v3098_v26  ;;  %v2682_v17 = vmax.f32 %v2666_v33, 0.0 }
 0x23e   : > { %v3279_v18 = vld [vmem:[#allocation2 + $0x8] sm:$0xff]  ;;  %v3194_v21 = vpop.f32.mrf.mxu2 }
 0x23f   : > { %3248 = vst.msk [vmem:[#allocation2 + $0x10] sm:$0xff] %vm210_vm2, %v3232_v49  ;;  %v3413_v52 = vadd.f32 %v3367_v56, %v3279_v18  ;;  %v3376_v40 = vpop.f32.mrf.mxu3 }
 0x240   : > { %v3444_v32 = vld [vmem:[#allocation2] sm:$0xff]  ;;  %v2833_v10 = vpop.f32.mrf.mxu0  ;;  %4285 = vst.msk [vmem:[%s4992_s15 + $0x178] sm:$0xff] %vm210_vm2, %v2682_v17 }
 0x241   : > { %v3015_v35 = vpop.f32.mrf.mxu1  ;;  %v3460_v37 = vmul.f32 %v5870_v22, %v3444_v32  ;;  %3429 = vst.msk [vmem:[#allocation2 + $0x8] sm:$0xff] %vm210_vm2, %v3413_v52  ;;  %v2871_v39 = vadd.f32 %v2833_v10, %v2737_v29  ;;  %v2741_v52 = vld [vmem:[#allocation2 + $0x48] sm:$0xff] }
 0x242   : > { %v2918_v45 = vld [vmem:[#allocation2 + $0x20] sm:$0xff] }
 0x243   : > { %v3476_v7 = vadd.f32 %v5883_v51, %v3460_v37  ;;  %2887 = vst.msk [vmem:[#allocation2 + $0x28] sm:$0xff] %vm210_vm2, %v2871_v39  ;;  %v3052_v55 = vadd.f32 %v3012_v4, %v2918_v45 }
 0x244   : > { %v3099_v43 = vld [vmem:[#allocation2 + $0x18] sm:$0xff] }
 0x245   : > { %v3492_v5 = vmax.f32 %v3476_v7, 0.0  ;;  %3068 = vst.msk [vmem:[#allocation2 + $0x20] sm:$0xff] %vm210_vm2, %v3052_v55  ;;  %v3233_v48 = vadd.f32 %v3191_v20, %v3099_v43 }
 0x246   : > { %v3280_v27 = vld [vmem:[#allocation2 + $0x10] sm:$0xff]  ;;  %v3197_v6 = vpop.f32.mrf.mxu2 }
 0x247   : > { %4422 = vst.msk [vmem:[%s4992_s15 + $0x180] sm:$0xff] %vm210_vm2, %v3492_v5  ;;  %v3414_v23 = vadd.f32 %v3370_v25, %v3280_v27  ;;  %v3379_v50 = vpop.f32.mrf.mxu3 }
 0x248   : > { %v3445_v31 = vld [vmem:[#allocation2 + $0x8] sm:$0xff]  ;;  %3249 = vst.msk [vmem:[#allocation2 + $0x18] sm:$0xff] %vm210_vm2, %v3233_v48  ;;  %v2836_v15 = vpop.f32.mrf.mxu0 }
 0x249   : > { %v3018_v56 = vpop.f32.mrf.mxu1  ;;  %v3461_v57 = vmul.f32 %v5870_v22, %v3445_v31  ;;  %3430 = vst.msk [vmem:[#allocation2 + $0x10] sm:$0xff] %vm210_vm2, %v3414_v23  ;;  %v2872_v62 = vadd.f32 %v2836_v15, %v2738_v53  ;;  %v2742_v23 = vld [vmem:[#allocation2 + $0x50] sm:$0xff] }
 0x24a   : > { %v2919_v63 = vld [vmem:[#allocation2 + $0x28] sm:$0xff] }
 0x24b   : > { %v3477_v38 = vadd.f32 %v5883_v51, %v3461_v57  ;;  %2888 = vst.msk [vmem:[#allocation2 + $0x30] sm:$0xff] %vm210_vm2, %v2872_v62  ;;  %v3053_v34 = vadd.f32 %v3015_v35, %v2919_v63 }
 0x24c   : > { %v3100_v0 = vld [vmem:[#allocation2 + $0x20] sm:$0xff] }
 0x24d   : > { %v3493_v59 = vmax.f32 %v3477_v38, 0.0  ;;  %3069 = vst.msk [vmem:[#allocation2 + $0x28] sm:$0xff] %vm210_vm2, %v3053_v34  ;;  %v3234_v42 = vadd.f32 %v3194_v21, %v3100_v0 }
 0x24e   : > { %v3200_v3 = vpop.f32.mrf.mxu2 }
 0x24f   : > { %4423 = vst.msk [vmem:[%s4992_s15 + $0x188] sm:$0xff] %vm210_vm2, %v3493_v59  ;;  %v3281_v47 = vld [vmem:[#allocation2 + $0x18] sm:$0xff]  ;;  %v3382_v8 = vpop.f32.mrf.mxu3 }
 0x250   : > { %v3446_v1 = vld [vmem:[#allocation2 + $0x10] sm:$0xff]  ;;  %3250 = vst.msk [vmem:[#allocation2 + $0x20] sm:$0xff] %vm210_vm2, %v3234_v42  ;;  %v3415_v28 = vadd.f32 %v3373_v16, %v3281_v47  ;;  %v2839_v30 = vpop.f32.mrf.mxu0 }
 0x251   : > { %v3021_v25 = vpop.f32.mrf.mxu1  ;;  %v3462_v19 = vmul.f32 %v5870_v22, %v3446_v1  ;;  %v2873_v11 = vadd.f32 %v2839_v30, %v2739_v60 }
 0x252   : > { %3431 = vst.msk [vmem:[#allocation2 + $0x18] sm:$0xff] %vm210_vm2, %v3415_v28  ;;  %v2920_v24 = vld [vmem:[#allocation2 + $0x30] sm:$0xff] }
 0x253   : > { %v3478_v58 = vadd.f32 %v5883_v51, %v3462_v19  ;;  %2889 = vst.msk [vmem:[#allocation2 + $0x38] sm:$0xff] %vm210_vm2, %v2873_v11  ;;  %v3054_v2 = vadd.f32 %v3018_v56, %v2920_v24 }
 0x254   : > { %v3101_v61 = vld [vmem:[#allocation2 + $0x28] sm:$0xff] }
 0x255   : > { %v3494_v41 = vmax.f32 %v3478_v58, 0.0  ;;  %3070 = vst.msk [vmem:[#allocation2 + $0x30] sm:$0xff] %vm210_vm2, %v3054_v2  ;;  %v3235_v12 = vadd.f32 %v3197_v6, %v3101_v61 }
 0x256   : > { %v3203_v36 = vpop.f32.mrf.mxu2 }
 0x257   : > { %4424 = vst.msk [vmem:[%s4992_s15 + $0x190] sm:$0xff] %vm210_vm2, %v3494_v41  ;;  %v3282_v20 = vld [vmem:[#allocation2 + $0x20] sm:$0xff]  ;;  %v3385_v18 = vpop.f32.mrf.mxu3 }
 0x258   : > { %3251 = vst.msk [vmem:[#allocation2 + $0x28] sm:$0xff] %vm210_vm2, %v3235_v12  ;;  %v3416_v4 = vadd.f32 %v3376_v40, %v3282_v20  ;;  %v2842_v14 = vpop.f32.mrf.mxu0 }
 0x259   : > { %v3024_v9 = vpop.f32.mrf.mxu1  ;;  %v3447_v16 = vld [vmem:[#allocation2 + $0x18] sm:$0xff]  ;;  %v2874_v54 = vadd.f32 %v2842_v14, %v2740_v44 }
 0x25a   : > { %v3463_v46 = vmul.f32 %v5870_v22, %v3447_v16  ;;  %3432 = vst.msk [vmem:[#allocation2 + $0x20] sm:$0xff] %vm210_vm2, %v3416_v4  ;;  %v2921_v13 = vld [vmem:[#allocation2 + $0x38] sm:$0xff] }
 0x25b   : > { %2890 = vst.msk [vmem:[#allocation2 + $0x40] sm:$0xff] %vm210_vm2, %v2874_v54  ;;  %v3055_v33 = vadd.f32 %v3021_v25, %v2921_v13 }
 0x25c   : > { %v3479_v26 = vadd.f32 %v5883_v51, %v3463_v46  ;;  %v3102_v49 = vld [vmem:[#allocation2 + $0x30] sm:$0xff] }
 0x25d   : > { %3071 = vst.msk [vmem:[#allocation2 + $0x38] sm:$0xff] %vm210_vm2, %v3055_v33  ;;  %v3236_v17 = vadd.f32 %v3200_v3, %v3102_v49  ;;  %v2743_v3 = vld [vmem:[#allocation2 + $0x58] sm:$0xff] }
 0x25e   : > { %v3495_v29 = vmax.f32 %v3479_v26, 0.0  ;;  %v3206_v32 = vpop.f32.mrf.mxu2 }
 0x25f   : > { %3252 = vst.msk [vmem:[#allocation2 + $0x30] sm:$0xff] %vm210_vm2, %v3236_v17  ;;  %v3283_v21 = vld [vmem:[#allocation2 + $0x28] sm:$0xff]  ;;  %v3388_v15 = vpop.f32.mrf.mxu3 }
 0x260   : > { %4425 = vst.msk [vmem:[%s4992_s15 + $0x198] sm:$0xff] %vm210_vm2, %v3495_v29  ;;  %v3417_v10 = vadd.f32 %v3379_v50, %v3283_v21  ;;  %v2845_v35 = vpop.f32.mrf.mxu0  ;;  %v2745_v21 = vld [vmem:[#allocation2 + $0x68] sm:$0xff] }
 0x261   : > { %v3027_v37 = vpop.f32.mrf.mxu1  ;;  %v3448_v39 = vld [vmem:[#allocation2 + $0x20] sm:$0xff]  ;;  %v2875_v40 = vadd.f32 %v2845_v35, %v2741_v52 }
 0x262   : > { %v3464_v45 = vmul.f32 %v5870_v22, %v3448_v39  ;;  %3433 = vst.msk [vmem:[#allocation2 + $0x28] sm:$0xff] %vm210_vm2, %v3417_v10  ;;  %v2922_v7 = vld [vmem:[#allocation2 + $0x40] sm:$0xff] }
 0x263   : > { %2891 = vst.msk [vmem:[#allocation2 + $0x48] sm:$0xff] %vm210_vm2, %v2875_v40  ;;  %v3056_v55 = vadd.f32 %v3024_v9, %v2922_v7 }
 0x264   : > { %v3480_v43 = vadd.f32 %v5883_v51, %v3464_v45  ;;  %v3103_v5 = vld [vmem:[#allocation2 + $0x38] sm:$0xff] }
 0x265   : > { %3072 = vst.msk [vmem:[#allocation2 + $0x40] sm:$0xff] %vm210_vm2, %v3056_v55  ;;  %v3237_v48 = vadd.f32 %v3203_v36, %v3103_v5  ;;  %v2744_v36 = vld [vmem:[#allocation2 + $0x60] sm:$0xff] }
 0x266   : > { %v3496_v27 = vmax.f32 %v3480_v43, 0.0  ;;  %v3284_v53 = vld [vmem:[#allocation2 + $0x30] sm:$0xff]  ;;  %v3209_v31 = vpop.f32.mrf.mxu2 }
 0x267   : > { %3253 = vst.msk [vmem:[#allocation2 + $0x38] sm:$0xff] %vm210_vm2, %v3237_v48  ;;  %v3418_v6 = vadd.f32 %v3382_v8, %v3284_v53  ;;  %v3391_v58 = vpop.f32.mrf.mxu3 }
 0x268   : > { %4426 = vst.msk [vmem:[%s4992_s15 + $0x1a0] sm:$0xff] %vm210_vm2, %v3496_v27  ;;  %v2848_v56 = vpop.f32.mrf.mxu0 }
 0x269   : > { %v3030_v57 = vpop.f32.mrf.mxu1  ;;  %v3449_v62 = vld [vmem:[#allocation2 + $0x28] sm:$0xff]  ;;  %3434 = vst.msk [vmem:[#allocation2 + $0x30] sm:$0xff] %vm210_vm2, %v3418_v6  ;;  %v2876_v50 = vadd.f32 %v2848_v56, %v2742_v23  ;;  %v2746_v6 = vld [vmem:[#allocation2 + $0x70] sm:$0xff] }
 0x26a   : > { %v3465_v63 = vmul.f32 %v5870_v22, %v3449_v62  ;;  %v2923_v38 = vld [vmem:[#allocation2 + $0x48] sm:$0xff] }
 0x26b   : > { %2892 = vst.msk [vmem:[#allocation2 + $0x50] sm:$0xff] %vm210_vm2, %v2876_v50  ;;  %v3057_v34 = vadd.f32 %v3027_v37, %v2923_v38 }
 0x26c   : > { %v3481_v0 = vadd.f32 %v5883_v51, %v3465_v63  ;;  %v3104_v59 = vld [vmem:[#allocation2 + $0x40] sm:$0xff] }
 0x26d   : > { %3073 = vst.msk [vmem:[#allocation2 + $0x48] sm:$0xff] %vm210_vm2, %v3057_v34  ;;  %v3238_v42 = vadd.f32 %v3206_v32, %v3104_v59 }
 0x26e   : > { %v3497_v60 = vmax.f32 %v3481_v0, 0.0  ;;  %v3285_v47 = vld [vmem:[#allocation2 + $0x38] sm:$0xff]  ;;  %v3212_v28 = vpop.f32.mrf.mxu2 }
 0x26f   : > { %3254 = vst.msk [vmem:[#allocation2 + $0x40] sm:$0xff] %vm210_vm2, %v3238_v42  ;;  %v3419_v1 = vadd.f32 %v3385_v18, %v3285_v47  ;;  %v3394_v17 = vpop.f32.mrf.mxu3 }
 0x270   : > { %4427 = vst.msk [vmem:[%s4992_s15 + $0x1a8] sm:$0xff] %vm210_vm2, %v3497_v60  ;;  %v3450_v30 = vld [vmem:[#allocation2 + $0x30] sm:$0xff]  ;;  %v2851_v25 = vpop.f32.mrf.mxu0  ;;  %v2747_v60 = vld [vmem:[#allocation2 + $0x78] sm:$0xff] }
 0x271   : > { %v3033_v19 = vpop.f32.mrf.mxu1  ;;  %v3466_v11 = vmul.f32 %v5870_v22, %v3450_v30  ;;  %3435 = vst.msk [vmem:[#allocation2 + $0x38] sm:$0xff] %vm210_vm2, %v3419_v1  ;;  %v2877_v24 = vadd.f32 %v2851_v25, %v2743_v3 }
 0x272   : > { %v2924_v2 = vld [vmem:[#allocation2 + $0x50] sm:$0xff] }
 0x273   : > { %v3482_v8 = vadd.f32 %v5883_v51, %v3466_v11  ;;  %2893 = vst.msk [vmem:[#allocation2 + $0x58] sm:$0xff] %vm210_vm2, %v2877_v24  ;;  %v3058_v61 = vadd.f32 %v3030_v57, %v2924_v2 }
 0x274   : > { %v3105_v41 = vld [vmem:[#allocation2 + $0x48] sm:$0xff] }
 0x275   : > { %v3498_v12 = vmax.f32 %v3482_v8, 0.0  ;;  %3074 = vst.msk [vmem:[#allocation2 + $0x50] sm:$0xff] %vm210_vm2, %v3058_v61  ;;  %v3239_v44 = vadd.f32 %v3209_v31, %v3105_v41 }
 0x276   : > { %v3286_v20 = vld [vmem:[#allocation2 + $0x40] sm:$0xff]  ;;  %v3215_v33 = vpop.f32.mrf.mxu2 }
 0x277   : > { %4428 = vst.msk [vmem:[%s4992_s15 + $0x1b0] sm:$0xff] %vm210_vm2, %v3498_v12  ;;  %v3420_v4 = vadd.f32 %v3388_v15, %v3286_v20  ;;  %v3397_v23 = vpop.f32.mrf.mxu3 }
 0x278   : > { %v3451_v14 = vld [vmem:[#allocation2 + $0x38] sm:$0xff]  ;;  %3255 = vst.msk [vmem:[#allocation2 + $0x48] sm:$0xff] %vm210_vm2, %v3239_v44  ;;  %v2854_v9 = vpop.f32.mrf.mxu0 }
 0x279   : > { %v3467_v16 = vmul.f32 %v5870_v22, %v3451_v14  ;;  %3436 = vst.msk [vmem:[#allocation2 + $0x40] sm:$0xff] %vm210_vm2, %v3420_v4  ;;  %v2878_v54 = vadd.f32 %v2854_v9, %v2744_v36  ;;  %v3036_v13 = vpop.f32.mrf.mxu1 }
 0x27a   : > { %v2925_v46 = vld [vmem:[#allocation2 + $0x58] sm:$0xff] }
 0x27b   : > { %v3483_v26 = vadd.f32 %v5883_v51, %v3467_v16  ;;  %2894 = vst.msk [vmem:[#allocation2 + $0x60] sm:$0xff] %vm210_vm2, %v2878_v54  ;;  %v3059_v49 = vadd.f32 %v3033_v19, %v2925_v46 }
 0x27c   : > { %v3106_v18 = vld [vmem:[#allocation2 + $0x50] sm:$0xff] }
 0x27d   : > { %v3499_v29 = vmax.f32 %v3483_v26, 0.0  ;;  %3075 = vst.msk [vmem:[#allocation2 + $0x58] sm:$0xff] %vm210_vm2, %v3059_v49  ;;  %v3240_v52 = vadd.f32 %v3212_v28, %v3106_v18 }
 0x27e   : > { %v3218_v48 = vpop.f32.mrf.mxu2 }
 0x27f   : > { %4429 = vst.msk [vmem:[%s4992_s15 + $0x1b8] sm:$0xff] %vm210_vm2, %v3499_v29  ;;  %v3287_v32 = vld [vmem:[#allocation2 + $0x48] sm:$0xff]  ;;  %v3400_v28 = vpop.f32.mrf.mxu3 }
 0x280   : > { %v3452_v10 = vld [vmem:[#allocation2 + $0x40] sm:$0xff]  ;;  %3256 = vst.msk [vmem:[#allocation2 + $0x50] sm:$0xff] %vm210_vm2, %v3240_v52  ;;  %v3421_v35 = vadd.f32 %v3391_v58, %v3287_v32  ;;  %v2857_v37 = vpop.f32.mrf.mxu0 }
 0x281   : > { %v3468_v39 = vmul.f32 %v5870_v22, %v3452_v10  ;;  %v2879_v40 = vadd.f32 %v2857_v37, %v2745_v21  ;;  %v3039_v5 = vpop.f32.mrf.mxu1 }
 0x282   : > { %3437 = vst.msk [vmem:[#allocation2 + $0x48] sm:$0xff] %vm210_vm2, %v3421_v35  ;;  %v2926_v45 = vld [vmem:[#allocation2 + $0x60] sm:$0xff] }
 0x283   : > { %v3484_v7 = vadd.f32 %v5883_v51, %v3468_v39  ;;  %2895 = vst.msk [vmem:[#allocation2 + $0x68] sm:$0xff] %vm210_vm2, %v2879_v40  ;;  %v3060_v55 = vadd.f32 %v3036_v13, %v2926_v45 }
 0x284   : > { %v3107_v43 = vld [vmem:[#allocation2 + $0x58] sm:$0xff] }
 0x285   : > { %v3500_v27 = vmax.f32 %v3484_v7, 0.0  ;;  %3076 = vst.msk [vmem:[#allocation2 + $0x60] sm:$0xff] %vm210_vm2, %v3060_v55  ;;  %v3241_v53 = vadd.f32 %v3215_v33, %v3107_v43 }
 0x286   : > { %v3221_v3 = vpop.f32.mrf.mxu2 }
 0x287   : > { %4430 = vst.msk [vmem:[%s4992_s15 + $0x1c0] sm:$0xff] %vm210_vm2, %v3500_v27  ;;  %v3288_v31 = vld [vmem:[#allocation2 + $0x50] sm:$0xff]  ;;  %v3403_v9 = vpop.f32.mrf.mxu3 }
 0x288   : > { %3257 = vst.msk [vmem:[#allocation2 + $0x58] sm:$0xff] %vm210_vm2, %v3241_v53  ;;  %v3422_v15 = vadd.f32 %v3394_v17, %v3288_v31  ;;  %v2860_v56 = vpop.f32.mrf.mxu0 }
 0x289   : > { %v3453_v57 = vld [vmem:[#allocation2 + $0x48] sm:$0xff]  ;;  %v2880_v62 = vadd.f32 %v2860_v56, %v2746_v6  ;;  %v3042_v47 = vpop.f32.mrf.mxu1 }
 0x28a   : > { %v3469_v50 = vmul.f32 %v5870_v22, %v3453_v57  ;;  %3438 = vst.msk [vmem:[#allocation2 + $0x50] sm:$0xff] %vm210_vm2, %v3422_v15  ;;  %v2927_v63 = vld [vmem:[#allocation2 + $0x68] sm:$0xff] }
 0x28b   : > { %2896 = vst.msk [vmem:[#allocation2 + $0x70] sm:$0xff] %vm210_vm2, %v2880_v62  ;;  %v3061_v38 = vadd.f32 %v3039_v5, %v2927_v63  ;;  %v3692_v63 = vld [vmem:[%s4992_s15] sm:$0xff] (%p4640_p5) }
 0x28c   : > { %v3485_v34 = vadd.f32 %v5883_v51, %v3469_v50  ;;  %v3108_v0 = vld [vmem:[#allocation2 + $0x60] sm:$0xff]  ;;  %3693 = vst [vmem:[%s6170_s9] sm:$0xff] (%p4640_p5), %v3692_v63 }
 0x28d   : > { %3077 = vst.msk [vmem:[#allocation2 + $0x68] sm:$0xff] %vm210_vm2, %v3061_v38  ;;  %v3242_v59 = vadd.f32 %v3218_v48, %v3108_v0  ;;  %v3694_v38 = vld [vmem:[%s4992_s15 + $0x8] sm:$0xff] (%p4640_p5)  ;;  %v3698_v0 = vld [vmem:[%s4992_s15 + $0x18] sm:$0xff] (%p4640_p5) }
 0x28e   : > { %v3501_v42 = vmax.f32 %v3485_v34, 0.0  ;;  %v3224_v4 = vpop.f32.mrf.mxu2  ;;  %v3696_v34 = vld [vmem:[%s4992_s15 + $0x10] sm:$0xff] (%p4640_p5)  ;;  %3695 = vst [vmem:[%s6170_s9 + $0x8] sm:$0xff] (%p4640_p5), %v3694_v38 }
 0x28f   : > { %3258 = vst.msk [vmem:[#allocation2 + $0x60] sm:$0xff] %vm210_vm2, %v3242_v59  ;;  %v3289_v1 = vld [vmem:[#allocation2 + $0x58] sm:$0xff]  ;;  %v3406_v10 = vpop.f32.mrf.mxu3  ;;  %v3700_v59 = vld [vmem:[%s4992_s15 + $0x20] sm:$0xff] (%p4640_p5) }
 0x290   : > { %4431 = vst.msk [vmem:[%s4992_s15 + $0x1c8] sm:$0xff] %vm210_vm2, %v3501_v42  ;;  %v3423_v30 = vadd.f32 %v3397_v23, %v3289_v1  ;;  %v2863_v25 = vpop.f32.mrf.mxu0  ;;  %v3702_v42 = vld [vmem:[%s4992_s15 + $0x28] sm:$0xff] (%p4640_p5) }
 0x291   : > { %v3454_v19 = vld [vmem:[#allocation2 + $0x50] sm:$0xff]  ;;  %v2881_v11 = vadd.f32 %v2863_v25, %v2747_v60  ;;  %v3045_v36 = vpop.f32.mrf.mxu1  ;;  %3697 = vst [vmem:[%s6170_s9 + $0x10] sm:$0xff] (%p4640_p5), %v3696_v34  ;;  %v3710_v1 = vld [vmem:[%s4992_s15 + $0x48] sm:$0xff] (%p4640_p5)  ;;  %v3716_v25 = vld [vmem:[%s4992_s15 + $0x60] sm:$0xff] (%p4640_p5) }
 0x292   : > { %v3470_v24 = vmul.f32 %v5870_v22, %v3454_v19  ;;  %3439 = vst.msk [vmem:[#allocation2 + $0x58] sm:$0xff] %vm210_vm2, %v3423_v30  ;;  %v2928_v58 = vld [vmem:[#allocation2 + $0x70] sm:$0xff]  ;;  %v3714_v30 = vld [vmem:[%s4992_s15 + $0x58] sm:$0xff] (%p4640_p5)  ;;  %v3718_v19 = vld [vmem:[%s4992_s15 + $0x68] sm:$0xff] (%p4640_p5) }
 0x293   : > { %2897 = vst.msk [vmem:[#allocation2 + $0x78] sm:$0xff] %vm210_vm2, %v2881_v11  ;;  %v3062_v2 = vadd.f32 %v3042_v47, %v2928_v58  ;;  %v3704_v60 = vld [vmem:[%s4992_s15 + $0x30] sm:$0xff] (%p4640_p5)  ;;  %v3706_v47 = vld [vmem:[%s4992_s15 + $0x38] sm:$0xff] (%p4640_p5)  ;;  %v3724_v58 = vld [vmem:[%s4992_s15 + $0x80] sm:$0xff] (%p4640_p5) }
 0x294   : > { %v3486_v8 = vadd.f32 %v5883_v51, %v3470_v24  ;;  %v3109_v61 = vld [vmem:[#allocation2 + $0x68] sm:$0xff]  ;;  %3699 = vst [vmem:[%s6170_s9 + $0x18] sm:$0xff] (%p4640_p5), %v3698_v0  ;;  %v3720_v11 = vld [vmem:[%s4992_s15 + $0x70] sm:$0xff] (%p4640_p5)  ;;  %v3722_v24 = vld [vmem:[%s4992_s15 + $0x78] sm:$0xff] (%p4640_p5) }
 0x295   : > { %3078 = vst.msk [vmem:[#allocation2 + $0x70] sm:$0xff] %vm210_vm2, %v3062_v2  ;;  %v3243_v41 = vadd.f32 %v3221_v3, %v3109_v61  ;;  %v3708_v3 = vld [vmem:[%s4992_s15 + $0x40] sm:$0xff] (%p4640_p5)  ;;  %v3726_v2 = vld [vmem:[%s4992_s15 + $0x88] sm:$0xff] (%p4640_p5)  ;;  %v3730_v61 = vld [vmem:[%s4992_s15 + $0x98] sm:$0xff] (%p4640_p5) }
 0x296   : > { %v3502_v12 = vmax.f32 %v3486_v8, 0.0  ;;  %v3290_v44 = vld [vmem:[#allocation2 + $0x60] sm:$0xff]  ;;  %v3227_v21 = vpop.f32.mrf.mxu2  ;;  %3701 = vst [vmem:[%s6170_s9 + $0x20] sm:$0xff] (%p4640_p5), %v3700_v59  ;;  %v3728_v8 = vld [vmem:[%s4992_s15 + $0x90] sm:$0xff] (%p4640_p5) }
 0x297   : > { %3259 = vst.msk [vmem:[#allocation2 + $0x68] sm:$0xff] %vm210_vm2, %v3243_v41  ;;  %v3424_v20 = vadd.f32 %v3400_v28, %v3290_v44  ;;  %v3409_v48 = vpop.f32.mrf.mxu3  ;;  %v3712_v28 = vld [vmem:[%s4992_s15 + $0x50] sm:$0xff] (%p4640_p5)  ;;  %v3732_v41 = vld [vmem:[%s4992_s15 + $0xa0] sm:$0xff] (%p4640_p5) }
 0x298   : > { %4432 = vst.msk [vmem:[%s4992_s15 + $0x1d0] sm:$0xff] %vm210_vm2, %v3502_v12  ;;  %v3734_v12 = vld [vmem:[%s4992_s15 + $0xa8] sm:$0xff] (%p4640_p5)  ;;  %v3736_v44 = vld [vmem:[%s4992_s15 + $0xb0] sm:$0xff] (%p4640_p5) }
 0x299   : > { %v3455_v14 = vld [vmem:[#allocation2 + $0x58] sm:$0xff]  ;;  %3440 = vst.msk [vmem:[#allocation2 + $0x60] sm:$0xff] %vm210_vm2, %v3424_v20 }
 0x29a   : > { %v3471_v16 = vmul.f32 %v5870_v22, %v3455_v14  ;;  %v2929_v54 = vld [vmem:[#allocation2 + $0x78] sm:$0xff]  ;;  %3703 = vst [vmem:[%s6170_s9 + $0x28] sm:$0xff] (%p4640_p5), %v3702_v42  ;;  %v3744_v14 = vld [vmem:[%s4992_s15 + $0xd0] sm:$0xff] (%p4640_p5) }
 0x29b   : > { %v3063_v46 = vadd.f32 %v3045_v36, %v2929_v54  ;;  %3705 = vst [vmem:[%s6170_s9 + $0x30] sm:$0xff] (%p4640_p5), %v3704_v60  ;;  %v3738_v20 = vld [vmem:[%s4992_s15 + $0xb8] sm:$0xff] (%p4640_p5)  ;;  %v3740_v36 = vld [vmem:[%s4992_s15 + $0xc0] sm:$0xff] (%p4640_p5)  ;;  %v3750_v54 = vld [vmem:[%s4992_s15 + $0xe8] sm:$0xff] (%p4640_p5) }
 0x29c   : > { %v3487_v13 = vadd.f32 %v5883_v51, %v3471_v16  ;;  %v3110_v33 = vld [vmem:[#allocation2 + $0x70] sm:$0xff]  ;;  %3707 = vst [vmem:[%s6170_s9 + $0x38] sm:$0xff] (%p4640_p5), %v3706_v47  ;;  %v3748_v16 = vld [vmem:[%s4992_s15 + $0xe0] sm:$0xff] (%p4640_p5) }
 0x29d   : > { %3079 = vst.msk [vmem:[#allocation2 + $0x78] sm:$0xff] %vm210_vm2, %v3063_v46  ;;  %v3244_v26 = vadd.f32 %v3224_v4, %v3110_v33  ;;  %v3742_v4 = vld [vmem:[%s4992_s15 + $0xc8] sm:$0xff] (%p4640_p5)  ;;  %v3752_v46 = vld [vmem:[%s4992_s15 + $0xf0] sm:$0xff] (%p4640_p5)  ;;  %v3756_v33 = vld [vmem:[%s4992_s15 + $0x100] sm:$0xff] (%p4640_p5) }
 0x29e   : > { %v3503_v49 = vmax.f32 %v3487_v13, 0.0  ;;  %v3291_v17 = vld [vmem:[#allocation2 + $0x68] sm:$0xff]  ;;  %3709 = vst [vmem:[%s6170_s9 + $0x40] sm:$0xff] (%p4640_p5), %v3708_v3  ;;  %v3754_v13 = vld [vmem:[%s4992_s15 + $0xf8] sm:$0xff] (%p4640_p5) }
 0x29f   : > { %3260 = vst.msk [vmem:[#allocation2 + $0x70] sm:$0xff] %vm210_vm2, %v3244_v26  ;;  %v3425_v18 = vadd.f32 %v3403_v9, %v3291_v17  ;;  %v3746_v9 = vld [vmem:[%s4992_s15 + $0xd8] sm:$0xff] (%p4640_p5)  ;;  %v3758_v26 = vld [vmem:[%s4992_s15 + $0x108] sm:$0xff] (%p4640_p5) }
 0x2a0   : > { %4433 = vst.msk [vmem:[%s4992_s15 + $0x1d8] sm:$0xff] %vm210_vm2, %v3503_v49  ;;  %v3456_v29 = vld [vmem:[#allocation2 + $0x60] sm:$0xff]  ;;  %v3760_v49 = vld [vmem:[%s4992_s15 + $0x110] sm:$0xff] (%p4640_p5)  ;;  %v3762_v17 = vld [vmem:[%s4992_s15 + $0x118] sm:$0xff] (%p4640_p5) }
 0x2a1   : > { %v3472_v52 = vmul.f32 %v5870_v22, %v3456_v29  ;;  %3441 = vst.msk [vmem:[#allocation2 + $0x68] sm:$0xff] %vm210_vm2, %v3425_v18  ;;  %v4510_v22 = vld [vmem:[%s6321_s2] ss:$0 sm:$0xff]  ;;  %v3766_v29 = vld [vmem:[%s4992_s15 + $0x128] sm:$0xff] (%p4640_p5) }
 0x2a2   : > { %3711 = vst [vmem:[%s6170_s9 + $0x48] sm:$0xff] (%p4640_p5), %v3710_v1  ;;  %v3764_v18 = vld [vmem:[%s4992_s15 + $0x120] sm:$0xff] (%p4640_p5) }
 0x2a3   : > { %v3488_v32 = vadd.f32 %v5883_v51, %v3472_v52  ;;  %v4511_v51 = vld [vmem:[%s6322_s3] ss:$0 sm:$0xff]  ;;  %3713 = vst [vmem:[%s6170_s9 + $0x50] sm:$0xff] (%p4640_p5), %v3712_v28  ;;  %v3768_v52 = vld [vmem:[%s4992_s15 + $0x130] sm:$0xff] (%p4640_p5) }
 0x2a4   : > { %v3111_v35 = vld [vmem:[#allocation2 + $0x78] sm:$0xff]  ;;  %3715 = vst [vmem:[%s6170_s9 + $0x58] sm:$0xff] (%p4640_p5), %v3714_v30 }
 0x2a5   : > { %v3504_v37 = vmax.f32 %v3488_v32, 0.0  ;;  %v3245_v39 = vadd.f32 %v3227_v21, %v3111_v35  ;;  %3717 = vst [vmem:[%s6170_s9 + $0x60] sm:$0xff] (%p4640_p5), %v3716_v25  ;;  %v3770_v21 = vld [vmem:[%s4992_s15 + $0x138] sm:$0xff] (%p4640_p5)  ;;  %v3772_v32 = vld [vmem:[%s4992_s15 + $0x140] sm:$0xff] (%p4640_p5)  ;;  %v3776_v35 = vld [vmem:[%s4992_s15 + $0x150] sm:$0xff] (%p4640_p5) }
 0x2a6   : > { %v3292_v40 = vld [vmem:[#allocation2 + $0x70] sm:$0xff]  ;;  %3719 = vst [vmem:[%s6170_s9 + $0x68] sm:$0xff] (%p4640_p5), %v3718_v19 }
 0x2a7   : > { %4434 = vst.msk [vmem:[%s4992_s15 + $0x1e0] sm:$0xff] %vm210_vm2, %v3504_v37  ;;  %v3426_v45 = vadd.f32 %v3406_v10, %v3292_v40  ;;  %v3774_v10 = vld [vmem:[%s4992_s15 + $0x148] sm:$0xff] (%p4640_p5)  ;;  %v3778_v37 = vld [vmem:[%s4992_s15 + $0x158] sm:$0xff] (%p4640_p5) }
 0x2a8   : > { %v3457_v7 = vld [vmem:[#allocation2 + $0x68] sm:$0xff]  ;;  %3261 = vst.msk [vmem:[#allocation2 + $0x78] sm:$0xff] %vm210_vm2, %v3245_v39  ;;  %v3780_v39 = vld [vmem:[%s4992_s15 + $0x160] sm:$0xff] (%p4640_p5) }
 0x2a9   : > { %v3473_v55 = vmul.f32 %v4510_v22, %v3457_v7  ;;  %3442 = vst.msk [vmem:[#allocation2 + $0x70] sm:$0xff] %vm210_vm2, %v3426_v45  ;;  %v3782_v40 = vld [vmem:[%s4992_s15 + $0x168] sm:$0xff] (%p4640_p5)  ;;  %v3784_v45 = vld [vmem:[%s4992_s15 + $0x170] sm:$0xff] (%p4640_p5)  ;;  %v3786_v7 = vld [vmem:[%s4992_s15 + $0x178] sm:$0xff] (%p4640_p5) }
 0x2aa   : > { %3721 = vst [vmem:[%s6170_s9 + $0x70] sm:$0xff] (%p4640_p5), %v3720_v11 }
 0x2ab   : > { %v3489_v43 = vadd.f32 %v4511_v51, %v3473_v55  ;;  %3723 = vst [vmem:[%s6170_s9 + $0x78] sm:$0xff] (%p4640_p5), %v3722_v24  ;;  %v3790_v55 = vld [vmem:[%s4992_s15 + $0x188] sm:$0xff] (%p4640_p5) }
 0x2ac   : > { %3725 = vst [vmem:[%s6170_s9 + $0x100] sm:$0xff] (%p4640_p5), %v3724_v58 }
 0x2ad   : > { %v3505_v5 = vmax.f32 %v3489_v43, 0.0  ;;  %3727 = vst [vmem:[%s6170_s9 + $0x108] sm:$0xff] (%p4640_p5), %v3726_v2  ;;  %v3794_v43 = vld [vmem:[%s4992_s15 + $0x198] sm:$0xff] (%p4640_p5) }
 0x2ae   : > { %3729 = vst [vmem:[%s6170_s9 + $0x110] sm:$0xff] (%p4640_p5), %v3728_v8 }
 0x2af   : > { %4435 = vst.msk [vmem:[%s4992_s15 + $0x1e8] sm:$0xff] %vm210_vm2, %v3505_v5  ;;  %v3293_v27 = vld [vmem:[#allocation2 + $0x78] sm:$0xff]  ;;  %v3796_v5 = vld [vmem:[%s4992_s15 + $0x1a0] sm:$0xff] (%p4640_p5) }
 0x2b0   : > { %v3458_v53 = vld [vmem:[#allocation2 + $0x70] sm:$0xff]  ;;  %v3427_v23 = vadd.f32 %v3409_v48, %v3293_v27  ;;  %3731 = vst [vmem:[%s6170_s9 + $0x118] sm:$0xff] (%p4640_p5), %v3730_v61  ;;  %v3798_v48 = vld [vmem:[%s4992_s15 + $0x1a8] sm:$0xff] (%p4640_p5) }
 0x2b1   : > { %v3474_v6 = vmul.f32 %v4510_v22, %v3458_v53  ;;  %3733 = vst [vmem:[%s6170_s9 + $0x120] sm:$0xff] (%p4640_p5), %v3732_v41  ;;  %v3800_v27 = vld [vmem:[%s4992_s15 + $0x1b0] sm:$0xff] (%p4640_p5)  ;;  %v3802_v53 = vld [vmem:[%s4992_s15 + $0x1b8] sm:$0xff] (%p4640_p5) }
 0x2b2   : > { %3443 = vst.msk [vmem:[#allocation2 + $0x78] sm:$0xff] %vm210_vm2, %v3427_v23  ;;  %v3804_v23 = vld [vmem:[%s4992_s15 + $0x1c0] sm:$0xff] (%p4640_p5) }
 0x2b3   : > { %v3490_v31 = vadd.f32 %v4511_v51, %v3474_v6  ;;  %3735 = vst [vmem:[%s6170_s9 + $0x128] sm:$0xff] (%p4640_p5), %v3734_v12  ;;  %v3806_v6 = vld [vmem:[%s4992_s15 + $0x1c8] sm:$0xff] (%p4640_p5) }
 0x2b4   : > { %3737 = vst [vmem:[%s6170_s9 + $0x130] sm:$0xff] (%p4640_p5), %v3736_v44 }
 0x2b5   : > { %v3506_v15 = vmax.f32 %v3490_v31, 0.0  ;;  %3739 = vst [vmem:[%s6170_s9 + $0x138] sm:$0xff] (%p4640_p5), %v3738_v20  ;;  %v3808_v31 = vld [vmem:[%s4992_s15 + $0x1d0] sm:$0xff] (%p4640_p5) }
 0x2b6   : > { %3741 = vst [vmem:[%s6170_s9 + $0x140] sm:$0xff] (%p4640_p5), %v3740_v36 }
 0x2b7   : > { %4436 = vst.msk [vmem:[%s4992_s15 + $0x1f0] sm:$0xff] %vm210_vm2, %v3506_v15  ;;  %v3810_v15 = vld [vmem:[%s4992_s15 + $0x1d8] sm:$0xff] (%p4640_p5) }
 0x2b8   : > { %3743 = vst [vmem:[%s6170_s9 + $0x148] sm:$0xff] (%p4640_p5), %v3742_v4 }
 0x2b9   : > { %v3459_v56 = vld [vmem:[#allocation2 + $0x78] sm:$0xff]  ;;  %3745 = vst [vmem:[%s6170_s9 + $0x150] sm:$0xff] (%p4640_p5), %v3744_v14 }
 0x2ba   : > { %v3475_v57 = vmul.f32 %v4510_v22, %v3459_v56  ;;  %3747 = vst [vmem:[%s6170_s9 + $0x158] sm:$0xff] (%p4640_p5), %v3746_v9  ;;  %v3788_v22 = vld [vmem:[%s4992_s15 + $0x180] sm:$0xff] (%p4640_p5) }
 0x2bb   : > { %3749 = vst [vmem:[%s6170_s9 + $0x160] sm:$0xff] (%p4640_p5), %v3748_v16  ;;  %v3812_v56 = vld [vmem:[%s4992_s15 + $0x1e0] sm:$0xff] (%p4640_p5) }
 0x2bc   : > { %v3491_v62 = vadd.f32 %v4511_v51, %v3475_v57  ;;  %3531 = sbr.rel (!%p4640_p5) target bundleno = 736 (0x2e0), region = 40  ;;  %3751 = vst [vmem:[%s6170_s9 + $0x168] sm:$0xff] (%p4640_p5), %v3750_v54  ;;  %v3792_v51 = vld [vmem:[%s4992_s15 + $0x190] sm:$0xff] (%p4640_p5)  ;;  %v3814_v57 = vld [vmem:[%s4992_s15 + $0x1e8] sm:$0xff] (%p4640_p5) }
 0x2bd   : > { %3753 = vst [vmem:[%s6170_s9 + $0x170] sm:$0xff] (%p4640_p5), %v3752_v46 }
 0x2be   : > { %v3507_v50 = vmax.f32 %v3491_v62, 0.0  ;;  %3755 = vst [vmem:[%s6170_s9 + $0x178] sm:$0xff] (%p4640_p5), %v3754_v13  ;;  %v3816_v62 = vld [vmem:[%s4992_s15 + $0x1f0] sm:$0xff] (%p4640_p5) }
 0x2bf   : > { %3757 = vst [vmem:[%s6170_s9 + $0x200] sm:$0xff] (%p4640_p5), %v3756_v33 }
 0x2c0   : > { %4437 = vst.msk [vmem:[%s4992_s15 + $0x1f8] sm:$0xff] %vm210_vm2, %v3507_v50 }
 0x2c1   : > { %3759 = vst [vmem:[%s6170_s9 + $0x208] sm:$0xff] %v3758_v26 }
 0x2c2   : > { %3761 = vst [vmem:[%s6170_s9 + $0x210] sm:$0xff] %v3760_v49 }
 0x2c3   : > { %3763 = vst [vmem:[%s6170_s9 + $0x218] sm:$0xff] %v3762_v17 }
 0x2c4   : > { %3765 = vst [vmem:[%s6170_s9 + $0x220] sm:$0xff] %v3764_v18 }
 0x2c5   : > { %3767 = vst [vmem:[%s6170_s9 + $0x228] sm:$0xff] %v3766_v29 }
 0x2c6   : > { %3769 = vst [vmem:[%s6170_s9 + $0x230] sm:$0xff] %v3768_v52 }
 0x2c7   : > { %3771 = vst [vmem:[%s6170_s9 + $0x238] sm:$0xff] %v3770_v21  ;;  %v3818_v50 = vld [vmem:[%s4992_s15 + $0x1f8] sm:$0xff] }
 0x2c8   : > { %3773 = vst [vmem:[%s6170_s9 + $0x240] sm:$0xff] %v3772_v32 }
 0x2c9   : > { %3775 = vst [vmem:[%s6170_s9 + $0x248] sm:$0xff] %v3774_v10 }
 0x2ca   : > { %3777 = vst [vmem:[%s6170_s9 + $0x250] sm:$0xff] %v3776_v35 }
 0x2cb   : > { %3779 = vst [vmem:[%s6170_s9 + $0x258] sm:$0xff] %v3778_v37 }
 0x2cc   : > { %3781 = vst [vmem:[%s6170_s9 + $0x260] sm:$0xff] %v3780_v39 }
 0x2cd   : > { %3783 = vst [vmem:[%s6170_s9 + $0x268] sm:$0xff] %v3782_v40 }
 0x2ce   : > { %3785 = vst [vmem:[%s6170_s9 + $0x270] sm:$0xff] %v3784_v45 }
 0x2cf   : > { %3787 = vst [vmem:[%s6170_s9 + $0x278] sm:$0xff] %v3786_v7 }
 0x2d0   : > { %3789 = vst [vmem:[%s6170_s9 + $0x300] sm:$0xff] %v3788_v22 }
 0x2d1   : > { %3791 = vst [vmem:[%s6170_s9 + $0x308] sm:$0xff] %v3790_v55 }
 0x2d2   : > { %3793 = vst [vmem:[%s6170_s9 + $0x310] sm:$0xff] %v3792_v51 }
 0x2d3   : > { %3795 = vst [vmem:[%s6170_s9 + $0x318] sm:$0xff] %v3794_v43 }
 0x2d4   : > { %3797 = vst [vmem:[%s6170_s9 + $0x320] sm:$0xff] %v3796_v5 }
 0x2d5   : > { %3799 = vst [vmem:[%s6170_s9 + $0x328] sm:$0xff] %v3798_v48 }
 0x2d6   : > { %3801 = vst [vmem:[%s6170_s9 + $0x330] sm:$0xff] %v3800_v27 }
 0x2d7   : > { %3803 = vst [vmem:[%s6170_s9 + $0x338] sm:$0xff] %v3802_v53 }
 0x2d8   : > { %3805 = vst [vmem:[%s6170_s9 + $0x340] sm:$0xff] %v3804_v23 }
 0x2d9   : > { %3807 = vst [vmem:[%s6170_s9 + $0x348] sm:$0xff] %v3806_v6 }
 0x2da   : > { %3809 = vst [vmem:[%s6170_s9 + $0x350] sm:$0xff] %v3808_v31 }
 0x2db   : > { %3811 = vst [vmem:[%s6170_s9 + $0x358] sm:$0xff] %v3810_v15 }
 0x2dc   : > { %3813 = vst [vmem:[%s6170_s9 + $0x360] sm:$0xff] %v3812_v56 }
 0x2dd   : > { %3815 = vst [vmem:[%s6170_s9 + $0x368] sm:$0xff] %v3814_v57 }
 0x2de   : > { %3817 = vst [vmem:[%s6170_s9 + $0x370] sm:$0xff] %v3816_v62 }
 0x2df   : > { %3819 = vst [vmem:[%s6170_s9 + $0x378] sm:$0xff] %v3818_v50 }
 0x2e0 PF: > { %s14_s21 = sadd.s32 1, %s4566_s21   ;;  %s6325_s15 = smov %s4546_s16 }
 0x2e1   : > { %p11_p10 = scmp.ge.s32.totalorder %s14_s21, 6   ;;  %s6326_s16 = smov %s4651_s30 }
 0x2e2   : > { %s6327_s17 = smov %s4558_s19  ;;  %s6328_s18 = smov %s4562_s20 }
 0x2e3   : > { %s6329_s19 = smov %s6332_s22  ;;  %s6330_s20 = smov %s6336_s23 }
 0x2e4   :  { %13 = sbr.rel (!%p11_p10) target bundleno = 4 (0x4), region = 125 }

</bundles_post_ra>
